<compile_context>
chip_gen: v6e
topology: v6e:2x2x1
jax: 0.10.0
libtpu: 0.0.40
codegen_flags: <defaults>
</compile_context>

<pallas_src>
import functools

import jax
import jax.numpy as jnp
from jax.experimental import pallas as pl
from jax.experimental.pallas import tpu as pltpu

IN_DIM = 64 * 64 * 3   # 12288
H1 = 128
H2 = 64
OUT = 10
LANE = 128             # lane-dense padded width for layers 2/3 and the output


def _round_up(x, m):
    return ((x + m - 1) // m) * m


def _mlp_kernel(x_ref, w1_ref, b1_ref, w2_ref, b2_ref, w3_ref, b3_ref, o_ref):
    # Full 3-layer MLP hot path; compute is entirely hidden under the x DMA.
    x = x_ref[...]                                   # (tm, 12288), compute dtype
    h1 = jnp.dot(x, w1_ref[...], preferred_element_type=jnp.float32) + b1_ref[...]
    h1 = jnp.maximum(h1, 0.0)                        # ReLU, f32, (tm, 128)
    h2 = jnp.dot(h1, w2_ref[...], preferred_element_type=jnp.float32) + b2_ref[...]
    h2 = jnp.maximum(h2, 0.0)                        # ReLU, f32, (tm, 128) lane-dense
    out = jnp.dot(h2, w3_ref[...], preferred_element_type=jnp.float32) + b3_ref[...]
    o_ref[...] = out.astype(o_ref.dtype)             # (tm, 128) lane-dense store


def prepare_params(params, compute_dtype=jnp.bfloat16):
    """One-time parameter prep (do NOT call per forward).

    Casts W1 to the compute dtype and zero-pads layers 2/3 to 128 lanes so the
    per-call path never re-casts or re-pads weights. Numerically identical to
    the unpadded model: padded h2 columns are ReLU(0)=0 and the padded W3 rows
    are zero.
    """
    w1, b1, w2, b2, w3, b3 = params
    w1c = w1.astype(compute_dtype)                                        # (12288, 128)
    b1f = jnp.reshape(b1, (1, H1)).astype(jnp.float32)                    # (1, 128)
    w2p = jnp.pad(w2.astype(jnp.float32), ((0, 0), (0, LANE - H2)))       # (128, 128)
    b2p = jnp.pad(jnp.reshape(b2, (1, H2)).astype(jnp.float32),
                  ((0, 0), (0, LANE - H2)))                               # (1, 128)
    w3p = jnp.pad(w3.astype(jnp.float32),
                  ((0, LANE - H2), (0, LANE - OUT)))                      # (128, 128)
    b3p = jnp.pad(jnp.reshape(b3, (1, OUT)).astype(jnp.float32),
                  ((0, 0), (0, LANE - OUT)))                              # (1, 128)
    return (w1c, b1f, w2p, b2p, w3p, b3p)


@functools.partial(jax.jit, static_argnames=("tm",))
def _forward(x_nchw, w1, b1, w2, b2, w3, b3, *, tm):
    n = x_nchw.shape[0]
    compute_dtype = w1.dtype
    # Reshape + (no-op if already matching) cast in one fused XLA pass; no pad.
    x = x_nchw.reshape(n, IN_DIM).astype(compute_dtype)

    grid = (pl.cdiv(n, tm),)

    x_bytes = jnp.dtype(compute_dtype).itemsize
    flops = 2 * n * (IN_DIM * H1 + H1 * LANE + LANE * LANE)
    bytes_accessed = (
        n * IN_DIM * x_bytes            # streamed x
        + n * LANE * 4                  # streamed output
        + IN_DIM * H1 * x_bytes         # W1 (read once, resident)
        + 2 * LANE * LANE * 4           # W2, W3
        + 3 * LANE * 4                  # biases
    )

    out = pl.pallas_call(
        _mlp_kernel,
        out_shape=jax.ShapeDtypeStruct((n, LANE), jnp.float32),
        grid_spec=pltpu.PrefetchScalarGridSpec(
            num_scalar_prefetch=0,
            grid=grid,
            in_specs=[
                pl.BlockSpec((tm, IN_DIM), lambda i: (i, 0)),    # x tile (streamed)
                pl.BlockSpec((IN_DIM, H1), lambda i: (0, 0)),    # W1 (resident)
                pl.BlockSpec((1, H1),      lambda i: (0, 0)),    # b1
                pl.BlockSpec((H1, LANE),   lambda i: (0, 0)),    # W2 (padded, resident)
                pl.BlockSpec((1, LANE),    lambda i: (0, 0)),    # b2 (padded)
                pl.BlockSpec((LANE, LANE), lambda i: (0, 0)),    # W3 (padded, resident)
                pl.BlockSpec((1, LANE),    lambda i: (0, 0)),    # b3 (padded)
            ],
            out_specs=pl.BlockSpec((tm, LANE), lambda i: (i, 0)),
        ),
        compiler_params=pltpu.CompilerParams(
            dimension_semantics=("parallel",),      # megacore-shardable batch axis
            vmem_limit_bytes=48 << 20,              # > 16/32 MiB defaults, < v7x 64 MiB
        ),
        cost_estimate=pl.CostEstimate(
            flops=flops, transcendentals=0, bytes_accessed=bytes_accessed),
    )(x, w1, b1, w2, b2, w3, b3)

    return out[:, :OUT]


def dog_classifier_fc(x_nchw, prepared_params, *, tm=None):
    """Forward pass. x_nchw: (N, 3, 64, 64). Returns (N, 10) f32 logits.

    prepared_params: output of prepare_params() (cast/padded once, reused).
    tm: batch tile (multiple of 16). Default is adaptive: big tiles (up to 512
        for bf16 / 256 for f32 streaming) for large batches, shrunk for small
        batches, and >= 2 grid steps whenever n >= 32 so v7x's two TensorCores
        both run.
    """
    n = x_nchw.shape[0]
    compute_dtype = prepared_params[0].dtype
    if tm is None:
        tm_max = 512 if jnp.dtype(compute_dtype).itemsize <= 2 else 256
        tm = min(tm_max, max(16, _round_up(pl.cdiv(n, 2), 16)))
    assert tm % 16 == 0, "batch tile must be a multiple of 16 (bf16 sublane packing)"
    return _forward(x_nchw, *prepared_params, tm=tm)


def init_params(key):
    """Deterministic init mimicking nn.Linear defaults (U[-1/sqrt(fan_in), 1/sqrt(fan_in)]).
    Weights are stored transposed: (in_features, out_features)."""
    ks = jax.random.split(key, 6)

    def layer(kw, kb, fan_in, fan_out):
        bound = 1.0 / jnp.sqrt(jnp.float32(fan_in))
        w = jax.random.uniform(kw, (fan_in, fan_out), jnp.float32, -bound, bound)
        b = jax.random.uniform(kb, (1, fan_out), jnp.float32, -bound, bound)
        return w, b

    w1, b1 = layer(ks[0], ks[1], IN_DIM, H1)
    w2, b2 = layer(ks[2], ks[3], H1, H2)
    w3, b3 = layer(ks[4], ks[5], H2, OUT)
    return (w1, b1, w2, b2, w3, b3)


def _ref_forward(x_nchw, params, x_dtype=jnp.float32):
    """Pure-JAX reference. x_dtype lets us reproduce the kernel's bf16 first layer."""
    w1, b1, w2, b2, w3, b3 = params
    x = x_nchw.reshape(x_nchw.shape[0], IN_DIM).astype(x_dtype)
    h1 = jnp.dot(x, w1.astype(x_dtype), preferred_element_type=jnp.float32) + b1
    h1 = jnp.maximum(h1, 0.0)
    h2 = jnp.maximum(h1 @ w2 + b2, 0.0)
    return h2 @ w3 + b3


if __name__ == "__main__":
    key = jax.random.PRNGKey(0)
    k_params, k_x = jax.random.split(key)

    params = init_params(k_params)
    prepared = prepare_params(params, compute_dtype=jnp.bfloat16)  # one-time cast/pad

    # Small batch, full DogSet image shape (NCHW) as implied by reshape(-1, 12288).
    x = jax.random.normal(k_x, (16, 3, 64, 64), dtype=jnp.float32)

    out = dog_classifier_fc(x, prepared)      # adaptive tm; no wrapper-side padding of x
    out = jax.block_until_ready(out)
    assert out.shape == (16, OUT), out.shape

    # Tight check against a reference with the same bf16 first-layer numerics.
    ref_matched = _ref_forward(x, params, x_dtype=jnp.bfloat16)
    assert jnp.allclose(out, ref_matched, atol=2e-3, rtol=2e-3), \
        "mismatch vs matched-precision reference"

    # Loose sanity check against the exact f32 PyTorch-equivalent forward.
    ref_f32 = _ref_forward(x, params, x_dtype=jnp.float32)
    assert jnp.allclose(out, ref_f32, atol=5e-2, rtol=5e-2), "mismatch vs f32 reference"

    print("KERNEL_OK")
</pallas_src>

<mosaic_0001>
module attributes {stable_mosaic.version = 11 : i64} {
  func.func @_mlp_kernel(%arg0: i32, %arg1: memref<16x12288xbf16, #tpu.memory_space<vmem>>, %arg2: memref<12288x128xbf16, #tpu.memory_space<vmem>>, %arg3: memref<1x128xf32, #tpu.memory_space<vmem>>, %arg4: memref<128x128xf32, #tpu.memory_space<vmem>>, %arg5: memref<1x128xf32, #tpu.memory_space<vmem>>, %arg6: memref<128x128xf32, #tpu.memory_space<vmem>>, %arg7: memref<1x128xf32, #tpu.memory_space<vmem>>, %arg8: memref<16x128xf32, #tpu.memory_space<vmem>>) attributes {dimension_semantics = [#tpu.dimension_semantics<parallel>], iteration_bounds = array<i64: 1>, scalar_prefetch = 0 : i64, scratch_operands = 0 : i64, tpu.core_type = #tpu.core_type<tc>, window_params = [{transform_indices = @transform_0, window_bounds = array<i64: 16, 12288>}, {pipeline_mode = #tpu.pipeline_mode<synchronous>, transform_indices = @transform_1, window_bounds = array<i64: 12288, 128>}, {pipeline_mode = #tpu.pipeline_mode<synchronous>, transform_indices = @transform_2, window_bounds = array<i64: 1, 128>}, {pipeline_mode = #tpu.pipeline_mode<synchronous>, transform_indices = @transform_3, window_bounds = array<i64: 128, 128>}, {pipeline_mode = #tpu.pipeline_mode<synchronous>, transform_indices = @transform_4, window_bounds = array<i64: 1, 128>}, {pipeline_mode = #tpu.pipeline_mode<synchronous>, transform_indices = @transform_5, window_bounds = array<i64: 128, 128>}, {pipeline_mode = #tpu.pipeline_mode<synchronous>, transform_indices = @transform_6, window_bounds = array<i64: 1, 128>}, {transform_indices = @transform_7, window_bounds = array<i64: 16, 128>}]} {
    %c0 = arith.constant 0 : index
    %c0_0 = arith.constant 0 : index
    %0 = vector.load %arg1[%c0, %c0_0] : memref<16x12288xbf16, #tpu.memory_space<vmem>>, vector<16x12288xbf16>
    %c0_1 = arith.constant 0 : index
    %c0_2 = arith.constant 0 : index
    %1 = vector.load %arg2[%c0_1, %c0_2] : memref<12288x128xbf16, #tpu.memory_space<vmem>>, vector<12288x128xbf16>
    %cst = arith.constant dense<0.000000e+00> : vector<16x128xf32>
    %2 = tpu.matmul %0, %1, %cst {dimension_numbers = #tpu.dot_dimension_numbers<[1], [0], [0], [1], [0, 0, 1, 1], [], []>} : vector<16x12288xbf16>, vector<12288x128xbf16>, vector<16x128xf32> -> vector<16x128xf32>
    %c0_3 = arith.constant 0 : index
    %c0_4 = arith.constant 0 : index
    %3 = vector.load %arg3[%c0_3, %c0_4] : memref<1x128xf32, #tpu.memory_space<vmem>>, vector<1x128xf32>
    %4 = vector.broadcast %3 : vector<1x128xf32> to vector<16x128xf32>
    %5 = arith.addf %2, %4 : vector<16x128xf32>
    %cst_5 = arith.constant 0.000000e+00 : f32
    %6 = vector.broadcast %cst_5 : f32 to vector<16x128xf32>
    %7 = arith.maximumf %5, %6 : vector<16x128xf32>
    %c0_6 = arith.constant 0 : index
    %c0_7 = arith.constant 0 : index
    %8 = vector.load %arg4[%c0_6, %c0_7] : memref<128x128xf32, #tpu.memory_space<vmem>>, vector<128x128xf32>
    %cst_8 = arith.constant dense<0.000000e+00> : vector<16x128xf32>
    %9 = tpu.matmul %7, %8, %cst_8 {dimension_numbers = #tpu.dot_dimension_numbers<[1], [0], [0], [1], [0, 0, 1, 1], [], []>} : vector<16x128xf32>, vector<128x128xf32>, vector<16x128xf32> -> vector<16x128xf32>
    %c0_9 = arith.constant 0 : index
    %c0_10 = arith.constant 0 : index
    %10 = vector.load %arg5[%c0_9, %c0_10] : memref<1x128xf32, #tpu.memory_space<vmem>>, vector<1x128xf32>
    %11 = vector.broadcast %10 : vector<1x128xf32> to vector<16x128xf32>
    %12 = arith.addf %9, %11 : vector<16x128xf32>
    %cst_11 = arith.constant 0.000000e+00 : f32
    %13 = vector.broadcast %cst_11 : f32 to vector<16x128xf32>
    %14 = arith.maximumf %12, %13 : vector<16x128xf32>
    %c0_12 = arith.constant 0 : index
    %c0_13 = arith.constant 0 : index
    %15 = vector.load %arg6[%c0_12, %c0_13] : memref<128x128xf32, #tpu.memory_space<vmem>>, vector<128x128xf32>
    %cst_14 = arith.constant dense<0.000000e+00> : vector<16x128xf32>
    %16 = tpu.matmul %14, %15, %cst_14 {dimension_numbers = #tpu.dot_dimension_numbers<[1], [0], [0], [1], [0, 0, 1, 1], [], []>} : vector<16x128xf32>, vector<128x128xf32>, vector<16x128xf32> -> vector<16x128xf32>
    %c0_15 = arith.constant 0 : index
    %c0_16 = arith.constant 0 : index
    %17 = vector.load %arg7[%c0_15, %c0_16] : memref<1x128xf32, #tpu.memory_space<vmem>>, vector<1x128xf32>
    %18 = vector.broadcast %17 : vector<1x128xf32> to vector<16x128xf32>
    %19 = arith.addf %16, %18 : vector<16x128xf32>
    %c0_17 = arith.constant 0 : index
    %c0_18 = arith.constant 0 : index
    %20 = vector.load %arg8[%c0_17, %c0_18] : memref<16x128xf32, #tpu.memory_space<vmem>>, vector<16x128xf32>
    tpu.vector_store %arg8[%c0_17, %c0_18], %19 {strides = array<i32>} : memref<16x128xf32, #tpu.memory_space<vmem>>, vector<16x128xf32>,
    return
  }
  func.func @transform_0(%arg0: i32) -> (i32, i32) {
    %c0_i32 = arith.constant 0 : i32
    %c0_i32_0 = arith.constant 0 : i32
    return %arg0, %c0_i32 : i32, i32
  }
  func.func @transform_1(%arg0: i32) -> (i32, i32) {
    %c0_i32 = arith.constant 0 : i32
    %c0_i32_0 = arith.constant 0 : i32
    %c0_i32_1 = arith.constant 0 : i32
    return %c0_i32, %c0_i32_0 : i32, i32
  }
  func.func @transform_2(%arg0: i32) -> (i32, i32) {
    %c0_i32 = arith.constant 0 : i32
    %c0_i32_0 = arith.constant 0 : i32
    %c0_i32_1 = arith.constant 0 : i32
    return %c0_i32, %c0_i32_0 : i32, i32
  }
  func.func @transform_3(%arg0: i32) -> (i32, i32) {
    %c0_i32 = arith.constant 0 : i32
    %c0_i32_0 = arith.constant 0 : i32
    %c0_i32_1 = arith.constant 0 : i32
    return %c0_i32, %c0_i32_0 : i32, i32
  }
  func.func @transform_4(%arg0: i32) -> (i32, i32) {
    %c0_i32 = arith.constant 0 : i32
    %c0_i32_0 = arith.constant 0 : i32
    %c0_i32_1 = arith.constant 0 : i32
    return %c0_i32, %c0_i32_0 : i32, i32
  }
  func.func @transform_5(%arg0: i32) -> (i32, i32) {
    %c0_i32 = arith.constant 0 : i32
    %c0_i32_0 = arith.constant 0 : i32
    %c0_i32_1 = arith.constant 0 : i32
    return %c0_i32, %c0_i32_0 : i32, i32
  }
  func.func @transform_6(%arg0: i32) -> (i32, i32) {
    %c0_i32 = arith.constant 0 : i32
    %c0_i32_0 = arith.constant 0 : i32
    %c0_i32_1 = arith.constant 0 : i32
    return %c0_i32, %c0_i32_0 : i32, i32
  }
  func.func @transform_7(%arg0: i32) -> (i32, i32) {
    %c0_i32 = arith.constant 0 : i32
    %c0_i32_0 = arith.constant 0 : i32
    return %arg0, %c0_i32 : i32, i32
  }
}

</mosaic_0001>

<bundles_post_ra>
// kernel: _forward.1
= control target key start
LH: loop header
LB: loop body
LE: loop exit
PB: predicated region body
PF: predicated region fallthrough
CT: control target
= control target key end

     0   :  { %s14824_s0 = inlined_call_operand.vmem [shape: bf16[16,12288], index: 0, kind: input, shape index: {}]   ;;  %s14825_s1 = inlined_call_operand.vmem [shape: bf16[12288,128], index: 1, kind: input, shape index: {}]   ;;  %s14826_s2 = inlined_call_operand.vmem [shape: f32[1,128], index: 2, kind: input, shape index: {}]   ;;  %s14827_s3 = inlined_call_operand.vmem [shape: f32[128,128], index: 3, kind: input, shape index: {}]   ;;  %s14828_s4 = inlined_call_operand.vmem [shape: f32[1,128], index: 4, kind: input, shape index: {}]   ;;  %s14829_s5 = inlined_call_operand.vmem [shape: f32[128,128], index: 5, kind: input, shape index: {}]   ;;  %s14830_s6 = inlined_call_operand.vmem [shape: f32[1,128], index: 6, kind: input, shape index: {}]   ;;  %s14831_s7 = inlined_call_operand.hbm [shape: f32[16,128], index: 7, kind: output, shape index: {}]  }
   0x1   :  { %v10973_v0 = vld [vmem:[%s14825_s1 + $0x78] sm:$0xff]   ;;  %v10977_v4 = vld [vmem:[%s14825_s1 + $0x70] sm:$0xff]   ;;  %v10981_v8 = vld [vmem:[%s14825_s1 + $0x68] sm:$0xff]  }
   0x2   :  { %v10974_v1 = vld [vmem:[%s14825_s1 + $0xf8] sm:$0xff]   ;;  %9808 = vmatprep.subr.bf16.mxu0 %v10973_v0  ;;  %v10978_v5 = vld [vmem:[%s14825_s1 + $0xf0] sm:$0xff]   ;;  %v10982_v9 = vld [vmem:[%s14825_s1 + $0xe8] sm:$0xff]  }
   0x3   :  { %v10975_v2 = vld [vmem:[%s14825_s1 + $0x38] sm:$0xff]   ;;  %9830 = vmatprep.subr.bf16.mxu1 %v10974_v1  ;;  %v10979_v6 = vld [vmem:[%s14825_s1 + $0x30] sm:$0xff]   ;;  %v10983_v10 = vld [vmem:[%s14825_s1 + $0x28] sm:$0xff]  }
   0x4   :  { %v10976_v3 = vld [vmem:[%s14825_s1 + $0xb8] sm:$0xff]   ;;  %9809 = vmatpush3.bf16.msra.mxu0 %v10975_v2  ;;  %v10980_v7 = vld [vmem:[%s14825_s1 + $0xb0] sm:$0xff]   ;;  %v10984_v11 = vld [vmem:[%s14825_s1 + $0xa8] sm:$0xff]  }
   0x5   :  { %9831 = vmatpush3.bf16.msra.mxu1 %v10976_v3  ;;  %9810 = vmatprep.subr.bf16.mxu0 %v10977_v4  ;;  %v10985_v12 = vld [vmem:[%s14825_s1 + $0x60] sm:$0xff]   ;;  %v10989_v16 = vld [vmem:[%s14825_s1 + $0x58] sm:$0xff]   ;;  %v10993_v20 = vld [vmem:[%s14825_s1 + $0x50] sm:$0xff]  }
   0x6   :  { %9832 = vmatprep.subr.bf16.mxu1 %v10978_v5  ;;  %v10986_v13 = vld [vmem:[%s14825_s1 + $0xe0] sm:$0xff]   ;;  %v10990_v17 = vld [vmem:[%s14825_s1 + $0xd8] sm:$0xff]   ;;  %v10994_v21 = vld [vmem:[%s14825_s1 + $0xd0] sm:$0xff]  }
   0x7   :  { %v10987_v14 = vld [vmem:[%s14825_s1 + $0x20] sm:$0xff]   ;;  %v10991_v18 = vld [vmem:[%s14825_s1 + $0x18] sm:$0xff]   ;;  %v10995_v22 = vld [vmem:[%s14825_s1 + $0x10] sm:$0xff]  }
   0x8   :  { %9811 = vmatpush3.bf16.msra.mxu0 %v10979_v6  ;;  %v10988_v15 = vld [vmem:[%s14825_s1 + $0xa0] sm:$0xff]   ;;  %v10992_v19 = vld [vmem:[%s14825_s1 + $0x98] sm:$0xff]   ;;  %v10996_v23 = vld [vmem:[%s14825_s1 + $0x90] sm:$0xff]  }
   0x9   :  { %9833 = vmatpush3.bf16.msra.mxu1 %v10980_v7  ;;  %9812 = vmatprep.subr.bf16.mxu0 %v10981_v8  ;;  %v10997_v24 = vld [vmem:[%s14825_s1 + $0x48] sm:$0xff]   ;;  %v11001_v28 = vld [vmem:[%s14825_s1 + $0x40] sm:$0xff]   ;;  %v11005_v40 = vld [vmem:[%s14825_s1 + $0x178] sm:$0xff]  }
   0xa   :  { %9834 = vmatprep.subr.bf16.mxu1 %v10982_v9  ;;  %v10998_v25 = vld [vmem:[%s14825_s1 + $0xc8] sm:$0xff]   ;;  %v11002_v29 = vld [vmem:[%s14825_s1 + $0xc0] sm:$0xff]   ;;  %v11006_v41 = vld [vmem:[%s14825_s1 + $0x1f8] sm:$0xff]  }
   0xb   :  { %v10999_v26 = vld [vmem:[%s14825_s1 + $0x8] sm:$0xff]   ;;  %v11003_v30 = vld [vmem:[%s14825_s1] sm:$0xff]   ;;  %v11007_v42 = vld [vmem:[%s14825_s1 + $0x138] sm:$0xff]  }
   0xc   :  { %9813 = vmatpush3.bf16.msra.mxu0 %v10983_v10  ;;  %v11000_v27 = vld [vmem:[%s14825_s1 + $0x88] sm:$0xff]   ;;  %v11004_v31 = vld [vmem:[%s14825_s1 + $0x80] sm:$0xff]   ;;  %v11008_v43 = vld [vmem:[%s14825_s1 + $0x1b8] sm:$0xff]  }
   0xd   :  { %9835 = vmatpush3.bf16.msra.mxu1 %v10984_v11  ;;  %9814 = vmatprep.subr.bf16.mxu0 %v10985_v12  ;;  %v28_v32 = vld [vmem:[%s14824_s0] sm:$0xff]  ;;  %v29_v34 = vld [vmem:[%s14824_s0 + $0x8] sm:$0xff]  ;;  %v11009_v44 = vld [vmem:[%s14825_s1 + $0x170] sm:$0xff]  }
   0xe   :  { %9836 = vmatprep.subr.bf16.mxu1 %v10986_v13  ;;  %v76_v33 = vld [vmem:[%s14824_s0 + $0x180] sm:$0xff]  ;;  %v77_v37 = vld [vmem:[%s14824_s0 + $0x188] sm:$0xff]  ;;  %v11010_v45 = vld [vmem:[%s14825_s1 + $0x1f0] sm:$0xff]  }
   0xf   :  { %v8942_v35 = vcombine.low %v28_v32, %v76_v33  ;;  %v8943_v36 = vcombine.high %v28_v32, %v76_v33  ;;  %v8944_v38 = vcombine.low %v29_v34, %v77_v37  ;;  %v8945_v39 = vcombine.high %v29_v34, %v77_v37  ;;  %v11011_v46 = vld [vmem:[%s14825_s1 + $0x130] sm:$0xff]   ;;  %v11013_v48 = vld [vmem:[%s14825_s1 + $0x168] sm:$0xff]   ;;  %v11017_v52 = vld [vmem:[%s14825_s1 + $0x160] sm:$0xff]  }
  0x10   :  { %9815 = vmatpush3.bf16.msra.mxu0 %v10987_v14  ;;  %v11012_v47 = vld [vmem:[%s14825_s1 + $0x1b0] sm:$0xff]   ;;  %v11014_v49 = vld [vmem:[%s14825_s1 + $0x1e8] sm:$0xff]   ;;  %v11018_v53 = vld [vmem:[%s14825_s1 + $0x1e0] sm:$0xff]  }
  0x11   :  { %9837 = vmatpush3.bf16.msra.mxu1 %v10988_v15  ;;  %9816 = vmatprep.subr.bf16.mxu0 %v10989_v16  ;;  %v11015_v50 = vld [vmem:[%s14825_s1 + $0x128] sm:$0xff]   ;;  %v11019_v54 = vld [vmem:[%s14825_s1 + $0x120] sm:$0xff]   ;;  %v11021_v56 = vld [vmem:[%s14825_s1 + $0x158] sm:$0xff]  }
  0x12   :  { %9838 = vmatprep.subr.bf16.mxu1 %v10990_v17  ;;  %6787 = vmatprep.mubr.bf16.mxu0 %v8943_v36  ;;  %v11016_v51 = vld [vmem:[%s14825_s1 + $0x1a8] sm:$0xff]   ;;  %v11020_v55 = vld [vmem:[%s14825_s1 + $0x1a0] sm:$0xff]   ;;  %v11022_v57 = vld [vmem:[%s14825_s1 + $0x1d8] sm:$0xff]  }
  0x13   :  { %6828 = vmatprep.mubr.bf16.mxu1 %v8945_v39  ;;  %v11023_v58 = vld [vmem:[%s14825_s1 + $0x118] sm:$0xff]   ;;  %v11025_v60 = vld [vmem:[%s14825_s1 + $0x150] sm:$0xff]   ;;  %v11029_v0 = vld [vmem:[%s14825_s1 + $0x148] sm:$0xff]  }
  0x14   :  { %9817 = vmatpush3.bf16.msra.mxu0 %v10991_v18  ;;  %v11024_v59 = vld [vmem:[%s14825_s1 + $0x198] sm:$0xff]   ;;  %v11026_v61 = vld [vmem:[%s14825_s1 + $0x1d0] sm:$0xff]   ;;  %v11030_v1 = vld [vmem:[%s14825_s1 + $0x1c8] sm:$0xff]  }
  0x15   :  { %9839 = vmatpush3.bf16.msra.mxu1 %v10992_v19  ;;  %9818 = vmatprep.subr.bf16.mxu0 %v10993_v20  ;;  %v11027_v62 = vld [vmem:[%s14825_s1 + $0x110] sm:$0xff]   ;;  %v11031_v2 = vld [vmem:[%s14825_s1 + $0x108] sm:$0xff]   ;;  %v11033_v4 = vld [vmem:[%s14825_s1 + $0x140] sm:$0xff]  }
  0x16   :  { %9840 = vmatprep.subr.bf16.mxu1 %v10994_v21  ;;  %v11028_v63 = vld [vmem:[%s14825_s1 + $0x190] sm:$0xff]   ;;  %v11032_v3 = vld [vmem:[%s14825_s1 + $0x188] sm:$0xff]   ;;  %v11034_v5 = vld [vmem:[%s14825_s1 + $0x1c0] sm:$0xff]  }
  0x17   :  { %v11035_v6 = vld [vmem:[%s14825_s1 + $0x100] sm:$0xff]   ;;  %v30_v8 = vld [vmem:[%s14824_s0 + $0x10] sm:$0xff]  ;;  %v31_v12 = vld [vmem:[%s14824_s0 + $0x18] sm:$0xff] }
  0x18   :  { %9819 = vmatpush3.bf16.msra.mxu0 %v10995_v22  ;;  %v11036_v7 = vld [vmem:[%s14825_s1 + $0x180] sm:$0xff]   ;;  %v78_v9 = vld [vmem:[%s14824_s0 + $0x190] sm:$0xff]  ;;  %v79_v13 = vld [vmem:[%s14824_s0 + $0x198] sm:$0xff] }
  0x19   :  { %9841 = vmatpush3.bf16.msra.mxu1 %v10996_v23  ;;  %9820 = vmatprep.subr.bf16.mxu0 %v10997_v24  ;;  %v8946_v10 = vcombine.low %v30_v8, %v78_v9  ;;  %v8947_v11 = vcombine.high %v30_v8, %v78_v9  ;;  %v8948_v14 = vcombine.low %v31_v12, %v79_v13  ;;  %v11037_v16 = vld [vmem:[%s14825_s1 + $0x278] sm:$0xff]   ;;  %v11041_v20 = vld [vmem:[%s14825_s1 + $0x270] sm:$0xff]   ;;  %v11045_v24 = vld [vmem:[%s14825_s1 + $0x268] sm:$0xff]  }
  0x1a   :  { %9842 = vmatprep.subr.bf16.mxu1 %v10998_v25  ;;  %v8949_v15 = vcombine.high %v31_v12, %v79_v13  ;;  %v11038_v17 = vld [vmem:[%s14825_s1 + $0x2f8] sm:$0xff]   ;;  %v11042_v21 = vld [vmem:[%s14825_s1 + $0x2f0] sm:$0xff]   ;;  %v11046_v25 = vld [vmem:[%s14825_s1 + $0x2e8] sm:$0xff]  }
  0x1b   :  { %v11039_v18 = vld [vmem:[%s14825_s1 + $0x238] sm:$0xff]   ;;  %v11043_v22 = vld [vmem:[%s14825_s1 + $0x230] sm:$0xff]  }
  0x1c   :  { %9821 = vmatpush3.bf16.msra.mxu0 %v10999_v26  ;;  %v11040_v19 = vld [vmem:[%s14825_s1 + $0x2b8] sm:$0xff]   ;;  %v11044_v23 = vld [vmem:[%s14825_s1 + $0x2b0] sm:$0xff]   ;;  %v11047_v26 = vld [vmem:[%s14825_s1 + $0x228] sm:$0xff]  }
  0x1d   :  { %9843 = vmatpush3.bf16.msra.mxu1 %v11000_v27  ;;  %9822 = vmatprep.subr.bf16.mxu0 %v11001_v28  ;;  %v11048_v27 = vld [vmem:[%s14825_s1 + $0x2a8] sm:$0xff]   ;;  %v11049_v28 = vld [vmem:[%s14825_s1 + $0x260] sm:$0xff]   ;;  %v11053_v32 = vld [vmem:[%s14825_s1 + $0x258] sm:$0xff]  }
  0x1e   :  { %9844 = vmatprep.subr.bf16.mxu1 %v11002_v29  ;;  %v11050_v29 = vld [vmem:[%s14825_s1 + $0x2e0] sm:$0xff]   ;;  %v11054_v33 = vld [vmem:[%s14825_s1 + $0x2d8] sm:$0xff]   ;;  %v11057_v36 = vld [vmem:[%s14825_s1 + $0x250] sm:$0xff]  }
  0x1f   :  { %v11055_v34 = vld [vmem:[%s14825_s1 + $0x218] sm:$0xff]   ;;  %v11058_v37 = vld [vmem:[%s14825_s1 + $0x2d0] sm:$0xff]  }
  0x20   :  { %9823 = vmatpush3.bf16.msra.mxu0 %v11003_v30  ;;  %v11051_v30 = vld [vmem:[%s14825_s1 + $0x220] sm:$0xff]   ;;  %v11060_v39 = vld [vmem:[%s14825_s1 + $0x290] sm:$0xff]   ;;  %v11085_v8 = vld [vmem:[%s14825_s1 + $0x358] sm:$0xff]  }
  0x21   :  { %9845 = vmatpush3.bf16.msra.mxu1 %v11004_v31  ;;  %9852 = vmatprep.subr.bf16.mxu0 %v11005_v40  ;;  %v11052_v31 = vld [vmem:[%s14825_s1 + $0x2a0] sm:$0xff]   ;;  %v11061_v40 = vld [vmem:[%s14825_s1 + $0x248] sm:$0xff]   ;;  %v11086_v9 = vld [vmem:[%s14825_s1 + $0x3d8] sm:$0xff]  }
  0x22   :  { %9874 = vmatprep.subr.bf16.mxu1 %v11006_v41  ;;  %v11062_v41 = vld [vmem:[%s14825_s1 + $0x2c8] sm:$0xff]   ;;  %v11089_v12 = vld [vmem:[%s14825_s1 + $0x350] sm:$0xff]  }
  0x23   :  { %6788 = vmatmul.mubr.bf16.vlgmr.msra.gmra.mxu0 %v8942_v35  ;;  %v11056_v35 = vld [vmem:[%s14825_s1 + $0x298] sm:$0xff]   ;;  %v11090_v13 = vld [vmem:[%s14825_s1 + $0x3d0] sm:$0xff]  }
  0x24   :  { %6829 = vmatmul.mubr.bf16.vlgmr.msra.gmra.mxu1 %v8944_v38  ;;  %9853 = vmatpush3.bf16.msra.mxu0 %v11007_v42  ;;  %v11059_v38 = vld [vmem:[%s14825_s1 + $0x210] sm:$0xff]   ;;  %v11063_v42 = vld [vmem:[%s14825_s1 + $0x208] sm:$0xff]  }
  0x25   :  { %9875 = vmatpush3.bf16.msra.mxu1 %v11008_v43  ;;  %9854 = vmatprep.subr.bf16.mxu0 %v11009_v44  ;;  %v11064_v43 = vld [vmem:[%s14825_s1 + $0x288] sm:$0xff]   ;;  %v11065_v44 = vld [vmem:[%s14825_s1 + $0x240] sm:$0xff]  }
  0x26   :  { %9876 = vmatprep.subr.bf16.mxu1 %v11010_v45  ;;  %6869 = vmatprep.mubr.bf16.mxu0 %v8947_v11  ;;  %v11066_v45 = vld [vmem:[%s14825_s1 + $0x2c0] sm:$0xff]   ;;  %v11088_v11 = vld [vmem:[%s14825_s1 + $0x398] sm:$0xff]  }
  0x27   :  { %6910 = vmatprep.mubr.bf16.mxu1 %v8949_v15  ;;  %v11092_v15 = vld [vmem:[%s14825_s1 + $0x390] sm:$0xff]  }
  0x28   :  { %9855 = vmatpush3.bf16.msra.mxu0 %v11011_v46  ;;  %v11067_v46 = vld [vmem:[%s14825_s1 + $0x200] sm:$0xff]  }
  0x29   :  { %9877 = vmatpush3.bf16.msra.mxu1 %v11012_v47  ;;  %9856 = vmatprep.subr.bf16.mxu0 %v11013_v48  ;;  %v11068_v47 = vld [vmem:[%s14825_s1 + $0x280] sm:$0xff]  }
  0x2a   :  { %9878 = vmatprep.subr.bf16.mxu1 %v11014_v49  ;;  %v32_v48 = vld [vmem:[%s14824_s0 + $0x20] sm:$0xff] }
  0x2b   :  { %v80_v49 = vld [vmem:[%s14824_s0 + $0x1a0] sm:$0xff] }
  0x2c   :  { %9857 = vmatpush3.bf16.msra.mxu0 %v11015_v50  ;;  %v33_v50 = vld [vmem:[%s14824_s0 + $0x28] sm:$0xff] }
  0x2d   :  { %9879 = vmatpush3.bf16.msra.mxu1 %v11016_v51  ;;  %9858 = vmatprep.subr.bf16.mxu0 %v11017_v52  ;;  %v81_v51 = vld [vmem:[%s14824_s0 + $0x1a8] sm:$0xff]  ;;  %v8950_v52 = vcombine.low %v32_v48, %v80_v49 }
  0x2e   :  { %9880 = vmatprep.subr.bf16.mxu1 %v11018_v53  ;;  %v8951_v53 = vcombine.high %v32_v48, %v80_v49  ;;  %v11117_v48 = vld [vmem:[%s14825_s1 + $0x458] sm:$0xff]  }
  0x2f   :  { %v11118_v49 = vld [vmem:[%s14825_s1 + $0x4d8] sm:$0xff]  }
  0x30   :  { %9859 = vmatpush3.bf16.msra.mxu0 %v11019_v54  ;;  %v8952_v54 = vcombine.low %v33_v50, %v81_v51 }
  0x31   :  { %9881 = vmatpush3.bf16.msra.mxu1 %v11020_v55  ;;  %9860 = vmatprep.subr.bf16.mxu0 %v11021_v56  ;;  %v8953_v55 = vcombine.high %v33_v50, %v81_v51  ;;  %v11069_v56 = vld [vmem:[%s14825_s1 + $0x378] sm:$0xff]  }
  0x32   :  { %9882 = vmatprep.subr.bf16.mxu1 %v11022_v57  ;;  %v11070_v57 = vld [vmem:[%s14825_s1 + $0x3f8] sm:$0xff]  }
  0x33   :  { %v11119_v50 = vld [vmem:[%s14825_s1 + $0x418] sm:$0xff]  }
  0x34   :  { %9861 = vmatpush3.bf16.msra.mxu0 %v11023_v58  ;;  %v11071_v58 = vld [vmem:[%s14825_s1 + $0x338] sm:$0xff]  }
  0x35   :  { %9883 = vmatpush3.bf16.msra.mxu1 %v11024_v59  ;;  %9862 = vmatprep.subr.bf16.mxu0 %v11025_v60  ;;  %v11072_v59 = vld [vmem:[%s14825_s1 + $0x3b8] sm:$0xff]   ;;  %v11073_v60 = vld [vmem:[%s14825_s1 + $0x370] sm:$0xff]  }
  0x36   :  { %9884 = vmatprep.subr.bf16.mxu1 %v11026_v61  ;;  %v11074_v61 = vld [vmem:[%s14825_s1 + $0x3f0] sm:$0xff]   ;;  %v11120_v51 = vld [vmem:[%s14825_s1 + $0x498] sm:$0xff]  }
  0x38   :  { %9863 = vmatpush3.bf16.msra.mxu0 %v11027_v62  ;;  %v11075_v62 = vld [vmem:[%s14825_s1 + $0x330] sm:$0xff]  }
  0x39   :  { %9885 = vmatpush3.bf16.msra.mxu1 %v11028_v63  ;;  %9864 = vmatprep.subr.bf16.mxu0 %v11029_v0  ;;  %v11076_v63 = vld [vmem:[%s14825_s1 + $0x3b0] sm:$0xff]   ;;  %v11077_v0 = vld [vmem:[%s14825_s1 + $0x368] sm:$0xff]  }
  0x3a   :  { %9886 = vmatprep.subr.bf16.mxu1 %v11030_v1  ;;  %v11078_v1 = vld [vmem:[%s14825_s1 + $0x3e8] sm:$0xff]  }
  0x3c   :  { %9865 = vmatpush3.bf16.msra.mxu0 %v11031_v2  ;;  %v11079_v2 = vld [vmem:[%s14825_s1 + $0x328] sm:$0xff]  }
  0x3d   :  { %9887 = vmatpush3.bf16.msra.mxu1 %v11032_v3  ;;  %9866 = vmatprep.subr.bf16.mxu0 %v11033_v4  ;;  %v11080_v3 = vld [vmem:[%s14825_s1 + $0x3a8] sm:$0xff]   ;;  %v11081_v4 = vld [vmem:[%s14825_s1 + $0x360] sm:$0xff]  }
  0x3e   :  { %9888 = vmatprep.subr.bf16.mxu1 %v11034_v5  ;;  %v11082_v5 = vld [vmem:[%s14825_s1 + $0x3e0] sm:$0xff]  }
  0x40   :  { %9867 = vmatpush3.bf16.msra.mxu0 %v11035_v6  ;;  %v11083_v6 = vld [vmem:[%s14825_s1 + $0x320] sm:$0xff]  }
  0x41   :  { %9889 = vmatpush3.bf16.msra.mxu1 %v11036_v7  ;;  %9896 = vmatprep.subr.bf16.mxu0 %v11037_v16  ;;  %v11084_v7 = vld [vmem:[%s14825_s1 + $0x3a0] sm:$0xff]   ;;  %v11093_v16 = vld [vmem:[%s14825_s1 + $0x348] sm:$0xff]  }
  0x42   :  { %9918 = vmatprep.subr.bf16.mxu1 %v11038_v17  ;;  %v11094_v17 = vld [vmem:[%s14825_s1 + $0x3c8] sm:$0xff]  }
  0x43   :  { %6870 = vmatmul.mubr.bf16.vlgmr.msra.gmra.mxu0 %v8946_v10  ;;  %v11087_v10 = vld [vmem:[%s14825_s1 + $0x318] sm:$0xff]  }
  0x44   :  { %6911 = vmatmul.mubr.bf16.vlgmr.msra.gmra.mxu1 %v8948_v14  ;;  %9897 = vmatpush3.bf16.msra.mxu0 %v11039_v18  ;;  %v11091_v14 = vld [vmem:[%s14825_s1 + $0x310] sm:$0xff]   ;;  %v11095_v18 = vld [vmem:[%s14825_s1 + $0x308] sm:$0xff]  }
  0x45   :  { %9919 = vmatpush3.bf16.msra.mxu1 %v11040_v19  ;;  %9898 = vmatprep.subr.bf16.mxu0 %v11041_v20  ;;  %v11096_v19 = vld [vmem:[%s14825_s1 + $0x388] sm:$0xff]   ;;  %v11097_v20 = vld [vmem:[%s14825_s1 + $0x340] sm:$0xff]  }
  0x46   :  { %9920 = vmatprep.subr.bf16.mxu1 %v11042_v21  ;;  %6951 = vmatprep.mubr.bf16.mxu0 %v8951_v53  ;;  %v11098_v21 = vld [vmem:[%s14825_s1 + $0x3c0] sm:$0xff]   ;;  %v11122_v53 = vld [vmem:[%s14825_s1 + $0x4d0] sm:$0xff]  }
  0x47   :  { %6992 = vmatprep.mubr.bf16.mxu1 %v8953_v55  ;;  %v11124_v55 = vld [vmem:[%s14825_s1 + $0x490] sm:$0xff]  }
  0x48   :  { %9899 = vmatpush3.bf16.msra.mxu0 %v11043_v22  ;;  %v11099_v22 = vld [vmem:[%s14825_s1 + $0x300] sm:$0xff]  }
  0x49   :  { %9921 = vmatpush3.bf16.msra.mxu1 %v11044_v23  ;;  %9900 = vmatprep.subr.bf16.mxu0 %v11045_v24  ;;  %v11100_v23 = vld [vmem:[%s14825_s1 + $0x380] sm:$0xff]   ;;  %v34_v24 = vld [vmem:[%s14824_s0 + $0x30] sm:$0xff] }
  0x4a   :  { %9922 = vmatprep.subr.bf16.mxu1 %v11046_v25  ;;  %v82_v25 = vld [vmem:[%s14824_s0 + $0x1b0] sm:$0xff] }
  0x4c   :  { %9901 = vmatpush3.bf16.msra.mxu0 %v11047_v26  ;;  %v35_v26 = vld [vmem:[%s14824_s0 + $0x38] sm:$0xff] }
  0x4d   :  { %9923 = vmatpush3.bf16.msra.mxu1 %v11048_v27  ;;  %9902 = vmatprep.subr.bf16.mxu0 %v11049_v28  ;;  %v8954_v27 = vcombine.low %v34_v24, %v82_v25  ;;  %v8955_v28 = vcombine.high %v34_v24, %v82_v25  ;;  %v11149_v24 = vld [vmem:[%s14825_s1 + $0x558] sm:$0xff]  }
  0x4e   :  { %9924 = vmatprep.subr.bf16.mxu1 %v11050_v29  ;;  %v83_v29 = vld [vmem:[%s14824_s0 + $0x1b8] sm:$0xff] }
  0x4f   :  { %v11150_v25 = vld [vmem:[%s14825_s1 + $0x5d8] sm:$0xff]  }
  0x50   :  { %9903 = vmatpush3.bf16.msra.mxu0 %v11051_v30  ;;  %v8956_v30 = vcombine.low %v35_v26, %v83_v29 }
  0x51   :  { %9925 = vmatpush3.bf16.msra.mxu1 %v11052_v31  ;;  %9904 = vmatprep.subr.bf16.mxu0 %v11053_v32  ;;  %v8957_v31 = vcombine.high %v35_v26, %v83_v29  ;;  %v11101_v32 = vld [vmem:[%s14825_s1 + $0x478] sm:$0xff]   ;;  %v11154_v29 = vld [vmem:[%s14825_s1 + $0x5d0] sm:$0xff]  }
  0x52   :  { %9926 = vmatprep.subr.bf16.mxu1 %v11054_v33  ;;  %v11102_v33 = vld [vmem:[%s14825_s1 + $0x4f8] sm:$0xff]  }
  0x53   :  { %v11151_v26 = vld [vmem:[%s14825_s1 + $0x518] sm:$0xff]  }
  0x54   :  { %9905 = vmatpush3.bf16.msra.mxu0 %v11055_v34  ;;  %v11103_v34 = vld [vmem:[%s14825_s1 + $0x438] sm:$0xff]  }
  0x55   :  { %9927 = vmatpush3.bf16.msra.mxu1 %v11056_v35  ;;  %9906 = vmatprep.subr.bf16.mxu0 %v11057_v36  ;;  %v11104_v35 = vld [vmem:[%s14825_s1 + $0x4b8] sm:$0xff]   ;;  %v11105_v36 = vld [vmem:[%s14825_s1 + $0x470] sm:$0xff]  }
  0x56   :  { %9928 = vmatprep.subr.bf16.mxu1 %v11058_v37  ;;  %v11106_v37 = vld [vmem:[%s14825_s1 + $0x4f0] sm:$0xff]  }
  0x58   :  { %9907 = vmatpush3.bf16.msra.mxu0 %v11059_v38  ;;  %v11107_v38 = vld [vmem:[%s14825_s1 + $0x430] sm:$0xff]  }
  0x59   :  { %9929 = vmatpush3.bf16.msra.mxu1 %v11060_v39  ;;  %9908 = vmatprep.subr.bf16.mxu0 %v11061_v40  ;;  %v11108_v39 = vld [vmem:[%s14825_s1 + $0x4b0] sm:$0xff]   ;;  %v11109_v40 = vld [vmem:[%s14825_s1 + $0x468] sm:$0xff]  }
  0x5a   :  { %9930 = vmatprep.subr.bf16.mxu1 %v11062_v41  ;;  %v11110_v41 = vld [vmem:[%s14825_s1 + $0x4e8] sm:$0xff]  }
  0x5c   :  { %9909 = vmatpush3.bf16.msra.mxu0 %v11063_v42  ;;  %v11111_v42 = vld [vmem:[%s14825_s1 + $0x428] sm:$0xff]  }
  0x5d   :  { %9931 = vmatpush3.bf16.msra.mxu1 %v11064_v43  ;;  %9910 = vmatprep.subr.bf16.mxu0 %v11065_v44  ;;  %v11112_v43 = vld [vmem:[%s14825_s1 + $0x4a8] sm:$0xff]   ;;  %v11113_v44 = vld [vmem:[%s14825_s1 + $0x460] sm:$0xff]  }
  0x5e   :  { %9932 = vmatprep.subr.bf16.mxu1 %v11066_v45  ;;  %v11114_v45 = vld [vmem:[%s14825_s1 + $0x4e0] sm:$0xff]  }
  0x60   :  { %9911 = vmatpush3.bf16.msra.mxu0 %v11067_v46  ;;  %v11115_v46 = vld [vmem:[%s14825_s1 + $0x420] sm:$0xff]  }
  0x61   :  { %9933 = vmatpush3.bf16.msra.mxu1 %v11068_v47  ;;  %9940 = vmatprep.subr.bf16.mxu0 %v11069_v56  ;;  %v11116_v47 = vld [vmem:[%s14825_s1 + $0x4a0] sm:$0xff]   ;;  %v11125_v56 = vld [vmem:[%s14825_s1 + $0x448] sm:$0xff]  }
  0x62   :  { %9962 = vmatprep.subr.bf16.mxu1 %v11070_v57  ;;  %v11126_v57 = vld [vmem:[%s14825_s1 + $0x4c8] sm:$0xff]  }
  0x63   :  { %6952 = vmatmul.mubr.bf16.vlgmr.msra.gmra.mxu0 %v8950_v52  ;;  %v11121_v52 = vld [vmem:[%s14825_s1 + $0x450] sm:$0xff]  }
  0x64   :  { %6993 = vmatmul.mubr.bf16.vlgmr.msra.gmra.mxu1 %v8952_v54  ;;  %9941 = vmatpush3.bf16.msra.mxu0 %v11071_v58  ;;  %v11123_v54 = vld [vmem:[%s14825_s1 + $0x410] sm:$0xff]   ;;  %v11127_v58 = vld [vmem:[%s14825_s1 + $0x408] sm:$0xff]  }
  0x65   :  { %9963 = vmatpush3.bf16.msra.mxu1 %v11072_v59  ;;  %9942 = vmatprep.subr.bf16.mxu0 %v11073_v60  ;;  %v11128_v59 = vld [vmem:[%s14825_s1 + $0x488] sm:$0xff]   ;;  %v11129_v60 = vld [vmem:[%s14825_s1 + $0x440] sm:$0xff]  }
  0x66   :  { %9964 = vmatprep.subr.bf16.mxu1 %v11074_v61  ;;  %7033 = vmatprep.mubr.bf16.mxu0 %v8955_v28  ;;  %v11130_v61 = vld [vmem:[%s14825_s1 + $0x4c0] sm:$0xff]   ;;  %v11153_v28 = vld [vmem:[%s14825_s1 + $0x550] sm:$0xff]  }
  0x67   :  { %7074 = vmatprep.mubr.bf16.mxu1 %v8957_v31  ;;  %v11156_v31 = vld [vmem:[%s14825_s1 + $0x590] sm:$0xff]  }
  0x68   :  { %9943 = vmatpush3.bf16.msra.mxu0 %v11075_v62  ;;  %v11131_v62 = vld [vmem:[%s14825_s1 + $0x400] sm:$0xff]  }
  0x69   :  { %9965 = vmatpush3.bf16.msra.mxu1 %v11076_v63  ;;  %9944 = vmatprep.subr.bf16.mxu0 %v11077_v0  ;;  %v11132_v63 = vld [vmem:[%s14825_s1 + $0x480] sm:$0xff]  }
  0x6a   :  { %9966 = vmatprep.subr.bf16.mxu1 %v11078_v1  ;;  %v36_v0 = vld [vmem:[%s14824_s0 + $0x40] sm:$0xff] }
  0x6b   :  { %v84_v1 = vld [vmem:[%s14824_s0 + $0x1c0] sm:$0xff] }
  0x6c   :  { %9945 = vmatpush3.bf16.msra.mxu0 %v11079_v2  ;;  %v8958_v2 = vcombine.low %v36_v0, %v84_v1 }
  0x6d   :  { %9967 = vmatpush3.bf16.msra.mxu1 %v11080_v3  ;;  %9946 = vmatprep.subr.bf16.mxu0 %v11081_v4  ;;  %v8959_v3 = vcombine.high %v36_v0, %v84_v1  ;;  %v37_v4 = vld [vmem:[%s14824_s0 + $0x48] sm:$0xff]  ;;  %v11181_v0 = vld [vmem:[%s14825_s1 + $0x658] sm:$0xff]  }
  0x6e   :  { %9968 = vmatprep.subr.bf16.mxu1 %v11082_v5  ;;  %v85_v5 = vld [vmem:[%s14824_s0 + $0x1c8] sm:$0xff]  ;;  %v11182_v1 = vld [vmem:[%s14825_s1 + $0x6d8] sm:$0xff]  }
  0x70   :  { %9947 = vmatpush3.bf16.msra.mxu0 %v11083_v6  ;;  %v8960_v6 = vcombine.low %v37_v4, %v85_v5 }
  0x71   :  { %9969 = vmatpush3.bf16.msra.mxu1 %v11084_v7  ;;  %9948 = vmatprep.subr.bf16.mxu0 %v11085_v8  ;;  %v8961_v7 = vcombine.high %v37_v4, %v85_v5  ;;  %v11133_v8 = vld [vmem:[%s14825_s1 + $0x578] sm:$0xff]   ;;  %v11185_v4 = vld [vmem:[%s14825_s1 + $0x650] sm:$0xff]  }
  0x72   :  { %9970 = vmatprep.subr.bf16.mxu1 %v11086_v9  ;;  %v11134_v9 = vld [vmem:[%s14825_s1 + $0x5f8] sm:$0xff]   ;;  %v11186_v5 = vld [vmem:[%s14825_s1 + $0x6d0] sm:$0xff]  }
  0x74   :  { %9949 = vmatpush3.bf16.msra.mxu0 %v11087_v10  ;;  %v11135_v10 = vld [vmem:[%s14825_s1 + $0x538] sm:$0xff]  }
  0x75   :  { %9971 = vmatpush3.bf16.msra.mxu1 %v11088_v11  ;;  %9950 = vmatprep.subr.bf16.mxu0 %v11089_v12  ;;  %v11136_v11 = vld [vmem:[%s14825_s1 + $0x5b8] sm:$0xff]   ;;  %v11137_v12 = vld [vmem:[%s14825_s1 + $0x570] sm:$0xff]  }
  0x76   :  { %9972 = vmatprep.subr.bf16.mxu1 %v11090_v13  ;;  %v11138_v13 = vld [vmem:[%s14825_s1 + $0x5f0] sm:$0xff]  }
  0x78   :  { %9951 = vmatpush3.bf16.msra.mxu0 %v11091_v14  ;;  %v11139_v14 = vld [vmem:[%s14825_s1 + $0x530] sm:$0xff]  }
  0x79   :  { %9973 = vmatpush3.bf16.msra.mxu1 %v11092_v15  ;;  %9952 = vmatprep.subr.bf16.mxu0 %v11093_v16  ;;  %v11140_v15 = vld [vmem:[%s14825_s1 + $0x5b0] sm:$0xff]   ;;  %v11141_v16 = vld [vmem:[%s14825_s1 + $0x568] sm:$0xff]  }
  0x7a   :  { %9974 = vmatprep.subr.bf16.mxu1 %v11094_v17  ;;  %v11142_v17 = vld [vmem:[%s14825_s1 + $0x5e8] sm:$0xff]  }
  0x7c   :  { %9953 = vmatpush3.bf16.msra.mxu0 %v11095_v18  ;;  %v11143_v18 = vld [vmem:[%s14825_s1 + $0x528] sm:$0xff]  }
  0x7d   :  { %9975 = vmatpush3.bf16.msra.mxu1 %v11096_v19  ;;  %9954 = vmatprep.subr.bf16.mxu0 %v11097_v20  ;;  %v11144_v19 = vld [vmem:[%s14825_s1 + $0x5a8] sm:$0xff]   ;;  %v11145_v20 = vld [vmem:[%s14825_s1 + $0x560] sm:$0xff]  }
  0x7e   :  { %9976 = vmatprep.subr.bf16.mxu1 %v11098_v21  ;;  %v11146_v21 = vld [vmem:[%s14825_s1 + $0x5e0] sm:$0xff]  }
  0x80   :  { %9955 = vmatpush3.bf16.msra.mxu0 %v11099_v22  ;;  %v11147_v22 = vld [vmem:[%s14825_s1 + $0x520] sm:$0xff]  }
  0x81   :  { %9977 = vmatpush3.bf16.msra.mxu1 %v11100_v23  ;;  %9984 = vmatprep.subr.bf16.mxu0 %v11101_v32  ;;  %v11148_v23 = vld [vmem:[%s14825_s1 + $0x5a0] sm:$0xff]   ;;  %v11157_v32 = vld [vmem:[%s14825_s1 + $0x548] sm:$0xff]  }
  0x82   :  { %10006 = vmatprep.subr.bf16.mxu1 %v11102_v33  ;;  %v11158_v33 = vld [vmem:[%s14825_s1 + $0x5c8] sm:$0xff]  }
  0x83   :  { %7034 = vmatmul.mubr.bf16.vlgmr.msra.gmra.mxu0 %v8954_v27  ;;  %v11152_v27 = vld [vmem:[%s14825_s1 + $0x598] sm:$0xff]  }
  0x84   :  { %7075 = vmatmul.mubr.bf16.vlgmr.msra.gmra.mxu1 %v8956_v30  ;;  %9985 = vmatpush3.bf16.msra.mxu0 %v11103_v34  ;;  %v11155_v30 = vld [vmem:[%s14825_s1 + $0x510] sm:$0xff]   ;;  %v11159_v34 = vld [vmem:[%s14825_s1 + $0x508] sm:$0xff]  }
  0x85   :  { %10007 = vmatpush3.bf16.msra.mxu1 %v11104_v35  ;;  %9986 = vmatprep.subr.bf16.mxu0 %v11105_v36  ;;  %v11160_v35 = vld [vmem:[%s14825_s1 + $0x588] sm:$0xff]   ;;  %v11161_v36 = vld [vmem:[%s14825_s1 + $0x540] sm:$0xff]  }
  0x86   :  { %10008 = vmatprep.subr.bf16.mxu1 %v11106_v37  ;;  %7115 = vmatprep.mubr.bf16.mxu0 %v8959_v3  ;;  %v11162_v37 = vld [vmem:[%s14825_s1 + $0x5c0] sm:$0xff]   ;;  %v11184_v3 = vld [vmem:[%s14825_s1 + $0x698] sm:$0xff]  }
  0x87   :  { %7156 = vmatprep.mubr.bf16.mxu1 %v8961_v7  ;;  %v11188_v7 = vld [vmem:[%s14825_s1 + $0x690] sm:$0xff]  }
  0x88   :  { %9987 = vmatpush3.bf16.msra.mxu0 %v11107_v38  ;;  %v11163_v38 = vld [vmem:[%s14825_s1 + $0x500] sm:$0xff]  }
  0x89   :  { %10009 = vmatpush3.bf16.msra.mxu1 %v11108_v39  ;;  %9988 = vmatprep.subr.bf16.mxu0 %v11109_v40  ;;  %v11164_v39 = vld [vmem:[%s14825_s1 + $0x580] sm:$0xff]   ;;  %v38_v40 = vld [vmem:[%s14824_s0 + $0x50] sm:$0xff] }
  0x8a   :  { %10010 = vmatprep.subr.bf16.mxu1 %v11110_v41  ;;  %v86_v41 = vld [vmem:[%s14824_s0 + $0x1d0] sm:$0xff] }
  0x8c   :  { %9989 = vmatpush3.bf16.msra.mxu0 %v11111_v42  ;;  %v39_v42 = vld [vmem:[%s14824_s0 + $0x58] sm:$0xff] }
  0x8d   :  { %10011 = vmatpush3.bf16.msra.mxu1 %v11112_v43  ;;  %9990 = vmatprep.subr.bf16.mxu0 %v11113_v44  ;;  %v87_v43 = vld [vmem:[%s14824_s0 + $0x1d8] sm:$0xff]  ;;  %v8962_v44 = vcombine.low %v38_v40, %v86_v41 }
  0x8e   :  { %10012 = vmatprep.subr.bf16.mxu1 %v11114_v45  ;;  %v8963_v45 = vcombine.high %v38_v40, %v86_v41  ;;  %v8941_v40 = vld [vmem:[%s14826_s2] ss:$0 sm:$0xff] }
  0x90   :  { %9991 = vmatpush3.bf16.msra.mxu0 %v11115_v46  ;;  %v8964_v46 = vcombine.low %v39_v42, %v87_v43 }
  0x91   :  { %10013 = vmatpush3.bf16.msra.mxu1 %v11116_v47  ;;  %9992 = vmatprep.subr.bf16.mxu0 %v11117_v48  ;;  %v8965_v47 = vcombine.high %v39_v42, %v87_v43  ;;  %v11165_v48 = vld [vmem:[%s14825_s1 + $0x678] sm:$0xff]   ;;  %v11201_v42 = vld [vmem:[%s14825_s1 + $0x770] sm:$0xff]  }
  0x92   :  { %10014 = vmatprep.subr.bf16.mxu1 %v11118_v49  ;;  %v11166_v49 = vld [vmem:[%s14825_s1 + $0x6f8] sm:$0xff]  }
  0x94   :  { %9993 = vmatpush3.bf16.msra.mxu0 %v11119_v50  ;;  %v11167_v50 = vld [vmem:[%s14825_s1 + $0x638] sm:$0xff]  }
  0x95   :  { %10015 = vmatpush3.bf16.msra.mxu1 %v11120_v51  ;;  %9994 = vmatprep.subr.bf16.mxu0 %v11121_v52  ;;  %v11168_v51 = vld [vmem:[%s14825_s1 + $0x6b8] sm:$0xff]   ;;  %v11169_v52 = vld [vmem:[%s14825_s1 + $0x670] sm:$0xff]  }
  0x96   :  { %10016 = vmatprep.subr.bf16.mxu1 %v11122_v53  ;;  %v11170_v53 = vld [vmem:[%s14825_s1 + $0x6f0] sm:$0xff]  }
  0x98   :  { %9995 = vmatpush3.bf16.msra.mxu0 %v11123_v54  ;;  %v11171_v54 = vld [vmem:[%s14825_s1 + $0x630] sm:$0xff]  }
  0x99   :  { %10017 = vmatpush3.bf16.msra.mxu1 %v11124_v55  ;;  %9996 = vmatprep.subr.bf16.mxu0 %v11125_v56  ;;  %v11172_v55 = vld [vmem:[%s14825_s1 + $0x6b0] sm:$0xff]   ;;  %v11173_v56 = vld [vmem:[%s14825_s1 + $0x668] sm:$0xff]  }
  0x9a   :  { %10018 = vmatprep.subr.bf16.mxu1 %v11126_v57  ;;  %v11174_v57 = vld [vmem:[%s14825_s1 + $0x6e8] sm:$0xff]  }
  0x9c   :  { %9997 = vmatpush3.bf16.msra.mxu0 %v11127_v58  ;;  %v11175_v58 = vld [vmem:[%s14825_s1 + $0x628] sm:$0xff]  }
  0x9d   :  { %10019 = vmatpush3.bf16.msra.mxu1 %v11128_v59  ;;  %9998 = vmatprep.subr.bf16.mxu0 %v11129_v60  ;;  %v11176_v59 = vld [vmem:[%s14825_s1 + $0x6a8] sm:$0xff]   ;;  %v11177_v60 = vld [vmem:[%s14825_s1 + $0x660] sm:$0xff]  }
  0x9e   :  { %10020 = vmatprep.subr.bf16.mxu1 %v11130_v61  ;;  %v11178_v61 = vld [vmem:[%s14825_s1 + $0x6e0] sm:$0xff]  }
  0xa0   :  { %9999 = vmatpush3.bf16.msra.mxu0 %v11131_v62  ;;  %v11179_v62 = vld [vmem:[%s14825_s1 + $0x620] sm:$0xff]  }
  0xa1   :  { %10021 = vmatpush3.bf16.msra.mxu1 %v11132_v63  ;;  %10028 = vmatprep.subr.bf16.mxu0 %v11133_v8  ;;  %v11180_v63 = vld [vmem:[%s14825_s1 + $0x6a0] sm:$0xff]   ;;  %v11189_v8 = vld [vmem:[%s14825_s1 + $0x648] sm:$0xff]  }
  0xa2   :  { %10050 = vmatprep.subr.bf16.mxu1 %v11134_v9  ;;  %v11190_v9 = vld [vmem:[%s14825_s1 + $0x6c8] sm:$0xff]  }
  0xa3   :  { %7116 = vmatmul.mubr.bf16.vlgmr.msra.gmra.mxu0 %v8958_v2  ;;  %v11183_v2 = vld [vmem:[%s14825_s1 + $0x618] sm:$0xff]  }
  0xa4   :  { %7157 = vmatmul.mubr.bf16.vlgmr.msra.gmra.mxu1 %v8960_v6  ;;  %10029 = vmatpush3.bf16.msra.mxu0 %v11135_v10  ;;  %v11187_v6 = vld [vmem:[%s14825_s1 + $0x610] sm:$0xff]   ;;  %v11191_v10 = vld [vmem:[%s14825_s1 + $0x608] sm:$0xff]  }
  0xa5   :  { %10051 = vmatpush3.bf16.msra.mxu1 %v11136_v11  ;;  %10030 = vmatprep.subr.bf16.mxu0 %v11137_v12  ;;  %v11192_v11 = vld [vmem:[%s14825_s1 + $0x688] sm:$0xff]   ;;  %v11193_v12 = vld [vmem:[%s14825_s1 + $0x640] sm:$0xff]  }
  0xa6   :  { %10052 = vmatprep.subr.bf16.mxu1 %v11138_v13  ;;  %7197 = vmatprep.mubr.bf16.mxu0 %v8963_v45 }
  0xa7   :  { %7238 = vmatprep.mubr.bf16.mxu1 %v8965_v47 }
  0xa8   :  { %10031 = vmatpush3.bf16.msra.mxu0 %v11139_v14  ;;  %v11194_v14 = vld [vmem:[%s14825_s1 + $0x6c0] sm:$0xff]  }
  0xa9   :  { %10053 = vmatpush3.bf16.msra.mxu1 %v11140_v15  ;;  %10032 = vmatprep.subr.bf16.mxu0 %v11141_v16  ;;  %v11195_v16 = vld [vmem:[%s14825_s1 + $0x600] sm:$0xff]  }
  0xaa   :  { %10054 = vmatprep.subr.bf16.mxu1 %v11142_v17 }
  0xac   :  { %10033 = vmatpush3.bf16.msra.mxu0 %v11143_v18  ;;  %v11196_v18 = vld [vmem:[%s14825_s1 + $0x680] sm:$0xff]  }
  0xad   :  { %10055 = vmatpush3.bf16.msra.mxu1 %v11144_v19  ;;  %10034 = vmatprep.subr.bf16.mxu0 %v11145_v20 }
  0xae   :  { %10056 = vmatprep.subr.bf16.mxu1 %v11146_v21  ;;  %v40_v21 = vld [vmem:[%s14824_s0 + $0x60] sm:$0xff] }
  0xb0   :  { %10035 = vmatpush3.bf16.msra.mxu0 %v11147_v22  ;;  %v88_v22 = vld [vmem:[%s14824_s0 + $0x1e0] sm:$0xff] }
  0xb1   :  { %10057 = vmatpush3.bf16.msra.mxu1 %v11148_v23  ;;  %10036 = vmatprep.subr.bf16.mxu0 %v11149_v24  ;;  %v41_v23 = vld [vmem:[%s14824_s0 + $0x68] sm:$0xff] }
  0xb2   :  { %10058 = vmatprep.subr.bf16.mxu1 %v11150_v25 }
  0xb4   :  { %10037 = vmatpush3.bf16.msra.mxu0 %v11151_v26  ;;  %v8966_v26 = vcombine.low %v40_v21, %v88_v22 }
  0xb5   :  { %10059 = vmatpush3.bf16.msra.mxu1 %v11152_v27  ;;  %10038 = vmatprep.subr.bf16.mxu0 %v11153_v28  ;;  %v8967_v27 = vcombine.high %v40_v21, %v88_v22  ;;  %v89_v28 = vld [vmem:[%s14824_s0 + $0x1e8] sm:$0xff] }
  0xb6   :  { %10060 = vmatprep.subr.bf16.mxu1 %v11154_v29 }
  0xb8   :  { %10039 = vmatpush3.bf16.msra.mxu0 %v11155_v30  ;;  %v8968_v30 = vcombine.low %v41_v23, %v89_v28 }
  0xb9   :  { %10061 = vmatpush3.bf16.msra.mxu1 %v11156_v31  ;;  %10040 = vmatprep.subr.bf16.mxu0 %v11157_v32  ;;  %v8969_v31 = vcombine.high %v41_v23, %v89_v28  ;;  %v11197_v32 = vld [vmem:[%s14825_s1 + $0x778] sm:$0xff]  }
  0xba   :  { %10062 = vmatprep.subr.bf16.mxu1 %v11158_v33  ;;  %v11230_v28 = vld [vmem:[%s14825_s1 + $0x8f8] sm:$0xff]  }
  0xbc   :  { %10041 = vmatpush3.bf16.msra.mxu0 %v11159_v34  ;;  %v11198_v34 = vld [vmem:[%s14825_s1 + $0x7f8] sm:$0xff]  }
  0xbd   :  { %10063 = vmatpush3.bf16.msra.mxu1 %v11160_v35  ;;  %10042 = vmatprep.subr.bf16.mxu0 %v11161_v36 }
  0xbe   :  { %10064 = vmatprep.subr.bf16.mxu1 %v11162_v37  ;;  %v11199_v37 = vld [vmem:[%s14825_s1 + $0x738] sm:$0xff]  }
  0xc0   :  { %10043 = vmatpush3.bf16.msra.mxu0 %v11163_v38 }
  0xc1   :  { %10065 = vmatpush3.bf16.msra.mxu1 %v11164_v39  ;;  %10072 = vmatprep.subr.bf16.mxu0 %v11165_v48  ;;  %v11200_v39 = vld [vmem:[%s14825_s1 + $0x7b8] sm:$0xff]   ;;  %v11204_v48 = vld [vmem:[%s14825_s1 + $0x7b0] sm:$0xff]  }
  0xc2   :  { %10094 = vmatprep.subr.bf16.mxu1 %v11166_v49  ;;  %v11205_v49 = vld [vmem:[%s14825_s1 + $0x768] sm:$0xff]  }
  0xc3   :  { %7198 = vmatmul.mubr.bf16.vlgmr.msra.gmra.mxu0 %v8962_v44  ;;  %v11202_v44 = vld [vmem:[%s14825_s1 + $0x7f0] sm:$0xff]  }
  0xc4   :  { %7239 = vmatmul.mubr.bf16.vlgmr.msra.gmra.mxu1 %v8964_v46  ;;  %10073 = vmatpush3.bf16.msra.mxu0 %v11167_v50  ;;  %v11203_v46 = vld [vmem:[%s14825_s1 + $0x730] sm:$0xff]   ;;  %v11206_v50 = vld [vmem:[%s14825_s1 + $0x7e8] sm:$0xff]  }
  0xc5   :  { %10095 = vmatpush3.bf16.msra.mxu1 %v11168_v51  ;;  %10074 = vmatprep.subr.bf16.mxu0 %v11169_v52  ;;  %v11207_v51 = vld [vmem:[%s14825_s1 + $0x728] sm:$0xff]  }
  0xc6   :  { %10096 = vmatprep.subr.bf16.mxu1 %v11170_v53  ;;  %7279 = vmatprep.mubr.bf16.mxu0 %v8967_v27  ;;  %v11208_v52 = vld [vmem:[%s14825_s1 + $0x7a8] sm:$0xff]   ;;  %v11209_v53 = vld [vmem:[%s14825_s1 + $0x760] sm:$0xff]  }
  0xc7   :  { %7320 = vmatprep.mubr.bf16.mxu1 %v8969_v31 }
  0xc8   :  { %10075 = vmatpush3.bf16.msra.mxu0 %v11171_v54  ;;  %v11210_v54 = vld [vmem:[%s14825_s1 + $0x7e0] sm:$0xff]  }
  0xc9   :  { %10097 = vmatpush3.bf16.msra.mxu1 %v11172_v55  ;;  %10076 = vmatprep.subr.bf16.mxu0 %v11173_v56  ;;  %v11211_v55 = vld [vmem:[%s14825_s1 + $0x720] sm:$0xff]  }
  0xca   :  { %10098 = vmatprep.subr.bf16.mxu1 %v11174_v57  ;;  %v11212_v56 = vld [vmem:[%s14825_s1 + $0x7a0] sm:$0xff]   ;;  %v11213_v57 = vld [vmem:[%s14825_s1 + $0x758] sm:$0xff]  }
  0xcc   :  { %10077 = vmatpush3.bf16.msra.mxu0 %v11175_v58  ;;  %v11214_v58 = vld [vmem:[%s14825_s1 + $0x7d8] sm:$0xff]  }
  0xcd   :  { %10099 = vmatpush3.bf16.msra.mxu1 %v11176_v59  ;;  %10078 = vmatprep.subr.bf16.mxu0 %v11177_v60  ;;  %v11215_v59 = vld [vmem:[%s14825_s1 + $0x718] sm:$0xff]  }
  0xce   :  { %10100 = vmatprep.subr.bf16.mxu1 %v11178_v61  ;;  %v11216_v60 = vld [vmem:[%s14825_s1 + $0x798] sm:$0xff]   ;;  %v11217_v61 = vld [vmem:[%s14825_s1 + $0x750] sm:$0xff]  }
  0xd0   :  { %10079 = vmatpush3.bf16.msra.mxu0 %v11179_v62  ;;  %v11218_v62 = vld [vmem:[%s14825_s1 + $0x7d0] sm:$0xff]  }
  0xd1   :  { %10101 = vmatpush3.bf16.msra.mxu1 %v11180_v63  ;;  %10080 = vmatprep.subr.bf16.mxu0 %v11181_v0  ;;  %v11219_v63 = vld [vmem:[%s14825_s1 + $0x710] sm:$0xff]  }
  0xd2   :  { %10102 = vmatprep.subr.bf16.mxu1 %v11182_v1  ;;  %v11220_v0 = vld [vmem:[%s14825_s1 + $0x790] sm:$0xff]   ;;  %v11221_v1 = vld [vmem:[%s14825_s1 + $0x748] sm:$0xff]  }
  0xd4   :  { %10081 = vmatpush3.bf16.msra.mxu0 %v11183_v2  ;;  %v11222_v2 = vld [vmem:[%s14825_s1 + $0x7c8] sm:$0xff]  }
  0xd5   :  { %10103 = vmatpush3.bf16.msra.mxu1 %v11184_v3  ;;  %10082 = vmatprep.subr.bf16.mxu0 %v11185_v4  ;;  %v11223_v3 = vld [vmem:[%s14825_s1 + $0x708] sm:$0xff]  }
  0xd6   :  { %10104 = vmatprep.subr.bf16.mxu1 %v11186_v5  ;;  %v11224_v4 = vld [vmem:[%s14825_s1 + $0x788] sm:$0xff]  }
  0xd8   :  { %10083 = vmatpush3.bf16.msra.mxu0 %v11187_v6  ;;  %v11225_v6 = vld [vmem:[%s14825_s1 + $0x740] sm:$0xff]  }
  0xd9   :  { %10105 = vmatpush3.bf16.msra.mxu1 %v11188_v7  ;;  %10084 = vmatprep.subr.bf16.mxu0 %v11189_v8  ;;  %v11226_v8 = vld [vmem:[%s14825_s1 + $0x7c0] sm:$0xff]  }
  0xda   :  { %10106 = vmatprep.subr.bf16.mxu1 %v11190_v9 }
  0xdc   :  { %10085 = vmatpush3.bf16.msra.mxu0 %v11191_v10  ;;  %v11227_v10 = vld [vmem:[%s14825_s1 + $0x700] sm:$0xff]  }
  0xdd   :  { %10107 = vmatpush3.bf16.msra.mxu1 %v11192_v11  ;;  %10086 = vmatprep.subr.bf16.mxu0 %v11193_v12 }
  0xde   :  { %10108 = vmatprep.subr.bf16.mxu1 %v11194_v14  ;;  %v42_v14 = vld [vmem:[%s14824_s0 + $0x70] sm:$0xff] }
  0xe0   :  { %10087 = vmatpush3.bf16.msra.mxu0 %v11195_v16 }
  0xe1   :  { %10109 = vmatpush3.bf16.msra.mxu1 %v11196_v18  ;;  %10116 = vmatprep.subr.bf16.mxu0 %v11197_v32  ;;  %v43_v18 = vld [vmem:[%s14824_s0 + $0x78] sm:$0xff] }
  0xe2   :  { %10138 = vmatprep.subr.bf16.mxu1 %v11198_v34  ;;  %v11231_v32 = vld [vmem:[%s14825_s1 + $0x838] sm:$0xff]  }
  0xe3   :  { %v9824_v13 = vpop.f32.mrf.mxu0  ;;  %7280 = vmatmul.mubr.bf16.vlgmr.msra.gmra.mxu0 %v8966_v26  ;;  %v11229_v26 = vld [vmem:[%s14825_s1 + $0x878] sm:$0xff]  }
  0xe4   :  { %v9846_v15 = vpop.f32.mrf.mxu1  ;;  %7321 = vmatmul.mubr.bf16.vlgmr.msra.gmra.mxu1 %v8968_v30  ;;  %10117 = vmatpush3.bf16.msra.mxu0 %v11199_v37  ;;  %v11232_v34 = vld [vmem:[%s14825_s1 + $0x8b8] sm:$0xff]   ;;  %v11234_v37 = vld [vmem:[%s14825_s1 + $0x8f0] sm:$0xff]  }
  0xe5   :  { %v9825_v17 = vpop.f32.mrf.mxu0  ;;  %10139 = vmatpush3.bf16.msra.mxu1 %v11200_v39  ;;  %10118 = vmatprep.subr.bf16.mxu0 %v11201_v42  ;;  %v11235_v39 = vld [vmem:[%s14825_s1 + $0x830] sm:$0xff]   ;;  %v11238_v42 = vld [vmem:[%s14825_s1 + $0x8e8] sm:$0xff]  }
  0xe6   :  { %v9826_v19 = vadd.f32 %v9825_v17, %v9824_v13  ;;  %v9847_v20 = vpop.f32.mrf.mxu1  ;;  %10140 = vmatprep.subr.bf16.mxu1 %v11202_v44  ;;  %v11228_v13 = vld [vmem:[%s14825_s1 + $0x780] sm:$0xff]   ;;  %v90_v17 = vld [vmem:[%s14824_s0 + $0x1f0] sm:$0xff]  ;;  %v11240_v44 = vld [vmem:[%s14825_s1 + $0x8a8] sm:$0xff]  }
  0xe7   :  { %v9848_v24 = vadd.f32 %v9847_v20, %v9846_v15  ;;  %v9827_v25 = vpop.f32.mrf.mxu0  ;;  %v8970_v22 = vcombine.low %v42_v14, %v90_v17  ;;  %v8971_v23 = vcombine.high %v42_v14, %v90_v17  ;;  %v93_v14 = vld [vmem:[%s14824_s0 + $0x208] sm:$0xff] }
  0xe8   :  { %v9849_v29 = vpop.f32.mrf.mxu1  ;;  %v6790_v41 = vadd.f32 %v9826_v19, %v8941_v40  ;;  %10119 = vmatpush3.bf16.msra.mxu0 %v11203_v46  ;;  %v91_v19 = vld [vmem:[%s14824_s0 + $0x1f8] sm:$0xff]  ;;  %v11242_v46 = vld [vmem:[%s14825_s1 + $0x8e0] sm:$0xff]  }
  0xe9   :  { %v9828_v33 = vpop.f32.mrf.mxu0  ;;  %10141 = vmatpush3.bf16.msra.mxu1 %v11204_v48  ;;  %10120 = vmatprep.subr.bf16.mxu0 %v11205_v49  ;;  %v11244_v48 = vld [vmem:[%s14825_s1 + $0x8a0] sm:$0xff]   ;;  %v11245_v49 = vld [vmem:[%s14825_s1 + $0x858] sm:$0xff]  }
  0xea   :  { %v9829_v35 = vadd.f32 %v9828_v33, %v9827_v25  ;;  %v9850_v36 = vpop.f32.mrf.mxu1  ;;  %v12583_v45 = vadd.f32 %v9848_v24, %v6790_v41  ;;  %10142 = vmatprep.subr.bf16.mxu1 %v11206_v50  ;;  %v8972_v24 = vcombine.low %v43_v18, %v91_v19  ;;  %v8973_v25 = vcombine.high %v43_v18, %v91_v19  ;;  %v11237_v41 = vld [vmem:[%s14825_s1 + $0x868] sm:$0xff]   ;;  %v11246_v50 = vld [vmem:[%s14825_s1 + $0x8d8] sm:$0xff]  }
  0xeb   :  { %v9851_v38 = vadd.f32 %v9850_v36, %v9849_v29  ;;  %7361 = vmatprep.mubr.bf16.mxu0 %v8971_v23  ;;  %v11233_v36 = vld [vmem:[%s14825_s1 + $0x870] sm:$0xff]   ;;  %v11261_v18 = vld [vmem:[%s14825_s1 + $0x978] sm:$0xff]  }
  0xec   :  { %v6793_v43 = vadd.f32 %v9829_v35, %v8941_v40  ;;  %10121 = vmatpush3.bf16.msra.mxu0 %v11207_v51  ;;  %7402 = vmatprep.mubr.bf16.mxu1 %v8973_v25  ;;  %v11236_v40 = vld [vmem:[%s14825_s1 + $0x8b0] sm:$0xff]   ;;  %v11247_v51 = vld [vmem:[%s14825_s1 + $0x818] sm:$0xff]  }
  0xed   :  { %10143 = vmatpush3.bf16.msra.mxu1 %v11208_v52  ;;  %10122 = vmatprep.subr.bf16.mxu0 %v11209_v53  ;;  %v11248_v52 = vld [vmem:[%s14825_s1 + $0x898] sm:$0xff]   ;;  %v11249_v53 = vld [vmem:[%s14825_s1 + $0x850] sm:$0xff]  }
  0xee   :  { %v12588_v47 = vadd.f32 %v9851_v38, %v6793_v43  ;;  %10144 = vmatprep.subr.bf16.mxu1 %v11210_v54  ;;  %v11239_v43 = vld [vmem:[%s14825_s1 + $0x828] sm:$0xff]   ;;  %v11250_v54 = vld [vmem:[%s14825_s1 + $0x8d0] sm:$0xff]   ;;  %v11263_v25 = vld [vmem:[%s14825_s1 + $0x938] sm:$0xff]  }
  0xf0   :  { %10123 = vmatpush3.bf16.msra.mxu0 %v11211_v55  ;;  %v11251_v55 = vld [vmem:[%s14825_s1 + $0x810] sm:$0xff]  }
  0xf1   :  { %10145 = vmatpush3.bf16.msra.mxu1 %v11212_v56  ;;  %10124 = vmatprep.subr.bf16.mxu0 %v11213_v57  ;;  %v11252_v56 = vld [vmem:[%s14825_s1 + $0x890] sm:$0xff]   ;;  %v11253_v57 = vld [vmem:[%s14825_s1 + $0x848] sm:$0xff]  }
  0xf2   :  { %10146 = vmatprep.subr.bf16.mxu1 %v11214_v58  ;;  %v11254_v58 = vld [vmem:[%s14825_s1 + $0x8c8] sm:$0xff]  }
  0xf4   :  { %10125 = vmatpush3.bf16.msra.mxu0 %v11215_v59  ;;  %v11255_v59 = vld [vmem:[%s14825_s1 + $0x808] sm:$0xff]  }
  0xf5   :  { %10147 = vmatpush3.bf16.msra.mxu1 %v11216_v60  ;;  %10126 = vmatprep.subr.bf16.mxu0 %v11217_v61  ;;  %v11256_v60 = vld [vmem:[%s14825_s1 + $0x888] sm:$0xff]   ;;  %v11257_v61 = vld [vmem:[%s14825_s1 + $0x840] sm:$0xff]  }
  0xf6   :  { %10148 = vmatprep.subr.bf16.mxu1 %v11218_v62 }
  0xf8   :  { %10127 = vmatpush3.bf16.msra.mxu0 %v11219_v63 }
  0xf9   :  { %10149 = vmatpush3.bf16.msra.mxu1 %v11220_v0  ;;  %10128 = vmatprep.subr.bf16.mxu0 %v11221_v1  ;;  %v11258_v0 = vld [vmem:[%s14825_s1 + $0x8c0] sm:$0xff]  }
  0xfa   :  { %10150 = vmatprep.subr.bf16.mxu1 %v11222_v2  ;;  %v11259_v1 = vld [vmem:[%s14825_s1 + $0x800] sm:$0xff]  }
  0xfc   :  { %10129 = vmatpush3.bf16.msra.mxu0 %v11223_v3 }
  0xfd   :  { %10151 = vmatpush3.bf16.msra.mxu1 %v11224_v4  ;;  %10130 = vmatprep.subr.bf16.mxu0 %v11225_v6  ;;  %v11260_v4 = vld [vmem:[%s14825_s1 + $0x880] sm:$0xff]  }
  0xfe   :  { %10152 = vmatprep.subr.bf16.mxu1 %v11226_v8  ;;  %v92_v8 = vld [vmem:[%s14824_s0 + $0x200] sm:$0xff] }
 0x100   :  { %10131 = vmatpush3.bf16.msra.mxu0 %v11227_v10 }
 0x101   :  { %10153 = vmatpush3.bf16.msra.mxu1 %v11228_v13  ;;  %10160 = vmatprep.subr.bf16.mxu0 %v11229_v26  ;;  %v11264_v26 = vld [vmem:[%s14825_s1 + $0x9b8] sm:$0xff]  }
 0x102   :  { %10182 = vmatprep.subr.bf16.mxu1 %v11230_v28  ;;  %v11265_v28 = vld [vmem:[%s14825_s1 + $0x970] sm:$0xff]  }
 0x103   :  { %v9868_v5 = vpop.f32.mrf.mxu0  ;;  %7362 = vmatmul.mubr.bf16.vlgmr.msra.gmra.mxu0 %v8970_v22 }
 0x104   :  { %v9890_v7 = vpop.f32.mrf.mxu1  ;;  %7403 = vmatmul.mubr.bf16.vlgmr.msra.gmra.mxu1 %v8972_v24  ;;  %10161 = vmatpush3.bf16.msra.mxu0 %v11231_v32  ;;  %v11268_v32 = vld [vmem:[%s14825_s1 + $0x9b0] sm:$0xff]  }
 0x105   :  { %v9869_v9 = vpop.f32.mrf.mxu0  ;;  %10183 = vmatpush3.bf16.msra.mxu1 %v11232_v34  ;;  %10162 = vmatprep.subr.bf16.mxu0 %v11233_v36  ;;  %v11270_v34 = vld [vmem:[%s14825_s1 + $0x9e8] sm:$0xff]  }
 0x106   :  { %v9870_v11 = vadd.f32 %v9869_v9, %v9868_v5  ;;  %v9891_v12 = vpop.f32.mrf.mxu1  ;;  %10184 = vmatprep.subr.bf16.mxu1 %v11234_v37  ;;  %v45_v9 = vld [vmem:[%s14824_s0 + $0x88] sm:$0xff]  ;;  %v11273_v37 = vld [vmem:[%s14825_s1 + $0x960] sm:$0xff]  }
 0x107   :  { %v9892_v15 = vadd.f32 %v9891_v12, %v9890_v7  ;;  %v9871_v16 = vpop.f32.mrf.mxu0  ;;  %v44_v7 = vld [vmem:[%s14824_s0 + $0x80] sm:$0xff]  ;;  %v8977_v17 = vcombine.high %v45_v9, %v93_v14  ;;  %v11272_v36 = vld [vmem:[%s14825_s1 + $0x9a8] sm:$0xff]  }
 0x108   :  { %v6872_v20 = vadd.f32 %v9870_v11, %v12583_v45  ;;  %v9893_v21 = vpop.f32.mrf.mxu1  ;;  %10163 = vmatpush3.bf16.msra.mxu0 %v11235_v39  ;;  %v11241_v45 = vld [vmem:[%s14825_s1 + $0x860] sm:$0xff]   ;;  %v8974_v12 = vcombine.low %v44_v7, %v92_v8  ;;  %v8975_v13 = vcombine.high %v44_v7, %v92_v8 }
 0x109   :  { %v9872_v27 = vpop.f32.mrf.mxu0  ;;  %10185 = vmatpush3.bf16.msra.mxu1 %v11236_v40  ;;  %10164 = vmatprep.subr.bf16.mxu0 %v11237_v41  ;;  %v11275_v39 = vld [vmem:[%s14825_s1 + $0x920] sm:$0xff]   ;;  %v11277_v41 = vld [vmem:[%s14825_s1 + $0x958] sm:$0xff]  }
 0x10a   :  { %v12684_v29 = vadd.f32 %v9892_v15, %v6872_v20  ;;  %v9873_v30 = vadd.f32 %v9872_v27, %v9871_v16  ;;  %v9894_v31 = vpop.f32.mrf.mxu1  ;;  %10186 = vmatprep.subr.bf16.mxu1 %v11238_v42  ;;  %v8976_v16 = vcombine.low %v45_v9, %v93_v14  ;;  %7443 = vmatprep.mubr.bf16.mxu0 %v8975_v13  ;;  %v11276_v40 = vld [vmem:[%s14825_s1 + $0x9a0] sm:$0xff]   ;;  %v11278_v42 = vld [vmem:[%s14825_s1 + $0x9d8] sm:$0xff]  }
 0x10b   :  { %v9895_v33 = vadd.f32 %v9894_v31, %v9893_v21  ;;  %v11262_v21 = vld [vmem:[%s14825_s1 + $0x9f8] sm:$0xff]   ;;  %7484 = vmatprep.mubr.bf16.mxu1 %v8977_v17  ;;  %v11267_v31 = vld [vmem:[%s14825_s1 + $0x930] sm:$0xff]  }
 0x10c   :  { %v6875_v35 = vadd.f32 %v9873_v30, %v12588_v47  ;;  %10165 = vmatpush3.bf16.msra.mxu0 %v11239_v43  ;;  %v11243_v47 = vld [vmem:[%s14825_s1 + $0x820] sm:$0xff]   ;;  %v11279_v43 = vld [vmem:[%s14825_s1 + $0x918] sm:$0xff]  }
 0x10d   :  { %10187 = vmatpush3.bf16.msra.mxu1 %v11240_v44  ;;  %10166 = vmatprep.subr.bf16.mxu0 %v11241_v45  ;;  %v11280_v44 = vld [vmem:[%s14825_s1 + $0x998] sm:$0xff]   ;;  %v11281_v45 = vld [vmem:[%s14825_s1 + $0x950] sm:$0xff]  }
 0x10e   :  { %v12699_v38 = vadd.f32 %v9895_v33, %v6875_v35  ;;  %10188 = vmatprep.subr.bf16.mxu1 %v11242_v46  ;;  %v11269_v33 = vld [vmem:[%s14825_s1 + $0x968] sm:$0xff]   ;;  %v11282_v46 = vld [vmem:[%s14825_s1 + $0x9d0] sm:$0xff]  }
 0x10f   :  { %v11271_v35 = vld [vmem:[%s14825_s1 + $0x928] sm:$0xff]  }
 0x110   :  { %10167 = vmatpush3.bf16.msra.mxu0 %v11243_v47  ;;  %v11283_v47 = vld [vmem:[%s14825_s1 + $0x910] sm:$0xff]  }
 0x111   :  { %10189 = vmatpush3.bf16.msra.mxu1 %v11244_v48  ;;  %10168 = vmatprep.subr.bf16.mxu0 %v11245_v49  ;;  %v11284_v48 = vld [vmem:[%s14825_s1 + $0x990] sm:$0xff]   ;;  %v11285_v49 = vld [vmem:[%s14825_s1 + $0x948] sm:$0xff]  }
 0x112   :  { %10190 = vmatprep.subr.bf16.mxu1 %v11246_v50  ;;  %v11286_v50 = vld [vmem:[%s14825_s1 + $0x9c8] sm:$0xff]  }
 0x114   :  { %10169 = vmatpush3.bf16.msra.mxu0 %v11247_v51  ;;  %v11287_v51 = vld [vmem:[%s14825_s1 + $0x908] sm:$0xff]  }
 0x115   :  { %10191 = vmatpush3.bf16.msra.mxu1 %v11248_v52  ;;  %10170 = vmatprep.subr.bf16.mxu0 %v11249_v53  ;;  %v11288_v52 = vld [vmem:[%s14825_s1 + $0x988] sm:$0xff]  }
 0x116   :  { %10192 = vmatprep.subr.bf16.mxu1 %v11250_v54  ;;  %v11289_v54 = vld [vmem:[%s14825_s1 + $0x940] sm:$0xff]  }
 0x118   :  { %10171 = vmatpush3.bf16.msra.mxu0 %v11251_v55 }
 0x119   :  { %10193 = vmatpush3.bf16.msra.mxu1 %v11252_v56  ;;  %10172 = vmatprep.subr.bf16.mxu0 %v11253_v57  ;;  %v11290_v56 = vld [vmem:[%s14825_s1 + $0x9c0] sm:$0xff]  }
 0x11a   :  { %10194 = vmatprep.subr.bf16.mxu1 %v11254_v58  ;;  %v11291_v58 = vld [vmem:[%s14825_s1 + $0x900] sm:$0xff]  }
 0x11c   :  { %10173 = vmatpush3.bf16.msra.mxu0 %v11255_v59 }
 0x11d   :  { %10195 = vmatpush3.bf16.msra.mxu1 %v11256_v60  ;;  %10174 = vmatprep.subr.bf16.mxu0 %v11257_v61  ;;  %v11292_v61 = vld [vmem:[%s14825_s1 + $0x980] sm:$0xff]  }
 0x11e   :  { %10196 = vmatprep.subr.bf16.mxu1 %v11258_v0 }
 0x120   :  { %10175 = vmatpush3.bf16.msra.mxu0 %v11259_v1 }
 0x121   :  { %10197 = vmatpush3.bf16.msra.mxu1 %v11260_v4  ;;  %10204 = vmatprep.subr.bf16.mxu0 %v11261_v18  ;;  %v47_v4 = vld [vmem:[%s14824_s0 + $0x98] sm:$0xff] }
 0x122   :  { %10226 = vmatprep.subr.bf16.mxu1 %v11262_v21  ;;  %v11296_v18 = vld [vmem:[%s14825_s1 + $0xab8] sm:$0xff]   ;;  %v11298_v21 = vld [vmem:[%s14825_s1 + $0xaf0] sm:$0xff]  }
 0x123   :  { %v9912_v62 = vpop.f32.mrf.mxu0  ;;  %7444 = vmatmul.mubr.bf16.vlgmr.msra.gmra.mxu0 %v8974_v12  ;;  %v11294_v12 = vld [vmem:[%s14825_s1 + $0xaf8] sm:$0xff]  }
 0x124   :  { %v9934_v63 = vpop.f32.mrf.mxu1  ;;  %7485 = vmatmul.mubr.bf16.vlgmr.msra.gmra.mxu1 %v8976_v16  ;;  %10205 = vmatpush3.bf16.msra.mxu0 %v11263_v25  ;;  %v11295_v16 = vld [vmem:[%s14825_s1 + $0xa38] sm:$0xff]   ;;  %v11301_v25 = vld [vmem:[%s14825_s1 + $0xa68] sm:$0xff]  }
 0x125   :  { %v9913_v2 = vpop.f32.mrf.mxu0  ;;  %10227 = vmatpush3.bf16.msra.mxu1 %v11264_v26  ;;  %10206 = vmatprep.subr.bf16.mxu0 %v11265_v28  ;;  %v11302_v26 = vld [vmem:[%s14825_s1 + $0xae8] sm:$0xff]  }
 0x126   :  { %v9935_v3 = vpop.f32.mrf.mxu1  ;;  %v9914_v5 = vadd.f32 %v9913_v2, %v9912_v62  ;;  %v46_v62 = vld [vmem:[%s14824_s0 + $0x90] sm:$0xff]  ;;  %v11304_v28 = vld [vmem:[%s14825_s1 + $0xaa8] sm:$0xff]  }
 0x127   :  { %v9936_v6 = vadd.f32 %v9935_v3, %v9934_v63  ;;  %v9915_v10 = vpop.f32.mrf.mxu0  ;;  %v94_v63 = vld [vmem:[%s14824_s0 + $0x210] sm:$0xff] }
 0x128   :  { %v9937_v11 = vpop.f32.mrf.mxu1  ;;  %v6954_v15 = vadd.f32 %v9914_v5, %v12684_v29  ;;  %v11266_v29 = vld [vmem:[%s14825_s1 + $0x9f0] sm:$0xff]   ;;  %10207 = vmatpush3.bf16.msra.mxu0 %v11267_v31  ;;  %v8978_v2 = vcombine.low %v46_v62, %v94_v63  ;;  %v8979_v3 = vcombine.high %v46_v62, %v94_v63  ;;  %v95_v5 = vld [vmem:[%s14824_s0 + $0x218] sm:$0xff]  ;;  %v11307_v31 = vld [vmem:[%s14825_s1 + $0xa20] sm:$0xff]  }
 0x129   :  { %v9916_v19 = vpop.f32.mrf.mxu0  ;;  %10228 = vmatprep.subr.bf16.mxu1 %v11266_v29  ;;  %10208 = vmatprep.subr.bf16.mxu0 %v11269_v33  ;;  %v8980_v8 = vcombine.low %v47_v4, %v95_v5  ;;  %v8981_v9 = vcombine.high %v47_v4, %v95_v5  ;;  %v11305_v29 = vld [vmem:[%s14825_s1 + $0xa60] sm:$0xff]   ;;  %v11309_v33 = vld [vmem:[%s14825_s1 + $0xa58] sm:$0xff]  }
 0x12a   :  { %v9938_v20 = vpop.f32.mrf.mxu1  ;;  %v12798_v22 = vadd.f32 %v9936_v6, %v6954_v15  ;;  %v9917_v23 = vadd.f32 %v9916_v19, %v9915_v10  ;;  %10229 = vmatpush3.bf16.msra.mxu1 %v11268_v32  ;;  %v11293_v10 = vld [vmem:[%s14825_s1 + $0xa78] sm:$0xff]   ;;  %7525 = vmatprep.mubr.bf16.mxu0 %v8979_v3  ;;  %v11308_v32 = vld [vmem:[%s14825_s1 + $0xaa0] sm:$0xff]  }
 0x12b   :  { %v9939_v24 = vadd.f32 %v9938_v20, %v9937_v11  ;;  %10230 = vmatprep.subr.bf16.mxu1 %v11270_v34  ;;  %7566 = vmatprep.mubr.bf16.mxu1 %v8981_v9  ;;  %v11297_v20 = vld [vmem:[%s14825_s1 + $0xa70] sm:$0xff]   ;;  %v11310_v34 = vld [vmem:[%s14825_s1 + $0xad8] sm:$0xff]  }
 0x12c   :  { %v6957_v27 = vadd.f32 %v9917_v23, %v12699_v38  ;;  %10209 = vmatpush3.bf16.msra.mxu0 %v11271_v35  ;;  %v11274_v38 = vld [vmem:[%s14825_s1 + $0x9e0] sm:$0xff]   ;;  %v11299_v23 = vld [vmem:[%s14825_s1 + $0xa30] sm:$0xff]   ;;  %v11311_v35 = vld [vmem:[%s14825_s1 + $0xa18] sm:$0xff]  }
 0x12d   :  { %10210 = vmatprep.subr.bf16.mxu0 %v11273_v37  ;;  %v11313_v37 = vld [vmem:[%s14825_s1 + $0xa50] sm:$0xff]   ;;  %v11326_v4 = vld [vmem:[%s14825_s1 + $0xbf8] sm:$0xff]  }
 0x12e   :  { %v12813_v30 = vadd.f32 %v9939_v24, %v6957_v27  ;;  %10231 = vmatpush3.bf16.msra.mxu1 %v11272_v36  ;;  %v11300_v24 = vld [vmem:[%s14825_s1 + $0xab0] sm:$0xff]   ;;  %v11303_v27 = vld [vmem:[%s14825_s1 + $0xa28] sm:$0xff]   ;;  %v11312_v36 = vld [vmem:[%s14825_s1 + $0xa98] sm:$0xff]  }
 0x12f   :  { %10232 = vmatprep.subr.bf16.mxu1 %v11274_v38  ;;  %v11314_v38 = vld [vmem:[%s14825_s1 + $0xad0] sm:$0xff]  }
 0x130   :  { %10211 = vmatpush3.bf16.msra.mxu0 %v11275_v39  ;;  %v11315_v39 = vld [vmem:[%s14825_s1 + $0xa10] sm:$0xff]  }
 0x131   :  { %10212 = vmatprep.subr.bf16.mxu0 %v11277_v41  ;;  %v11317_v41 = vld [vmem:[%s14825_s1 + $0xa48] sm:$0xff]  }
 0x132   :  { %10233 = vmatpush3.bf16.msra.mxu1 %v11276_v40  ;;  %v11316_v40 = vld [vmem:[%s14825_s1 + $0xa90] sm:$0xff]  }
 0x133   :  { %10234 = vmatprep.subr.bf16.mxu1 %v11278_v42  ;;  %v11318_v42 = vld [vmem:[%s14825_s1 + $0xac8] sm:$0xff]  }
 0x134   :  { %10213 = vmatpush3.bf16.msra.mxu0 %v11279_v43  ;;  %v11319_v43 = vld [vmem:[%s14825_s1 + $0xa08] sm:$0xff]  }
 0x135   :  { %10214 = vmatprep.subr.bf16.mxu0 %v11281_v45 }
 0x136   :  { %10235 = vmatpush3.bf16.msra.mxu1 %v11280_v44  ;;  %v11320_v44 = vld [vmem:[%s14825_s1 + $0xa88] sm:$0xff]  }
 0x137   :  { %10236 = vmatprep.subr.bf16.mxu1 %v11282_v46  ;;  %v11321_v46 = vld [vmem:[%s14825_s1 + $0xa40] sm:$0xff]  }
 0x138   :  { %10215 = vmatpush3.bf16.msra.mxu0 %v11283_v47 }
 0x139   :  { %10216 = vmatprep.subr.bf16.mxu0 %v11285_v49 }
 0x13a   :  { %10237 = vmatpush3.bf16.msra.mxu1 %v11284_v48  ;;  %v11322_v48 = vld [vmem:[%s14825_s1 + $0xac0] sm:$0xff]  }
 0x13b   :  { %10238 = vmatprep.subr.bf16.mxu1 %v11286_v50  ;;  %v11323_v50 = vld [vmem:[%s14825_s1 + $0xa00] sm:$0xff]  }
 0x13c   :  { %10217 = vmatpush3.bf16.msra.mxu0 %v11287_v51 }
 0x13d   :  { %10218 = vmatprep.subr.bf16.mxu0 %v11289_v54  ;;  %v48_v54 = vld [vmem:[%s14824_s0 + $0xa0] sm:$0xff] }
 0x13e   :  { %10239 = vmatpush3.bf16.msra.mxu1 %v11288_v52 }
 0x13f   :  { %10240 = vmatprep.subr.bf16.mxu1 %v11290_v56 }
 0x140   :  { %10219 = vmatpush3.bf16.msra.mxu0 %v11291_v58  ;;  %v49_v58 = vld [vmem:[%s14824_s0 + $0xa8] sm:$0xff] }
 0x141   :  { %10248 = vmatprep.subr.bf16.mxu0 %v11293_v10  ;;  %v11328_v10 = vld [vmem:[%s14825_s1 + $0xbb8] sm:$0xff]  }
 0x142   :  { %10241 = vmatpush3.bf16.msra.mxu1 %v11292_v61 }
 0x143   :  { %v9956_v53 = vpop.f32.mrf.mxu0  ;;  %7526 = vmatmul.mubr.bf16.vlgmr.msra.gmra.mxu0 %v8978_v2  ;;  %10270 = vmatprep.subr.bf16.mxu1 %v11294_v12  ;;  %v11325_v2 = vld [vmem:[%s14825_s1 + $0xb78] sm:$0xff]   ;;  %v11329_v12 = vld [vmem:[%s14825_s1 + $0xb70] sm:$0xff]  }
 0x144   :  { %v9978_v55 = vpop.f32.mrf.mxu1  ;;  %10249 = vmatpush3.bf16.msra.mxu0 %v11295_v16  ;;  %v11332_v16 = vld [vmem:[%s14825_s1 + $0xbb0] sm:$0xff]  }
 0x145   :  { %v9957_v57 = vpop.f32.mrf.mxu0  ;;  %7567 = vmatmul.mubr.bf16.vlgmr.msra.gmra.mxu1 %v8980_v8  ;;  %10250 = vmatprep.subr.bf16.mxu0 %v11297_v20  ;;  %v11327_v8 = vld [vmem:[%s14825_s1 + $0xb38] sm:$0xff]   ;;  %v11336_v20 = vld [vmem:[%s14825_s1 + $0xba8] sm:$0xff]  }
 0x146   :  { %v9958_v59 = vadd.f32 %v9957_v57, %v9956_v53  ;;  %v9979_v60 = vpop.f32.mrf.mxu1  ;;  %10271 = vmatpush3.bf16.msra.mxu1 %v11296_v18  ;;  %v11324_v53 = vld [vmem:[%s14825_s1 + $0xa80] sm:$0xff]   ;;  %v11334_v18 = vld [vmem:[%s14825_s1 + $0xbe8] sm:$0xff]  }
 0x147   :  { %v9980_v0 = vadd.f32 %v9979_v60, %v9978_v55  ;;  %v9959_v1 = vpop.f32.mrf.mxu0  ;;  %10272 = vmatprep.subr.bf16.mxu1 %v11298_v21  ;;  %v96_v57 = vld [vmem:[%s14824_s0 + $0x220] sm:$0xff] }
 0x148   :  { %v7036_v6 = vadd.f32 %v9958_v59, %v12798_v22  ;;  %v9981_v7 = vpop.f32.mrf.mxu1  ;;  %10251 = vmatpush3.bf16.msra.mxu0 %v11299_v23  ;;  %v97_v59 = vld [vmem:[%s14824_s0 + $0x228] sm:$0xff]  ;;  %v8982_v62 = vcombine.low %v48_v54, %v96_v57  ;;  %v8983_v63 = vcombine.high %v48_v54, %v96_v57  ;;  %v11337_v21 = vld [vmem:[%s14825_s1 + $0xb60] sm:$0xff]   ;;  %v99_v54 = vld [vmem:[%s14824_s0 + $0x238] sm:$0xff] }
 0x149   :  { %v9960_v11 = vpop.f32.mrf.mxu0  ;;  %10252 = vmatprep.subr.bf16.mxu0 %v11301_v25  ;;  %v11339_v23 = vld [vmem:[%s14825_s1 + $0xb20] sm:$0xff]   ;;  %v11341_v25 = vld [vmem:[%s14825_s1 + $0xb58] sm:$0xff]  }
 0x14a   :  { %v12912_v13 = vadd.f32 %v9980_v0, %v7036_v6  ;;  %v9961_v14 = vadd.f32 %v9960_v11, %v9959_v1  ;;  %v9982_v15 = vpop.f32.mrf.mxu1  ;;  %10273 = vmatpush3.bf16.msra.mxu1 %v11300_v24  ;;  %v8984_v0 = vcombine.low %v49_v58, %v97_v59  ;;  %v8985_v1 = vcombine.high %v49_v58, %v97_v59  ;;  %v11340_v24 = vld [vmem:[%s14825_s1 + $0xba0] sm:$0xff]   ;;  %v11357_v58 = vld [vmem:[%s14825_s1 + $0xc78] sm:$0xff]  }
 0x14b   :  { %v9983_v17 = vadd.f32 %v9982_v15, %v9981_v7  ;;  %10274 = vmatprep.subr.bf16.mxu1 %v11302_v26  ;;  %7607 = vmatprep.mubr.bf16.mxu0 %v8983_v63  ;;  %v11331_v15 = vld [vmem:[%s14825_s1 + $0xb30] sm:$0xff]   ;;  %v11342_v26 = vld [vmem:[%s14825_s1 + $0xbd8] sm:$0xff]  }
 0x14c   :  { %v7039_v19 = vadd.f32 %v9961_v14, %v12813_v30  ;;  %10253 = vmatpush3.bf16.msra.mxu0 %v11303_v27  ;;  %v11306_v30 = vld [vmem:[%s14825_s1 + $0xae0] sm:$0xff]   ;;  %7648 = vmatprep.mubr.bf16.mxu1 %v8985_v1  ;;  %v11343_v27 = vld [vmem:[%s14825_s1 + $0xb18] sm:$0xff]  }
 0x14d   :  { %10254 = vmatprep.subr.bf16.mxu0 %v11305_v29  ;;  %v11345_v29 = vld [vmem:[%s14825_s1 + $0xb50] sm:$0xff]   ;;  %v11359_v1 = vld [vmem:[%s14825_s1 + $0xc38] sm:$0xff]  }
 0x14e   :  { %v12927_v22 = vadd.f32 %v9983_v17, %v7039_v19  ;;  %10275 = vmatpush3.bf16.msra.mxu1 %v11304_v28  ;;  %v11333_v17 = vld [vmem:[%s14825_s1 + $0xb68] sm:$0xff]   ;;  %v11344_v28 = vld [vmem:[%s14825_s1 + $0xb98] sm:$0xff]  }
 0x14f   :  { %10276 = vmatprep.subr.bf16.mxu1 %v11306_v30  ;;  %v11335_v19 = vld [vmem:[%s14825_s1 + $0xb28] sm:$0xff]   ;;  %v11346_v30 = vld [vmem:[%s14825_s1 + $0xbd0] sm:$0xff]  }
 0x150   :  { %10255 = vmatpush3.bf16.msra.mxu0 %v11307_v31  ;;  %v11347_v31 = vld [vmem:[%s14825_s1 + $0xb10] sm:$0xff]  }
 0x151   :  { %10256 = vmatprep.subr.bf16.mxu0 %v11309_v33  ;;  %v11349_v33 = vld [vmem:[%s14825_s1 + $0xb48] sm:$0xff]  }
 0x152   :  { %10277 = vmatpush3.bf16.msra.mxu1 %v11308_v32  ;;  %v11348_v32 = vld [vmem:[%s14825_s1 + $0xb90] sm:$0xff]  }
 0x153   :  { %10278 = vmatprep.subr.bf16.mxu1 %v11310_v34  ;;  %v11350_v34 = vld [vmem:[%s14825_s1 + $0xbc8] sm:$0xff]  }
 0x154   :  { %10257 = vmatpush3.bf16.msra.mxu0 %v11311_v35  ;;  %v11351_v35 = vld [vmem:[%s14825_s1 + $0xb08] sm:$0xff]  }
 0x155   :  { %10258 = vmatprep.subr.bf16.mxu0 %v11313_v37  ;;  %v11353_v37 = vld [vmem:[%s14825_s1 + $0xb40] sm:$0xff]  }
 0x156   :  { %10279 = vmatpush3.bf16.msra.mxu1 %v11312_v36  ;;  %v11352_v36 = vld [vmem:[%s14825_s1 + $0xb88] sm:$0xff]  }
 0x157   :  { %10280 = vmatprep.subr.bf16.mxu1 %v11314_v38 }
 0x158   :  { %10259 = vmatpush3.bf16.msra.mxu0 %v11315_v39 }
 0x159   :  { %10260 = vmatprep.subr.bf16.mxu0 %v11317_v41  ;;  %v11355_v41 = vld [vmem:[%s14825_s1 + $0xb00] sm:$0xff]  }
 0x15a   :  { %10281 = vmatpush3.bf16.msra.mxu1 %v11316_v40  ;;  %v11354_v40 = vld [vmem:[%s14825_s1 + $0xbc0] sm:$0xff]  }
 0x15b   :  { %10282 = vmatprep.subr.bf16.mxu1 %v11318_v42 }
 0x15c   :  { %10261 = vmatpush3.bf16.msra.mxu0 %v11319_v43 }
 0x15d   :  { %10262 = vmatprep.subr.bf16.mxu0 %v11321_v46 }
 0x15e   :  { %10283 = vmatpush3.bf16.msra.mxu1 %v11320_v44  ;;  %v11356_v44 = vld [vmem:[%s14825_s1 + $0xb80] sm:$0xff]  }
 0x15f   :  { %10284 = vmatprep.subr.bf16.mxu1 %v11322_v48  ;;  %v98_v48 = vld [vmem:[%s14824_s0 + $0x230] sm:$0xff] }
 0x160   :  { %10263 = vmatpush3.bf16.msra.mxu0 %v11323_v50 }
 0x161   :  { %10292 = vmatprep.subr.bf16.mxu0 %v11325_v2  ;;  %v11360_v2 = vld [vmem:[%s14825_s1 + $0xcb8] sm:$0xff]  }
 0x162   :  { %10285 = vmatpush3.bf16.msra.mxu1 %v11324_v53 }
 0x163   :  { %v10000_v45 = vpop.f32.mrf.mxu0  ;;  %7608 = vmatmul.mubr.bf16.vlgmr.msra.gmra.mxu0 %v8982_v62  ;;  %10314 = vmatprep.subr.bf16.mxu1 %v11326_v4  ;;  %v11361_v4 = vld [vmem:[%s14825_s1 + $0xc70] sm:$0xff]  }
 0x164   :  { %v10022_v47 = vpop.f32.mrf.mxu1  ;;  %10293 = vmatpush3.bf16.msra.mxu0 %v11327_v8  ;;  %v11364_v8 = vld [vmem:[%s14825_s1 + $0xcb0] sm:$0xff]  }
 0x165   :  { %v10001_v49 = vpop.f32.mrf.mxu0  ;;  %7649 = vmatmul.mubr.bf16.vlgmr.msra.gmra.mxu1 %v8984_v0  ;;  %10294 = vmatprep.subr.bf16.mxu0 %v11329_v12  ;;  %v11368_v12 = vld [vmem:[%s14825_s1 + $0xca8] sm:$0xff]  }
 0x166   :  { %v10002_v51 = vadd.f32 %v10001_v49, %v10000_v45  ;;  %v10023_v52 = vpop.f32.mrf.mxu1  ;;  %10315 = vmatpush3.bf16.msra.mxu1 %v11328_v10  ;;  %v51_v49 = vld [vmem:[%s14824_s0 + $0xb8] sm:$0xff]  ;;  %v11366_v10 = vld [vmem:[%s14825_s1 + $0xce8] sm:$0xff]  }
 0x167   :  { %v10024_v55 = vadd.f32 %v10023_v52, %v10022_v47  ;;  %v10003_v56 = vpop.f32.mrf.mxu0  ;;  %v50_v47 = vld [vmem:[%s14824_s0 + $0xb0] sm:$0xff]  ;;  %v8989_v57 = vcombine.high %v51_v49, %v99_v54 }
 0x168   :  { %v7118_v60 = vadd.f32 %v10002_v51, %v12912_v13  ;;  %v10025_v61 = vpop.f32.mrf.mxu1  ;;  %v11330_v13 = vld [vmem:[%s14825_s1 + $0xbf0] sm:$0xff]   ;;  %10295 = vmatpush3.bf16.msra.mxu0 %v11331_v15  ;;  %v8986_v52 = vcombine.low %v50_v47, %v98_v48  ;;  %v8987_v53 = vcombine.high %v50_v47, %v98_v48  ;;  %v11371_v15 = vld [vmem:[%s14825_s1 + $0xc20] sm:$0xff]  }
 0x169   :  { %v10004_v3 = vpop.f32.mrf.mxu0  ;;  %10316 = vmatprep.subr.bf16.mxu1 %v11330_v13  ;;  %10296 = vmatprep.subr.bf16.mxu0 %v11333_v17  ;;  %v11369_v13 = vld [vmem:[%s14825_s1 + $0xc60] sm:$0xff]   ;;  %v11373_v17 = vld [vmem:[%s14825_s1 + $0xc58] sm:$0xff]  }
 0x16a   :  { %v13026_v5 = vadd.f32 %v10024_v55, %v7118_v60  ;;  %v10005_v6 = vadd.f32 %v10004_v3, %v10003_v56  ;;  %v10026_v7 = vpop.f32.mrf.mxu1  ;;  %10317 = vmatpush3.bf16.msra.mxu1 %v11332_v16  ;;  %v8988_v56 = vcombine.low %v51_v49, %v99_v54  ;;  %7689 = vmatprep.mubr.bf16.mxu0 %v8987_v53  ;;  %v11372_v16 = vld [vmem:[%s14825_s1 + $0xca0] sm:$0xff]  }
 0x16b   :  { %v10027_v9 = vadd.f32 %v10026_v7, %v10025_v61  ;;  %10318 = vmatprep.subr.bf16.mxu1 %v11334_v18  ;;  %v11358_v61 = vld [vmem:[%s14825_s1 + $0xcf8] sm:$0xff]   ;;  %7730 = vmatprep.mubr.bf16.mxu1 %v8989_v57  ;;  %v11363_v7 = vld [vmem:[%s14825_s1 + $0xc30] sm:$0xff]  }
 0x16c   :  { %v7121_v11 = vadd.f32 %v10005_v6, %v12927_v22  ;;  %10297 = vmatpush3.bf16.msra.mxu0 %v11335_v19  ;;  %v11338_v22 = vld [vmem:[%s14825_s1 + $0xbe0] sm:$0xff]   ;;  %v11374_v18 = vld [vmem:[%s14825_s1 + $0xcd8] sm:$0xff]  }
 0x16d   :  { %10298 = vmatprep.subr.bf16.mxu0 %v11337_v21  ;;  %v11375_v19 = vld [vmem:[%s14825_s1 + $0xc18] sm:$0xff]   ;;  %v11377_v21 = vld [vmem:[%s14825_s1 + $0xc50] sm:$0xff]  }
 0x16e   :  { %v13041_v14 = vadd.f32 %v10027_v9, %v7121_v11  ;;  %10319 = vmatpush3.bf16.msra.mxu1 %v11336_v20  ;;  %v11365_v9 = vld [vmem:[%s14825_s1 + $0xc68] sm:$0xff]   ;;  %v11376_v20 = vld [vmem:[%s14825_s1 + $0xc98] sm:$0xff]  }
 0x16f   :  { %10320 = vmatprep.subr.bf16.mxu1 %v11338_v22  ;;  %v11367_v11 = vld [vmem:[%s14825_s1 + $0xc28] sm:$0xff]   ;;  %v11378_v22 = vld [vmem:[%s14825_s1 + $0xcd0] sm:$0xff]  }
 0x170   :  { %10299 = vmatpush3.bf16.msra.mxu0 %v11339_v23  ;;  %v11379_v23 = vld [vmem:[%s14825_s1 + $0xc10] sm:$0xff]  }
 0x171   :  { %10300 = vmatprep.subr.bf16.mxu0 %v11341_v25  ;;  %v11381_v25 = vld [vmem:[%s14825_s1 + $0xc48] sm:$0xff]  }
 0x172   :  { %10321 = vmatpush3.bf16.msra.mxu1 %v11340_v24  ;;  %v11380_v24 = vld [vmem:[%s14825_s1 + $0xc90] sm:$0xff]  }
 0x173   :  { %10322 = vmatprep.subr.bf16.mxu1 %v11342_v26  ;;  %v11382_v26 = vld [vmem:[%s14825_s1 + $0xcc8] sm:$0xff]  }
 0x174   :  { %10301 = vmatpush3.bf16.msra.mxu0 %v11343_v27  ;;  %v11383_v27 = vld [vmem:[%s14825_s1 + $0xc08] sm:$0xff]  }
 0x175   :  { %10302 = vmatprep.subr.bf16.mxu0 %v11345_v29 }
 0x176   :  { %10323 = vmatpush3.bf16.msra.mxu1 %v11344_v28  ;;  %v11384_v28 = vld [vmem:[%s14825_s1 + $0xc88] sm:$0xff]  }
 0x177   :  { %10324 = vmatprep.subr.bf16.mxu1 %v11346_v30  ;;  %v11385_v30 = vld [vmem:[%s14825_s1 + $0xc40] sm:$0xff]  }
 0x178   :  { %10303 = vmatpush3.bf16.msra.mxu0 %v11347_v31 }
 0x179   :  { %10304 = vmatprep.subr.bf16.mxu0 %v11349_v33 }
 0x17a   :  { %10325 = vmatpush3.bf16.msra.mxu1 %v11348_v32  ;;  %v11386_v32 = vld [vmem:[%s14825_s1 + $0xcc0] sm:$0xff]  }
 0x17b   :  { %10326 = vmatprep.subr.bf16.mxu1 %v11350_v34  ;;  %v11387_v34 = vld [vmem:[%s14825_s1 + $0xc00] sm:$0xff]  }
 0x17c   :  { %10305 = vmatpush3.bf16.msra.mxu0 %v11351_v35 }
 0x17d   :  { %10306 = vmatprep.subr.bf16.mxu0 %v11353_v37  ;;  %v11388_v37 = vld [vmem:[%s14825_s1 + $0xc80] sm:$0xff]  }
 0x17e   :  { %10327 = vmatpush3.bf16.msra.mxu1 %v11352_v36 }
 0x17f   :  { %10328 = vmatprep.subr.bf16.mxu1 %v11354_v40 }
 0x180   :  { %10307 = vmatpush3.bf16.msra.mxu0 %v11355_v41 }
 0x181   :  { %10336 = vmatprep.subr.bf16.mxu0 %v11357_v58  ;;  %v11392_v58 = vld [vmem:[%s14825_s1 + $0xdb8] sm:$0xff]  }
 0x182   :  { %10329 = vmatpush3.bf16.msra.mxu1 %v11356_v44  ;;  %v53_v44 = vld [vmem:[%s14824_s0 + $0xc8] sm:$0xff] }
 0x183   :  { %v10044_v38 = vpop.f32.mrf.mxu0  ;;  %7690 = vmatmul.mubr.bf16.vlgmr.msra.gmra.mxu0 %v8986_v52  ;;  %10358 = vmatprep.subr.bf16.mxu1 %v11358_v61  ;;  %v11390_v52 = vld [vmem:[%s14825_s1 + $0xdf8] sm:$0xff]   ;;  %v11394_v61 = vld [vmem:[%s14825_s1 + $0xdf0] sm:$0xff]  }
 0x184   :  { %v10066_v39 = vpop.f32.mrf.mxu1  ;;  %10337 = vmatpush3.bf16.msra.mxu0 %v11359_v1  ;;  %v11397_v1 = vld [vmem:[%s14825_s1 + $0xd68] sm:$0xff]  }
 0x185   :  { %v10045_v42 = vpop.f32.mrf.mxu0  ;;  %7731 = vmatmul.mubr.bf16.vlgmr.msra.gmra.mxu1 %v8988_v56  ;;  %10338 = vmatprep.subr.bf16.mxu0 %v11361_v4  ;;  %v11391_v56 = vld [vmem:[%s14825_s1 + $0xd38] sm:$0xff]   ;;  %v11400_v4 = vld [vmem:[%s14825_s1 + $0xda8] sm:$0xff]  }
 0x186   :  { %v10067_v43 = vpop.f32.mrf.mxu1  ;;  %v10046_v45 = vadd.f32 %v10045_v42, %v10044_v38  ;;  %10359 = vmatpush3.bf16.msra.mxu1 %v11360_v2  ;;  %v52_v38 = vld [vmem:[%s14824_s0 + $0xc0] sm:$0xff]  ;;  %v11398_v2 = vld [vmem:[%s14825_s1 + $0xde8] sm:$0xff]  }
 0x187   :  { %v10068_v46 = vadd.f32 %v10067_v43, %v10066_v39  ;;  %v10047_v50 = vpop.f32.mrf.mxu0  ;;  %v100_v39 = vld [vmem:[%s14824_s0 + $0x240] sm:$0xff] }
 0x188   :  { %v10069_v51 = vpop.f32.mrf.mxu1  ;;  %v7200_v55 = vadd.f32 %v10046_v45, %v13026_v5  ;;  %v11362_v5 = vld [vmem:[%s14825_s1 + $0xcf0] sm:$0xff]   ;;  %10339 = vmatpush3.bf16.msra.mxu0 %v11363_v7  ;;  %v8990_v42 = vcombine.low %v52_v38, %v100_v39  ;;  %v8991_v43 = vcombine.high %v52_v38, %v100_v39  ;;  %v101_v45 = vld [vmem:[%s14824_s0 + $0x248] sm:$0xff]  ;;  %v11403_v7 = vld [vmem:[%s14825_s1 + $0xd20] sm:$0xff]  }
 0x189   :  { %v10048_v59 = vpop.f32.mrf.mxu0  ;;  %10360 = vmatprep.subr.bf16.mxu1 %v11362_v5  ;;  %10340 = vmatprep.subr.bf16.mxu0 %v11365_v9  ;;  %v8992_v48 = vcombine.low %v53_v44, %v101_v45  ;;  %v8993_v49 = vcombine.high %v53_v44, %v101_v45  ;;  %v11401_v5 = vld [vmem:[%s14825_s1 + $0xd60] sm:$0xff]   ;;  %v11405_v9 = vld [vmem:[%s14825_s1 + $0xd58] sm:$0xff]  }
 0x18a   :  { %v10070_v60 = vpop.f32.mrf.mxu1  ;;  %v13140_v62 = vadd.f32 %v10068_v46, %v7200_v55  ;;  %v10049_v63 = vadd.f32 %v10048_v59, %v10047_v50  ;;  %10361 = vmatpush3.bf16.msra.mxu1 %v11364_v8  ;;  %v11389_v50 = vld [vmem:[%s14825_s1 + $0xd78] sm:$0xff]   ;;  %7771 = vmatprep.mubr.bf16.mxu0 %v8991_v43  ;;  %v11404_v8 = vld [vmem:[%s14825_s1 + $0xda0] sm:$0xff]  }
 0x18b   :  { %v10071_v0 = vadd.f32 %v10070_v60, %v10069_v51  ;;  %10362 = vmatprep.subr.bf16.mxu1 %v11366_v10  ;;  %7812 = vmatprep.mubr.bf16.mxu1 %v8993_v49  ;;  %v11393_v60 = vld [vmem:[%s14825_s1 + $0xd70] sm:$0xff]   ;;  %v11406_v10 = vld [vmem:[%s14825_s1 + $0xdd8] sm:$0xff]  }
 0x18c   :  { %v7203_v3 = vadd.f32 %v10049_v63, %v13041_v14  ;;  %10341 = vmatpush3.bf16.msra.mxu0 %v11367_v11  ;;  %v11370_v14 = vld [vmem:[%s14825_s1 + $0xce0] sm:$0xff]   ;;  %v11395_v63 = vld [vmem:[%s14825_s1 + $0xd30] sm:$0xff]   ;;  %v11407_v11 = vld [vmem:[%s14825_s1 + $0xd18] sm:$0xff]  }
 0x18d   :  { %10342 = vmatprep.subr.bf16.mxu0 %v11369_v13  ;;  %v11409_v13 = vld [vmem:[%s14825_s1 + $0xd50] sm:$0xff]   ;;  %v11424_v49 = vld [vmem:[%s14825_s1 + $0xeb8] sm:$0xff]  }
 0x18e   :  { %v13155_v6 = vadd.f32 %v10071_v0, %v7203_v3  ;;  %10363 = vmatpush3.bf16.msra.mxu1 %v11368_v12  ;;  %v11396_v0 = vld [vmem:[%s14825_s1 + $0xdb0] sm:$0xff]   ;;  %v11399_v3 = vld [vmem:[%s14825_s1 + $0xd28] sm:$0xff]   ;;  %v11408_v12 = vld [vmem:[%s14825_s1 + $0xd98] sm:$0xff]  }
 0x18f   :  { %10364 = vmatprep.subr.bf16.mxu1 %v11370_v14  ;;  %v11410_v14 = vld [vmem:[%s14825_s1 + $0xdd0] sm:$0xff]  }
 0x190   :  { %10343 = vmatpush3.bf16.msra.mxu0 %v11371_v15  ;;  %v11411_v15 = vld [vmem:[%s14825_s1 + $0xd10] sm:$0xff]  }
 0x191   :  { %10344 = vmatprep.subr.bf16.mxu0 %v11373_v17  ;;  %v11413_v17 = vld [vmem:[%s14825_s1 + $0xd48] sm:$0xff]  }
 0x192   :  { %10365 = vmatpush3.bf16.msra.mxu1 %v11372_v16  ;;  %v11412_v16 = vld [vmem:[%s14825_s1 + $0xd90] sm:$0xff]  }
 0x193   :  { %10366 = vmatprep.subr.bf16.mxu1 %v11374_v18  ;;  %v11414_v18 = vld [vmem:[%s14825_s1 + $0xdc8] sm:$0xff]  }
 0x194   :  { %10345 = vmatpush3.bf16.msra.mxu0 %v11375_v19  ;;  %v11415_v19 = vld [vmem:[%s14825_s1 + $0xd08] sm:$0xff]  }
 0x195   :  { %10346 = vmatprep.subr.bf16.mxu0 %v11377_v21  ;;  %v11417_v21 = vld [vmem:[%s14825_s1 + $0xd40] sm:$0xff]  }
 0x196   :  { %10367 = vmatpush3.bf16.msra.mxu1 %v11376_v20  ;;  %v11416_v20 = vld [vmem:[%s14825_s1 + $0xd88] sm:$0xff]  }
 0x197   :  { %10368 = vmatprep.subr.bf16.mxu1 %v11378_v22 }
 0x198   :  { %10347 = vmatpush3.bf16.msra.mxu0 %v11379_v23 }
 0x199   :  { %10348 = vmatprep.subr.bf16.mxu0 %v11381_v25  ;;  %v11419_v25 = vld [vmem:[%s14825_s1 + $0xd00] sm:$0xff]  }
 0x19a   :  { %10369 = vmatpush3.bf16.msra.mxu1 %v11380_v24  ;;  %v11418_v24 = vld [vmem:[%s14825_s1 + $0xdc0] sm:$0xff]  }
 0x19b   :  { %10370 = vmatprep.subr.bf16.mxu1 %v11382_v26 }
 0x19c   :  { %10349 = vmatpush3.bf16.msra.mxu0 %v11383_v27 }
 0x19d   :  { %10350 = vmatprep.subr.bf16.mxu0 %v11385_v30 }
 0x19e   :  { %10371 = vmatpush3.bf16.msra.mxu1 %v11384_v28  ;;  %v11420_v28 = vld [vmem:[%s14825_s1 + $0xd80] sm:$0xff]  }
 0x19f   :  { %10372 = vmatprep.subr.bf16.mxu1 %v11386_v32  ;;  %v102_v32 = vld [vmem:[%s14824_s0 + $0x250] sm:$0xff] }
 0x1a0   :  { %10351 = vmatpush3.bf16.msra.mxu0 %v11387_v34  ;;  %v103_v34 = vld [vmem:[%s14824_s0 + $0x258] sm:$0xff] }
 0x1a1   :  { %10380 = vmatprep.subr.bf16.mxu0 %v11389_v50 }
 0x1a2   :  { %10373 = vmatpush3.bf16.msra.mxu1 %v11388_v37 }
 0x1a3   :  { %v10088_v29 = vpop.f32.mrf.mxu0  ;;  %7772 = vmatmul.mubr.bf16.vlgmr.msra.gmra.mxu0 %v8990_v42  ;;  %10402 = vmatprep.subr.bf16.mxu1 %v11390_v52  ;;  %v11422_v42 = vld [vmem:[%s14825_s1 + $0xef8] sm:$0xff]  }
 0x1a4   :  { %v10110_v31 = vpop.f32.mrf.mxu1  ;;  %10381 = vmatpush3.bf16.msra.mxu0 %v11391_v56  ;;  %v11428_v56 = vld [vmem:[%s14825_s1 + $0xeb0] sm:$0xff]  }
 0x1a5   :  { %v10089_v33 = vpop.f32.mrf.mxu0  ;;  %7813 = vmatmul.mubr.bf16.vlgmr.msra.gmra.mxu1 %v8992_v48  ;;  %10382 = vmatprep.subr.bf16.mxu0 %v11393_v60  ;;  %v11432_v60 = vld [vmem:[%s14825_s1 + $0xea8] sm:$0xff]  }
 0x1a6   :  { %v10090_v35 = vadd.f32 %v10089_v33, %v10088_v29  ;;  %v10111_v36 = vpop.f32.mrf.mxu1  ;;  %10403 = vmatpush3.bf16.msra.mxu1 %v11392_v58  ;;  %v54_v29 = vld [vmem:[%s14824_s0 + $0xd0] sm:$0xff]  ;;  %v55_v33 = vld [vmem:[%s14824_s0 + $0xd8] sm:$0xff]  ;;  %v11430_v58 = vld [vmem:[%s14825_s1 + $0xee8] sm:$0xff]  }
 0x1a7   :  { %v10112_v40 = vadd.f32 %v10111_v36, %v10110_v31  ;;  %v10091_v41 = vpop.f32.mrf.mxu0  ;;  %10404 = vmatprep.subr.bf16.mxu1 %v11394_v61  ;;  %v8994_v37 = vcombine.low %v54_v29, %v102_v32  ;;  %v8995_v38 = vcombine.high %v54_v29, %v102_v32  ;;  %v8996_v39 = vcombine.low %v55_v33, %v103_v34  ;;  %v11433_v61 = vld [vmem:[%s14825_s1 + $0xe60] sm:$0xff]   ;;  %v11457_v29 = vld [vmem:[%s14825_s1 + $0xf70] sm:$0xff]  }
 0x1a8   :  { %v7282_v46 = vadd.f32 %v10090_v35, %v13140_v62  ;;  %v10113_v47 = vpop.f32.mrf.mxu1  ;;  %10383 = vmatpush3.bf16.msra.mxu0 %v11395_v63  ;;  %v11435_v63 = vld [vmem:[%s14825_s1 + $0xe20] sm:$0xff]   ;;  %v11460_v32 = vld [vmem:[%s14825_s1 + $0xfb0] sm:$0xff]  }
 0x1a9   :  { %v10092_v51 = vpop.f32.mrf.mxu0  ;;  %10384 = vmatprep.subr.bf16.mxu0 %v11397_v1  ;;  %7853 = vmatprep.mubr.bf16.mxu0 %v8995_v38  ;;  %v11437_v1 = vld [vmem:[%s14825_s1 + $0xe58] sm:$0xff]   ;;  %v11466_v38 = vld [vmem:[%s14825_s1 + $0xfe0] sm:$0xff]  }
 0x1aa   :  { %v13254_v53 = vadd.f32 %v10112_v40, %v7282_v46  ;;  %v10093_v54 = vadd.f32 %v10092_v51, %v10091_v41  ;;  %v10114_v55 = vpop.f32.mrf.mxu1  ;;  %10405 = vmatpush3.bf16.msra.mxu1 %v11396_v0  ;;  %v8997_v40 = vcombine.high %v55_v33, %v103_v34  ;;  %v11421_v41 = vld [vmem:[%s14825_s1 + $0xe78] sm:$0xff]   ;;  %v11425_v51 = vld [vmem:[%s14825_s1 + $0xe70] sm:$0xff]   ;;  %v11436_v0 = vld [vmem:[%s14825_s1 + $0xea0] sm:$0xff]  }
 0x1ab   :  { %v10115_v57 = vadd.f32 %v10114_v55, %v10113_v47  ;;  %10406 = vmatprep.subr.bf16.mxu1 %v11398_v2  ;;  %v11423_v46 = vld [vmem:[%s14825_s1 + $0xe38] sm:$0xff]   ;;  %v11461_v33 = vld [vmem:[%s14825_s1 + $0xf68] sm:$0xff]  }
 0x1ac   :  { %v7285_v59 = vadd.f32 %v10093_v54, %v13155_v6  ;;  %10385 = vmatpush3.bf16.msra.mxu0 %v11399_v3  ;;  %v11402_v6 = vld [vmem:[%s14825_s1 + $0xde0] sm:$0xff]   ;;  %7894 = vmatprep.mubr.bf16.mxu1 %v8997_v40  ;;  %v11427_v54 = vld [vmem:[%s14825_s1 + $0xe30] sm:$0xff]   ;;  %v11438_v2 = vld [vmem:[%s14825_s1 + $0xed8] sm:$0xff]  }
 0x1ad   :  { %10386 = vmatprep.subr.bf16.mxu0 %v11401_v5  ;;  %v11439_v3 = vld [vmem:[%s14825_s1 + $0xe18] sm:$0xff]   ;;  %v11441_v5 = vld [vmem:[%s14825_s1 + $0xe50] sm:$0xff]   ;;  %v11462_v34 = vld [vmem:[%s14825_s1 + $0xfe8] sm:$0xff]  }
 0x1ae   :  { %v13269_v62 = vadd.f32 %v10115_v57, %v7285_v59  ;;  %10407 = vmatpush3.bf16.msra.mxu1 %v11400_v4  ;;  %v11429_v57 = vld [vmem:[%s14825_s1 + $0xe68] sm:$0xff]   ;;  %v11440_v4 = vld [vmem:[%s14825_s1 + $0xe98] sm:$0xff]   ;;  %v11468_v40 = vld [vmem:[%s14825_s1 + $0xfa0] sm:$0xff]  }
 0x1af   :  { %10408 = vmatprep.subr.bf16.mxu1 %v11402_v6  ;;  %v11431_v59 = vld [vmem:[%s14825_s1 + $0xe28] sm:$0xff]   ;;  %v11442_v6 = vld [vmem:[%s14825_s1 + $0xed0] sm:$0xff]  }
 0x1b0   :  { %10387 = vmatpush3.bf16.msra.mxu0 %v11403_v7  ;;  %v11443_v7 = vld [vmem:[%s14825_s1 + $0xe10] sm:$0xff]  }
 0x1b1   :  { %10388 = vmatprep.subr.bf16.mxu0 %v11405_v9  ;;  %v11445_v9 = vld [vmem:[%s14825_s1 + $0xe48] sm:$0xff]  }
 0x1b2   :  { %10409 = vmatpush3.bf16.msra.mxu1 %v11404_v8  ;;  %v11444_v8 = vld [vmem:[%s14825_s1 + $0xe90] sm:$0xff]  }
 0x1b3   :  { %10410 = vmatprep.subr.bf16.mxu1 %v11406_v10  ;;  %v11446_v10 = vld [vmem:[%s14825_s1 + $0xec8] sm:$0xff]  }
 0x1b4   :  { %10389 = vmatpush3.bf16.msra.mxu0 %v11407_v11  ;;  %v11447_v11 = vld [vmem:[%s14825_s1 + $0xe08] sm:$0xff]  }
 0x1b5   :  { %10390 = vmatprep.subr.bf16.mxu0 %v11409_v13  ;;  %v11449_v13 = vld [vmem:[%s14825_s1 + $0xe40] sm:$0xff]  }
 0x1b6   :  { %10411 = vmatpush3.bf16.msra.mxu1 %v11408_v12  ;;  %v11448_v12 = vld [vmem:[%s14825_s1 + $0xe88] sm:$0xff]  }
 0x1b7   :  { %10412 = vmatprep.subr.bf16.mxu1 %v11410_v14  ;;  %v11450_v14 = vld [vmem:[%s14825_s1 + $0xec0] sm:$0xff]  }
 0x1b8   :  { %10391 = vmatpush3.bf16.msra.mxu0 %v11411_v15  ;;  %v11451_v15 = vld [vmem:[%s14825_s1 + $0xe00] sm:$0xff]  }
 0x1b9   :  { %10392 = vmatprep.subr.bf16.mxu0 %v11413_v17  ;;  %v56_v17 = vld [vmem:[%s14824_s0 + $0xe0] sm:$0xff] }
 0x1ba   :  { %10413 = vmatpush3.bf16.msra.mxu1 %v11412_v16  ;;  %v11452_v16 = vld [vmem:[%s14825_s1 + $0xe80] sm:$0xff]  }
 0x1bb   :  { %10414 = vmatprep.subr.bf16.mxu1 %v11414_v18  ;;  %v104_v18 = vld [vmem:[%s14824_s0 + $0x260] sm:$0xff] }
 0x1bc   :  { %10393 = vmatpush3.bf16.msra.mxu0 %v11415_v19  ;;  %v57_v19 = vld [vmem:[%s14824_s0 + $0xe8] sm:$0xff] }
 0x1bd   :  { %10394 = vmatprep.subr.bf16.mxu0 %v11417_v21  ;;  %v8999_v21 = vcombine.high %v56_v17, %v104_v18 }
 0x1be   :  { %10415 = vmatpush3.bf16.msra.mxu1 %v11416_v20  ;;  %v8998_v20 = vcombine.low %v56_v17, %v104_v18  ;;  %v11499_v17 = vld [vmem:[%s14825_s1 + $0x1020] sm:$0xff]  }
 0x1bf   :  { %10416 = vmatprep.subr.bf16.mxu1 %v11418_v24  ;;  %v11500_v18 = vld [vmem:[%s14825_s1 + $0x10a0] sm:$0xff]  }
 0x1c0   :  { %10395 = vmatpush3.bf16.msra.mxu0 %v11419_v25  ;;  %v11453_v25 = vld [vmem:[%s14825_s1 + $0xf78] sm:$0xff]  }
 0x1c1   :  { %10424 = vmatprep.subr.bf16.mxu0 %v11421_v41  ;;  %v11469_v41 = vld [vmem:[%s14825_s1 + $0xf58] sm:$0xff]  }
 0x1c2   :  { %10417 = vmatpush3.bf16.msra.mxu1 %v11420_v28  ;;  %v11456_v28 = vld [vmem:[%s14825_s1 + $0xfb8] sm:$0xff]  }
 0x1c3   :  { %v10132_v22 = vpop.f32.mrf.mxu0  ;;  %7854 = vmatmul.mubr.bf16.vlgmr.msra.gmra.mxu0 %v8994_v37  ;;  %10446 = vmatprep.subr.bf16.mxu1 %v11422_v42  ;;  %v11465_v37 = vld [vmem:[%s14825_s1 + $0xf60] sm:$0xff]   ;;  %v11470_v42 = vld [vmem:[%s14825_s1 + $0xfd8] sm:$0xff]  }
 0x1c4   :  { %v10154_v23 = vpop.f32.mrf.mxu1  ;;  %10425 = vmatpush3.bf16.msra.mxu0 %v11423_v46  ;;  %7935 = vmatprep.mubr.bf16.mxu0 %v8999_v21  ;;  %v11474_v46 = vld [vmem:[%s14825_s1 + $0xfd0] sm:$0xff]   ;;  %v11503_v21 = vld [vmem:[%s14825_s1 + $0x1018] sm:$0xff]  }
 0x1c5   :  { %v10133_v26 = vpop.f32.mrf.mxu0  ;;  %7895 = vmatmul.mubr.bf16.vlgmr.msra.gmra.mxu1 %v8996_v39  ;;  %10426 = vmatprep.subr.bf16.mxu0 %v11425_v51  ;;  %v11467_v39 = vld [vmem:[%s14825_s1 + $0xf20] sm:$0xff]   ;;  %v11478_v51 = vld [vmem:[%s14825_s1 + $0xfc8] sm:$0xff]  }
 0x1c6   :  { %v10155_v27 = vpop.f32.mrf.mxu1  ;;  %v10134_v30 = vadd.f32 %v10133_v26, %v10132_v22  ;;  %10447 = vmatpush3.bf16.msra.mxu1 %v11424_v49  ;;  %v105_v22 = vld [vmem:[%s14824_s0 + $0x268] sm:$0xff]  ;;  %v11454_v26 = vld [vmem:[%s14825_s1 + $0xff8] sm:$0xff]  }
 0x1c7   :  { %v10156_v31 = vadd.f32 %v10155_v27, %v10154_v23  ;;  %v10135_v35 = vpop.f32.mrf.mxu0  ;;  %v9000_v23 = vcombine.low %v57_v19, %v105_v22  ;;  %v9001_v24 = vcombine.high %v57_v19, %v105_v22  ;;  %v11455_v27 = vld [vmem:[%s14825_s1 + $0xf38] sm:$0xff]   ;;  %v11477_v49 = vld [vmem:[%s14825_s1 + $0xf48] sm:$0xff]  }
 0x1c8   :  { %v10157_v36 = vpop.f32.mrf.mxu1  ;;  %v7364_v43 = vadd.f32 %v10134_v30, %v13254_v53  ;;  %v11426_v53 = vld [vmem:[%s14825_s1 + $0xef0] sm:$0xff]   ;;  %10427 = vmatpush3.bf16.msra.mxu0 %v11427_v54  ;;  %v11481_v54 = vld [vmem:[%s14825_s1 + $0xf40] sm:$0xff]   ;;  %v11501_v19 = vld [vmem:[%s14825_s1 + $0x1058] sm:$0xff]  }
 0x1c9   :  { %v10136_v44 = vpop.f32.mrf.mxu0  ;;  %10448 = vmatprep.subr.bf16.mxu1 %v11426_v53  ;;  %10428 = vmatprep.subr.bf16.mxu0 %v11429_v57  ;;  %v11458_v30 = vld [vmem:[%s14825_s1 + $0xff0] sm:$0xff]   ;;  %v11480_v53 = vld [vmem:[%s14825_s1 + $0xf88] sm:$0xff]   ;;  %v11483_v57 = vld [vmem:[%s14825_s1 + $0xf00] sm:$0xff]  }
 0x1ca   :  { %v10158_v45 = vpop.f32.mrf.mxu1  ;;  %v10137_v47 = vadd.f32 %v10136_v44, %v10135_v35  ;;  %v13374_v50 = vadd.f32 %v10156_v31, %v7364_v43  ;;  %10449 = vmatpush3.bf16.msra.mxu1 %v11428_v56  ;;  %7976 = vmatprep.mubr.bf16.mxu1 %v9001_v24  ;;  %v11459_v31 = vld [vmem:[%s14825_s1 + $0xf30] sm:$0xff]   ;;  %v11463_v35 = vld [vmem:[%s14825_s1 + $0xf28] sm:$0xff]   ;;  %v11471_v43 = vld [vmem:[%s14825_s1 + $0xf18] sm:$0xff]  }
 0x1cb   :  { %v10159_v48 = vadd.f32 %v10158_v45, %v10157_v36  ;;  %10450 = vmatprep.subr.bf16.mxu1 %v11430_v58  ;;  %v11464_v36 = vld [vmem:[%s14825_s1 + $0xfa8] sm:$0xff]   ;;  %v11472_v44 = vld [vmem:[%s14825_s1 + $0xf98] sm:$0xff]   ;;  %v11473_v45 = vld [vmem:[%s14825_s1 + $0xf50] sm:$0xff]  }
 0x1cc   :  { %v7367_v52 = vadd.f32 %v10137_v47, %v13269_v62  ;;  %10429 = vmatpush3.bf16.msra.mxu0 %v11431_v59  ;;  %v11434_v62 = vld [vmem:[%s14825_s1 + $0xee0] sm:$0xff]   ;;  %v11475_v47 = vld [vmem:[%s14825_s1 + $0xf10] sm:$0xff]   ;;  %v11504_v22 = vld [vmem:[%s14825_s1 + $0x1098] sm:$0xff]  }
 0x1cd   :  { %10430 = vmatprep.subr.bf16.mxu0 %v11433_v61  ;;  %v11482_v56 = vld [vmem:[%s14825_s1 + $0xfc0] sm:$0xff]   ;;  %v58_v59 = vld [vmem:[%s14824_s0 + $0xf0] sm:$0xff] }
 0x1ce   :  { %v13386_v55 = vadd.f32 %v10159_v48, %v7367_v52  ;;  %10451 = vmatpush3.bf16.msra.mxu1 %v11432_v60  ;;  %v11476_v48 = vld [vmem:[%s14825_s1 + $0xf90] sm:$0xff]   ;;  %v11479_v52 = vld [vmem:[%s14825_s1 + $0xf08] sm:$0xff]   ;;  %v11484_v58 = vld [vmem:[%s14825_s1 + $0xf80] sm:$0xff]  }
 0x1cf   :  { %10452 = vmatprep.subr.bf16.mxu1 %v11434_v62  ;;  %v106_v60 = vld [vmem:[%s14824_s0 + $0x270] sm:$0xff] }
 0x1d0   :  { %10431 = vmatpush3.bf16.msra.mxu0 %v11435_v63  ;;  %v9002_v61 = vcombine.low %v58_v59, %v106_v60  ;;  %v9003_v62 = vcombine.high %v58_v59, %v106_v60  ;;  %v59_v63 = vld [vmem:[%s14824_s0 + $0xf8] sm:$0xff]  ;;  %v11506_v24 = vld [vmem:[%s14825_s1 + $0x10d0] sm:$0xff]   ;;  %v11531_v59 = vld [vmem:[%s14825_s1 + $0x1120] sm:$0xff]  }
 0x1d1   :  { %10432 = vmatprep.subr.bf16.mxu0 %v11437_v1  ;;  %v11532_v60 = vld [vmem:[%s14825_s1 + $0x11a0] sm:$0xff]  }
 0x1d2   :  { %10453 = vmatpush3.bf16.msra.mxu1 %v11436_v0  ;;  %v107_v0 = vld [vmem:[%s14824_s0 + $0x278] sm:$0xff] }
 0x1d3   :  { %10454 = vmatprep.subr.bf16.mxu1 %v11438_v2  ;;  %v9004_v1 = vcombine.low %v59_v63, %v107_v0  ;;  %v9005_v2 = vcombine.high %v59_v63, %v107_v0  ;;  %v11535_v63 = vld [vmem:[%s14825_s1 + $0x1118] sm:$0xff]  }
 0x1d4   :  { %10433 = vmatpush3.bf16.msra.mxu0 %v11439_v3  ;;  %v11485_v3 = vld [vmem:[%s14825_s1 + $0x1078] sm:$0xff]  }
 0x1d5   :  { %10434 = vmatprep.subr.bf16.mxu0 %v11441_v5  ;;  %v11487_v5 = vld [vmem:[%s14825_s1 + $0x1038] sm:$0xff]  }
 0x1d6   :  { %10455 = vmatpush3.bf16.msra.mxu1 %v11440_v4  ;;  %v11486_v4 = vld [vmem:[%s14825_s1 + $0x10f8] sm:$0xff]  }
 0x1d7   :  { %10456 = vmatprep.subr.bf16.mxu1 %v11442_v6  ;;  %v11488_v6 = vld [vmem:[%s14825_s1 + $0x10b8] sm:$0xff]  }
 0x1d8   :  { %10435 = vmatpush3.bf16.msra.mxu0 %v11443_v7  ;;  %v11489_v7 = vld [vmem:[%s14825_s1 + $0x1070] sm:$0xff]   ;;  %v11536_v0 = vld [vmem:[%s14825_s1 + $0x1198] sm:$0xff]  }
 0x1d9   :  { %10436 = vmatprep.subr.bf16.mxu0 %v11445_v9  ;;  %v11491_v9 = vld [vmem:[%s14825_s1 + $0x1030] sm:$0xff]  }
 0x1da   :  { %10457 = vmatpush3.bf16.msra.mxu1 %v11444_v8  ;;  %v11490_v8 = vld [vmem:[%s14825_s1 + $0x10f0] sm:$0xff]  }
 0x1db   :  { %10458 = vmatprep.subr.bf16.mxu1 %v11446_v10  ;;  %v11492_v10 = vld [vmem:[%s14825_s1 + $0x10b0] sm:$0xff]  }
 0x1dc   :  { %10437 = vmatpush3.bf16.msra.mxu0 %v11447_v11  ;;  %v11493_v11 = vld [vmem:[%s14825_s1 + $0x1068] sm:$0xff]  }
 0x1dd   :  { %10438 = vmatprep.subr.bf16.mxu0 %v11449_v13  ;;  %v11495_v13 = vld [vmem:[%s14825_s1 + $0x1028] sm:$0xff]  }
 0x1de   :  { %10459 = vmatpush3.bf16.msra.mxu1 %v11448_v12  ;;  %v11494_v12 = vld [vmem:[%s14825_s1 + $0x10e8] sm:$0xff]  }
 0x1df   :  { %10460 = vmatprep.subr.bf16.mxu1 %v11450_v14  ;;  %v11496_v14 = vld [vmem:[%s14825_s1 + $0x10a8] sm:$0xff]  }
 0x1e0   :  { %10439 = vmatpush3.bf16.msra.mxu0 %v11451_v15  ;;  %v11497_v15 = vld [vmem:[%s14825_s1 + $0x1060] sm:$0xff]  }
 0x1e1   :  { %10468 = vmatprep.subr.bf16.mxu0 %v11453_v25  ;;  %v11507_v25 = vld [vmem:[%s14825_s1 + $0x1010] sm:$0xff]  }
 0x1e2   :  { %10461 = vmatpush3.bf16.msra.mxu1 %v11452_v16  ;;  %v11498_v16 = vld [vmem:[%s14825_s1 + $0x10e0] sm:$0xff]  }
 0x1e3   :  { %7936 = vmatmul.mubr.bf16.vlgmr.msra.gmra.mxu0 %v8998_v20  ;;  %10490 = vmatprep.subr.bf16.mxu1 %v11454_v26  ;;  %v11502_v20 = vld [vmem:[%s14825_s1 + $0x10d8] sm:$0xff]   ;;  %v11508_v26 = vld [vmem:[%s14825_s1 + $0x1090] sm:$0xff]  }
 0x1e4   :  { %10469 = vmatpush3.bf16.msra.mxu0 %v11455_v27  ;;  %8017 = vmatprep.mubr.bf16.mxu0 %v9003_v62  ;;  %v11509_v27 = vld [vmem:[%s14825_s1 + $0x1048] sm:$0xff]   ;;  %v11534_v62 = vld [vmem:[%s14825_s1 + $0x11d8] sm:$0xff]  }
 0x1e5   :  { %7977 = vmatmul.mubr.bf16.vlgmr.msra.gmra.mxu1 %v9000_v23  ;;  %10470 = vmatprep.subr.bf16.mxu0 %v11457_v29  ;;  %v11505_v23 = vld [vmem:[%s14825_s1 + $0x1050] sm:$0xff]   ;;  %v11511_v29 = vld [vmem:[%s14825_s1 + $0x1008] sm:$0xff]  }
 0x1e6   :  { %10491 = vmatpush3.bf16.msra.mxu1 %v11456_v28  ;;  %8058 = vmatprep.mubr.bf16.mxu1 %v9005_v2  ;;  %v11510_v28 = vld [vmem:[%s14825_s1 + $0x10c8] sm:$0xff]   ;;  %v11538_v2 = vld [vmem:[%s14825_s1 + $0x11d0] sm:$0xff]  }
 0x1e7   :  { %10492 = vmatprep.subr.bf16.mxu1 %v11458_v30  ;;  %v11512_v30 = vld [vmem:[%s14825_s1 + $0x1088] sm:$0xff]  }
 0x1e8   :  { %10471 = vmatpush3.bf16.msra.mxu0 %v11459_v31  ;;  %v11513_v31 = vld [vmem:[%s14825_s1 + $0x1040] sm:$0xff]  }
 0x1e9   :  { %10472 = vmatprep.subr.bf16.mxu0 %v11461_v33  ;;  %v11515_v33 = vld [vmem:[%s14825_s1 + $0x1000] sm:$0xff]  }
 0x1ea   :  { %10493 = vmatpush3.bf16.msra.mxu1 %v11460_v32  ;;  %v11514_v32 = vld [vmem:[%s14825_s1 + $0x10c0] sm:$0xff]  }
 0x1eb   :  { %10494 = vmatprep.subr.bf16.mxu1 %v11462_v34  ;;  %v11516_v34 = vld [vmem:[%s14825_s1 + $0x1080] sm:$0xff]  }
 0x1ec   :  { %10473 = vmatpush3.bf16.msra.mxu0 %v11463_v35  ;;  %v60_v35 = vld [vmem:[%s14824_s0 + $0x100] sm:$0xff] }
 0x1ed   :  { %10474 = vmatprep.subr.bf16.mxu0 %v11465_v37  ;;  %v61_v37 = vld [vmem:[%s14824_s0 + $0x108] sm:$0xff] }
 0x1ee   :  { %10495 = vmatpush3.bf16.msra.mxu1 %v11464_v36  ;;  %v108_v36 = vld [vmem:[%s14824_s0 + $0x280] sm:$0xff] }
 0x1ef   :  { %10496 = vmatprep.subr.bf16.mxu1 %v11466_v38  ;;  %v109_v38 = vld [vmem:[%s14824_s0 + $0x288] sm:$0xff] }
 0x1f0   :  { %10475 = vmatpush3.bf16.msra.mxu0 %v11467_v39  ;;  %v9006_v39 = vcombine.low %v60_v35, %v108_v36 }
 0x1f1   :  { %10476 = vmatprep.subr.bf16.mxu0 %v11469_v41  ;;  %v9008_v41 = vcombine.low %v61_v37, %v109_v38 }
 0x1f2   :  { %10497 = vmatpush3.bf16.msra.mxu1 %v11468_v40  ;;  %v9007_v40 = vcombine.high %v60_v35, %v108_v36  ;;  %v11563_v35 = vld [vmem:[%s14825_s1 + $0x1220] sm:$0xff]  }
 0x1f3   :  { %10498 = vmatprep.subr.bf16.mxu1 %v11470_v42  ;;  %v9009_v42 = vcombine.high %v61_v37, %v109_v38  ;;  %v11564_v36 = vld [vmem:[%s14825_s1 + $0x12a0] sm:$0xff]   ;;  %v11565_v37 = vld [vmem:[%s14825_s1 + $0x1258] sm:$0xff]  }
 0x1f4   :  { %10477 = vmatpush3.bf16.msra.mxu0 %v11471_v43  ;;  %v11517_v43 = vld [vmem:[%s14825_s1 + $0x1178] sm:$0xff]  }
 0x1f5   :  { %10478 = vmatprep.subr.bf16.mxu0 %v11473_v45  ;;  %v11519_v45 = vld [vmem:[%s14825_s1 + $0x1138] sm:$0xff]  }
 0x1f6   :  { %10499 = vmatpush3.bf16.msra.mxu1 %v11472_v44  ;;  %v11518_v44 = vld [vmem:[%s14825_s1 + $0x11f8] sm:$0xff]  }
 0x1f7   :  { %10500 = vmatprep.subr.bf16.mxu1 %v11474_v46  ;;  %v11520_v46 = vld [vmem:[%s14825_s1 + $0x11b8] sm:$0xff]  }
 0x1f8   :  { %10479 = vmatpush3.bf16.msra.mxu0 %v11475_v47  ;;  %v11521_v47 = vld [vmem:[%s14825_s1 + $0x1170] sm:$0xff]   ;;  %v11566_v38 = vld [vmem:[%s14825_s1 + $0x12d8] sm:$0xff]  }
 0x1f9   :  { %10480 = vmatprep.subr.bf16.mxu0 %v11477_v49  ;;  %v11523_v49 = vld [vmem:[%s14825_s1 + $0x1130] sm:$0xff]  }
 0x1fa   :  { %10501 = vmatpush3.bf16.msra.mxu1 %v11476_v48  ;;  %v11522_v48 = vld [vmem:[%s14825_s1 + $0x11f0] sm:$0xff]  }
 0x1fb   :  { %10502 = vmatprep.subr.bf16.mxu1 %v11478_v51  ;;  %v11524_v51 = vld [vmem:[%s14825_s1 + $0x11b0] sm:$0xff]  }
 0x1fc   :  { %10481 = vmatpush3.bf16.msra.mxu0 %v11479_v52  ;;  %v11525_v52 = vld [vmem:[%s14825_s1 + $0x1168] sm:$0xff]  }
 0x1fd   :  { %10482 = vmatprep.subr.bf16.mxu0 %v11481_v54  ;;  %v11527_v54 = vld [vmem:[%s14825_s1 + $0x1128] sm:$0xff]  }
 0x1fe   :  { %10503 = vmatpush3.bf16.msra.mxu1 %v11480_v53  ;;  %v11526_v53 = vld [vmem:[%s14825_s1 + $0x11e8] sm:$0xff]  }
 0x1ff   :  { %10504 = vmatprep.subr.bf16.mxu1 %v11482_v56  ;;  %v11528_v56 = vld [vmem:[%s14825_s1 + $0x11a8] sm:$0xff]  }
 0x200   :  { %10483 = vmatpush3.bf16.msra.mxu0 %v11483_v57  ;;  %v11529_v57 = vld [vmem:[%s14825_s1 + $0x1160] sm:$0xff]  }
 0x201   :  { %10512 = vmatprep.subr.bf16.mxu0 %v11485_v3  ;;  %v11539_v3 = vld [vmem:[%s14825_s1 + $0x1110] sm:$0xff]  }
 0x202   :  { %10505 = vmatpush3.bf16.msra.mxu1 %v11484_v58  ;;  %v11530_v58 = vld [vmem:[%s14825_s1 + $0x11e0] sm:$0xff]  }
 0x203   :  { %8018 = vmatmul.mubr.bf16.vlgmr.msra.gmra.mxu0 %v9002_v61  ;;  %10534 = vmatprep.subr.bf16.mxu1 %v11486_v4  ;;  %v11533_v61 = vld [vmem:[%s14825_s1 + $0x1158] sm:$0xff]   ;;  %v11540_v4 = vld [vmem:[%s14825_s1 + $0x1190] sm:$0xff]  }
 0x204   :  { %10513 = vmatpush3.bf16.msra.mxu0 %v11487_v5  ;;  %8099 = vmatprep.mubr.bf16.mxu0 %v9007_v40  ;;  %v11541_v5 = vld [vmem:[%s14825_s1 + $0x1148] sm:$0xff]   ;;  %v11568_v40 = vld [vmem:[%s14825_s1 + $0x1298] sm:$0xff]  }
 0x205   :  { %8059 = vmatmul.mubr.bf16.vlgmr.msra.gmra.mxu1 %v9004_v1  ;;  %10514 = vmatprep.subr.bf16.mxu0 %v11489_v7  ;;  %v11537_v1 = vld [vmem:[%s14825_s1 + $0x1150] sm:$0xff]   ;;  %v11543_v7 = vld [vmem:[%s14825_s1 + $0x1108] sm:$0xff]  }
 0x206   :  { %10535 = vmatpush3.bf16.msra.mxu1 %v11488_v6  ;;  %8140 = vmatprep.mubr.bf16.mxu1 %v9009_v42  ;;  %v11542_v6 = vld [vmem:[%s14825_s1 + $0x11c8] sm:$0xff]   ;;  %v11570_v42 = vld [vmem:[%s14825_s1 + $0x12d0] sm:$0xff]  }
 0x207   :  { %10536 = vmatprep.subr.bf16.mxu1 %v11490_v8  ;;  %v11544_v8 = vld [vmem:[%s14825_s1 + $0x1188] sm:$0xff]  }
 0x208   :  { %10515 = vmatpush3.bf16.msra.mxu0 %v11491_v9  ;;  %v11545_v9 = vld [vmem:[%s14825_s1 + $0x1140] sm:$0xff]  }
 0x209   :  { %10516 = vmatprep.subr.bf16.mxu0 %v11493_v11  ;;  %v11547_v11 = vld [vmem:[%s14825_s1 + $0x1100] sm:$0xff]  }
 0x20a   :  { %10537 = vmatpush3.bf16.msra.mxu1 %v11492_v10  ;;  %v11546_v10 = vld [vmem:[%s14825_s1 + $0x11c0] sm:$0xff]  }
 0x20b   :  { %10538 = vmatprep.subr.bf16.mxu1 %v11494_v12  ;;  %v11548_v12 = vld [vmem:[%s14825_s1 + $0x1180] sm:$0xff]  }
 0x20c   :  { %10517 = vmatpush3.bf16.msra.mxu0 %v11495_v13  ;;  %v62_v13 = vld [vmem:[%s14824_s0 + $0x110] sm:$0xff] }
 0x20d   :  { %10518 = vmatprep.subr.bf16.mxu0 %v11497_v15  ;;  %v63_v15 = vld [vmem:[%s14824_s0 + $0x118] sm:$0xff] }
 0x20e   :  { %10539 = vmatpush3.bf16.msra.mxu1 %v11496_v14  ;;  %v110_v14 = vld [vmem:[%s14824_s0 + $0x290] sm:$0xff] }
 0x20f   :  { %10540 = vmatprep.subr.bf16.mxu1 %v11498_v16  ;;  %v9010_v16 = vcombine.low %v62_v13, %v110_v14 }
 0x210   :  { %10519 = vmatpush3.bf16.msra.mxu0 %v11499_v17  ;;  %v9011_v17 = vcombine.high %v62_v13, %v110_v14  ;;  %v11595_v13 = vld [vmem:[%s14825_s1 + $0x1320] sm:$0xff]  }
 0x211   :  { %10520 = vmatprep.subr.bf16.mxu0 %v11501_v19  ;;  %v11596_v14 = vld [vmem:[%s14825_s1 + $0x13a0] sm:$0xff]  }
 0x212   :  { %10541 = vmatpush3.bf16.msra.mxu1 %v11500_v18  ;;  %v111_v18 = vld [vmem:[%s14824_s0 + $0x298] sm:$0xff] }
 0x213   :  { %10542 = vmatprep.subr.bf16.mxu1 %v11502_v20  ;;  %v9012_v19 = vcombine.low %v63_v15, %v111_v18  ;;  %v9013_v20 = vcombine.high %v63_v15, %v111_v18  ;;  %v11597_v15 = vld [vmem:[%s14825_s1 + $0x1358] sm:$0xff]  }
 0x214   :  { %10521 = vmatpush3.bf16.msra.mxu0 %v11503_v21  ;;  %v11549_v21 = vld [vmem:[%s14825_s1 + $0x1278] sm:$0xff]  }
 0x215   :  { %10522 = vmatprep.subr.bf16.mxu0 %v11505_v23  ;;  %v11551_v23 = vld [vmem:[%s14825_s1 + $0x1238] sm:$0xff]  }
 0x216   :  { %10543 = vmatpush3.bf16.msra.mxu1 %v11504_v22  ;;  %v11550_v22 = vld [vmem:[%s14825_s1 + $0x12f8] sm:$0xff]  }
 0x217   :  { %10544 = vmatprep.subr.bf16.mxu1 %v11506_v24  ;;  %v11552_v24 = vld [vmem:[%s14825_s1 + $0x12b8] sm:$0xff]  }
 0x218   :  { %10523 = vmatpush3.bf16.msra.mxu0 %v11507_v25  ;;  %v11553_v25 = vld [vmem:[%s14825_s1 + $0x1270] sm:$0xff]   ;;  %v11600_v18 = vld [vmem:[%s14825_s1 + $0x1398] sm:$0xff]  }
 0x219   :  { %10524 = vmatprep.subr.bf16.mxu0 %v11509_v27  ;;  %v11555_v27 = vld [vmem:[%s14825_s1 + $0x1230] sm:$0xff]  }
 0x21a   :  { %10545 = vmatpush3.bf16.msra.mxu1 %v11508_v26  ;;  %v11554_v26 = vld [vmem:[%s14825_s1 + $0x12f0] sm:$0xff]  }
 0x21b   :  { %10546 = vmatprep.subr.bf16.mxu1 %v11510_v28  ;;  %v11556_v28 = vld [vmem:[%s14825_s1 + $0x12b0] sm:$0xff]  }
 0x21c   :  { %10525 = vmatpush3.bf16.msra.mxu0 %v11511_v29  ;;  %v11557_v29 = vld [vmem:[%s14825_s1 + $0x1268] sm:$0xff]  }
 0x21d   :  { %10526 = vmatprep.subr.bf16.mxu0 %v11513_v31  ;;  %v11559_v31 = vld [vmem:[%s14825_s1 + $0x1228] sm:$0xff]  }
 0x21e   :  { %10547 = vmatpush3.bf16.msra.mxu1 %v11512_v30  ;;  %v11558_v30 = vld [vmem:[%s14825_s1 + $0x12e8] sm:$0xff]  }
 0x21f   :  { %10548 = vmatprep.subr.bf16.mxu1 %v11514_v32  ;;  %v11560_v32 = vld [vmem:[%s14825_s1 + $0x12a8] sm:$0xff]  }
 0x220   :  { %10527 = vmatpush3.bf16.msra.mxu0 %v11515_v33  ;;  %v11561_v33 = vld [vmem:[%s14825_s1 + $0x1260] sm:$0xff]  }
 0x221   :  { %10556 = vmatprep.subr.bf16.mxu0 %v11517_v43  ;;  %v11571_v43 = vld [vmem:[%s14825_s1 + $0x1210] sm:$0xff]  }
 0x222   :  { %10549 = vmatpush3.bf16.msra.mxu1 %v11516_v34  ;;  %v11562_v34 = vld [vmem:[%s14825_s1 + $0x12e0] sm:$0xff]  }
 0x223   :  { %8100 = vmatmul.mubr.bf16.vlgmr.msra.gmra.mxu0 %v9006_v39  ;;  %10578 = vmatprep.subr.bf16.mxu1 %v11518_v44  ;;  %v11567_v39 = vld [vmem:[%s14825_s1 + $0x1218] sm:$0xff]   ;;  %v11572_v44 = vld [vmem:[%s14825_s1 + $0x1290] sm:$0xff]  }
 0x224   :  { %10557 = vmatpush3.bf16.msra.mxu0 %v11519_v45  ;;  %8181 = vmatprep.mubr.bf16.mxu0 %v9011_v17  ;;  %v11573_v45 = vld [vmem:[%s14825_s1 + $0x1248] sm:$0xff]   ;;  %v11599_v17 = vld [vmem:[%s14825_s1 + $0x1318] sm:$0xff]  }
 0x225   :  { %8141 = vmatmul.mubr.bf16.vlgmr.msra.gmra.mxu1 %v9008_v41  ;;  %10558 = vmatprep.subr.bf16.mxu0 %v11521_v47  ;;  %v11569_v41 = vld [vmem:[%s14825_s1 + $0x1250] sm:$0xff]   ;;  %v11575_v47 = vld [vmem:[%s14825_s1 + $0x1208] sm:$0xff]  }
 0x226   :  { %10579 = vmatpush3.bf16.msra.mxu1 %v11520_v46  ;;  %8222 = vmatprep.mubr.bf16.mxu1 %v9013_v20  ;;  %v11574_v46 = vld [vmem:[%s14825_s1 + $0x12c8] sm:$0xff]   ;;  %v11602_v20 = vld [vmem:[%s14825_s1 + $0x13d0] sm:$0xff]  }
 0x227   :  { %10580 = vmatprep.subr.bf16.mxu1 %v11522_v48  ;;  %v11576_v48 = vld [vmem:[%s14825_s1 + $0x1288] sm:$0xff]  }
 0x228   :  { %10559 = vmatpush3.bf16.msra.mxu0 %v11523_v49  ;;  %v11577_v49 = vld [vmem:[%s14825_s1 + $0x1240] sm:$0xff]  }
 0x229   :  { %10560 = vmatprep.subr.bf16.mxu0 %v11525_v52  ;;  %v11579_v52 = vld [vmem:[%s14825_s1 + $0x1200] sm:$0xff]  }
 0x22a   :  { %10581 = vmatpush3.bf16.msra.mxu1 %v11524_v51  ;;  %v11578_v51 = vld [vmem:[%s14825_s1 + $0x12c0] sm:$0xff]  }
 0x22b   :  { %10582 = vmatprep.subr.bf16.mxu1 %v11526_v53  ;;  %v11580_v53 = vld [vmem:[%s14825_s1 + $0x1280] sm:$0xff]  }
 0x22c   :  { %10561 = vmatpush3.bf16.msra.mxu0 %v11527_v54  ;;  %v64_v54 = vld [vmem:[%s14824_s0 + $0x120] sm:$0xff] }
 0x22d   :  { %10562 = vmatprep.subr.bf16.mxu0 %v11529_v57 }
 0x22e   :  { %10583 = vmatpush3.bf16.msra.mxu1 %v11528_v56  ;;  %v112_v56 = vld [vmem:[%s14824_s0 + $0x2a0] sm:$0xff] }
 0x22f   :  { %10584 = vmatprep.subr.bf16.mxu1 %v11530_v58  ;;  %v9014_v57 = vcombine.low %v64_v54, %v112_v56  ;;  %v9015_v58 = vcombine.high %v64_v54, %v112_v56  ;;  %v11627_v54 = vld [vmem:[%s14825_s1 + $0x1420] sm:$0xff]  }
 0x230   :  { %10563 = vmatpush3.bf16.msra.mxu0 %v11531_v59  ;;  %v65_v59 = vld [vmem:[%s14824_s0 + $0x128] sm:$0xff]  ;;  %v11628_v56 = vld [vmem:[%s14825_s1 + $0x14a0] sm:$0xff]  }
 0x231   :  { %10564 = vmatprep.subr.bf16.mxu0 %v11533_v61 }
 0x232   :  { %10585 = vmatpush3.bf16.msra.mxu1 %v11532_v60  ;;  %v113_v60 = vld [vmem:[%s14824_s0 + $0x2a8] sm:$0xff] }
 0x233   :  { %10586 = vmatprep.subr.bf16.mxu1 %v11534_v62  ;;  %v9016_v61 = vcombine.low %v65_v59, %v113_v60  ;;  %v9017_v62 = vcombine.high %v65_v59, %v113_v60  ;;  %v11631_v59 = vld [vmem:[%s14825_s1 + $0x1418] sm:$0xff]  }
 0x234   :  { %10565 = vmatpush3.bf16.msra.mxu0 %v11535_v63  ;;  %v11581_v63 = vld [vmem:[%s14825_s1 + $0x1378] sm:$0xff]  }
 0x235   :  { %10566 = vmatprep.subr.bf16.mxu0 %v11537_v1  ;;  %v11583_v1 = vld [vmem:[%s14825_s1 + $0x1338] sm:$0xff]  }
 0x236   :  { %10587 = vmatpush3.bf16.msra.mxu1 %v11536_v0  ;;  %v11582_v0 = vld [vmem:[%s14825_s1 + $0x13f8] sm:$0xff]  }
 0x237   :  { %10588 = vmatprep.subr.bf16.mxu1 %v11538_v2  ;;  %v11584_v2 = vld [vmem:[%s14825_s1 + $0x13b8] sm:$0xff]  }
 0x238   :  { %10567 = vmatpush3.bf16.msra.mxu0 %v11539_v3  ;;  %v11585_v3 = vld [vmem:[%s14825_s1 + $0x1370] sm:$0xff]   ;;  %v11632_v60 = vld [vmem:[%s14825_s1 + $0x1498] sm:$0xff]  }
 0x239   :  { %10568 = vmatprep.subr.bf16.mxu0 %v11541_v5  ;;  %v11587_v5 = vld [vmem:[%s14825_s1 + $0x1330] sm:$0xff]  }
 0x23a   :  { %10589 = vmatpush3.bf16.msra.mxu1 %v11540_v4  ;;  %v11586_v4 = vld [vmem:[%s14825_s1 + $0x13f0] sm:$0xff]  }
 0x23b   :  { %10590 = vmatprep.subr.bf16.mxu1 %v11542_v6  ;;  %v11588_v6 = vld [vmem:[%s14825_s1 + $0x13b0] sm:$0xff]  }
 0x23c   :  { %10569 = vmatpush3.bf16.msra.mxu0 %v11543_v7  ;;  %v11589_v7 = vld [vmem:[%s14825_s1 + $0x1368] sm:$0xff]  }
 0x23d   :  { %10570 = vmatprep.subr.bf16.mxu0 %v11545_v9  ;;  %v11591_v9 = vld [vmem:[%s14825_s1 + $0x1328] sm:$0xff]  }
 0x23e   :  { %10591 = vmatpush3.bf16.msra.mxu1 %v11544_v8  ;;  %v11590_v8 = vld [vmem:[%s14825_s1 + $0x13e8] sm:$0xff]  }
 0x23f   :  { %10592 = vmatprep.subr.bf16.mxu1 %v11546_v10  ;;  %v11592_v10 = vld [vmem:[%s14825_s1 + $0x13a8] sm:$0xff]  }
 0x240   :  { %10571 = vmatpush3.bf16.msra.mxu0 %v11547_v11  ;;  %v11593_v11 = vld [vmem:[%s14825_s1 + $0x1360] sm:$0xff]  }
 0x241   :  { %10600 = vmatprep.subr.bf16.mxu0 %v11549_v21  ;;  %v11603_v21 = vld [vmem:[%s14825_s1 + $0x1310] sm:$0xff]  }
 0x242   :  { %10593 = vmatpush3.bf16.msra.mxu1 %v11548_v12  ;;  %v11594_v12 = vld [vmem:[%s14825_s1 + $0x13e0] sm:$0xff]  }
 0x243   :  { %8182 = vmatmul.mubr.bf16.vlgmr.msra.gmra.mxu0 %v9010_v16  ;;  %10622 = vmatprep.subr.bf16.mxu1 %v11550_v22  ;;  %v11598_v16 = vld [vmem:[%s14825_s1 + $0x13d8] sm:$0xff]   ;;  %v11604_v22 = vld [vmem:[%s14825_s1 + $0x1390] sm:$0xff]  }
 0x244   :  { %10601 = vmatpush3.bf16.msra.mxu0 %v11551_v23  ;;  %8263 = vmatprep.mubr.bf16.mxu0 %v9015_v58  ;;  %v11605_v23 = vld [vmem:[%s14825_s1 + $0x1348] sm:$0xff]   ;;  %v11630_v58 = vld [vmem:[%s14825_s1 + $0x14d8] sm:$0xff]  }
 0x245   :  { %8223 = vmatmul.mubr.bf16.vlgmr.msra.gmra.mxu1 %v9012_v19  ;;  %10602 = vmatprep.subr.bf16.mxu0 %v11553_v25  ;;  %v11601_v19 = vld [vmem:[%s14825_s1 + $0x1350] sm:$0xff]   ;;  %v11607_v25 = vld [vmem:[%s14825_s1 + $0x1308] sm:$0xff]  }
 0x246   :  { %10623 = vmatpush3.bf16.msra.mxu1 %v11552_v24  ;;  %8304 = vmatprep.mubr.bf16.mxu1 %v9017_v62  ;;  %v11606_v24 = vld [vmem:[%s14825_s1 + $0x13c8] sm:$0xff]   ;;  %v11634_v62 = vld [vmem:[%s14825_s1 + $0x14d0] sm:$0xff]  }
 0x247   :  { %10624 = vmatprep.subr.bf16.mxu1 %v11554_v26  ;;  %v11608_v26 = vld [vmem:[%s14825_s1 + $0x1388] sm:$0xff]  }
 0x248   :  { %10603 = vmatpush3.bf16.msra.mxu0 %v11555_v27  ;;  %v11609_v27 = vld [vmem:[%s14825_s1 + $0x1340] sm:$0xff]  }
 0x249   :  { %10604 = vmatprep.subr.bf16.mxu0 %v11557_v29  ;;  %v11611_v29 = vld [vmem:[%s14825_s1 + $0x1300] sm:$0xff]  }
 0x24a   :  { %10625 = vmatpush3.bf16.msra.mxu1 %v11556_v28  ;;  %v11610_v28 = vld [vmem:[%s14825_s1 + $0x13c0] sm:$0xff]  }
 0x24b   :  { %10626 = vmatprep.subr.bf16.mxu1 %v11558_v30  ;;  %v11612_v30 = vld [vmem:[%s14825_s1 + $0x1380] sm:$0xff]  }
 0x24c   :  { %10605 = vmatpush3.bf16.msra.mxu0 %v11559_v31  ;;  %v66_v31 = vld [vmem:[%s14824_s0 + $0x130] sm:$0xff] }
 0x24d   :  { %10606 = vmatprep.subr.bf16.mxu0 %v11561_v33  ;;  %v67_v33 = vld [vmem:[%s14824_s0 + $0x138] sm:$0xff] }
 0x24e   :  { %10627 = vmatpush3.bf16.msra.mxu1 %v11560_v32  ;;  %v114_v32 = vld [vmem:[%s14824_s0 + $0x2b0] sm:$0xff] }
 0x24f   :  { %10628 = vmatprep.subr.bf16.mxu1 %v11562_v34  ;;  %v115_v34 = vld [vmem:[%s14824_s0 + $0x2b8] sm:$0xff] }
 0x250   :  { %10607 = vmatpush3.bf16.msra.mxu0 %v11563_v35  ;;  %v9018_v35 = vcombine.low %v66_v31, %v114_v32 }
 0x251   :  { %10608 = vmatprep.subr.bf16.mxu0 %v11565_v37  ;;  %v9020_v37 = vcombine.low %v67_v33, %v115_v34 }
 0x252   :  { %10629 = vmatpush3.bf16.msra.mxu1 %v11564_v36  ;;  %v9019_v36 = vcombine.high %v66_v31, %v114_v32  ;;  %v11659_v31 = vld [vmem:[%s14825_s1 + $0x1520] sm:$0xff]  }
 0x253   :  { %10630 = vmatprep.subr.bf16.mxu1 %v11566_v38  ;;  %v9021_v38 = vcombine.high %v67_v33, %v115_v34  ;;  %v11660_v32 = vld [vmem:[%s14825_s1 + $0x15a0] sm:$0xff]   ;;  %v11661_v33 = vld [vmem:[%s14825_s1 + $0x1558] sm:$0xff]  }
 0x254   :  { %10609 = vmatpush3.bf16.msra.mxu0 %v11567_v39  ;;  %v11613_v39 = vld [vmem:[%s14825_s1 + $0x1478] sm:$0xff]  }
 0x255   :  { %10610 = vmatprep.subr.bf16.mxu0 %v11569_v41  ;;  %v11615_v41 = vld [vmem:[%s14825_s1 + $0x1438] sm:$0xff]  }
 0x256   :  { %10631 = vmatpush3.bf16.msra.mxu1 %v11568_v40  ;;  %v11614_v40 = vld [vmem:[%s14825_s1 + $0x14f8] sm:$0xff]  }
 0x257   :  { %10632 = vmatprep.subr.bf16.mxu1 %v11570_v42  ;;  %v11616_v42 = vld [vmem:[%s14825_s1 + $0x14b8] sm:$0xff]  }
 0x258   :  { %10611 = vmatpush3.bf16.msra.mxu0 %v11571_v43  ;;  %v11617_v43 = vld [vmem:[%s14825_s1 + $0x1470] sm:$0xff]   ;;  %v11662_v34 = vld [vmem:[%s14825_s1 + $0x15d8] sm:$0xff]  }
 0x259   :  { %10612 = vmatprep.subr.bf16.mxu0 %v11573_v45  ;;  %v11619_v45 = vld [vmem:[%s14825_s1 + $0x1430] sm:$0xff]  }
 0x25a   :  { %10633 = vmatpush3.bf16.msra.mxu1 %v11572_v44  ;;  %v11618_v44 = vld [vmem:[%s14825_s1 + $0x14f0] sm:$0xff]  }
 0x25b   :  { %10634 = vmatprep.subr.bf16.mxu1 %v11574_v46  ;;  %v11620_v46 = vld [vmem:[%s14825_s1 + $0x14b0] sm:$0xff]  }
 0x25c   :  { %10613 = vmatpush3.bf16.msra.mxu0 %v11575_v47  ;;  %v11621_v47 = vld [vmem:[%s14825_s1 + $0x1468] sm:$0xff]  }
 0x25d   :  { %10614 = vmatprep.subr.bf16.mxu0 %v11577_v49  ;;  %v11623_v49 = vld [vmem:[%s14825_s1 + $0x1428] sm:$0xff]  }
 0x25e   :  { %10635 = vmatpush3.bf16.msra.mxu1 %v11576_v48  ;;  %v11622_v48 = vld [vmem:[%s14825_s1 + $0x14e8] sm:$0xff]  }
 0x25f   :  { %10636 = vmatprep.subr.bf16.mxu1 %v11578_v51  ;;  %v11624_v51 = vld [vmem:[%s14825_s1 + $0x14a8] sm:$0xff]  }
 0x260   :  { %10615 = vmatpush3.bf16.msra.mxu0 %v11579_v52  ;;  %v11625_v52 = vld [vmem:[%s14825_s1 + $0x1460] sm:$0xff]  }
 0x261   :  { %10644 = vmatprep.subr.bf16.mxu0 %v11581_v63  ;;  %v11635_v63 = vld [vmem:[%s14825_s1 + $0x1410] sm:$0xff]  }
 0x262   :  { %10637 = vmatpush3.bf16.msra.mxu1 %v11580_v53  ;;  %v11626_v53 = vld [vmem:[%s14825_s1 + $0x14e0] sm:$0xff]  }
 0x263   :  { %8264 = vmatmul.mubr.bf16.vlgmr.msra.gmra.mxu0 %v9014_v57  ;;  %10666 = vmatprep.subr.bf16.mxu1 %v11582_v0  ;;  %v11629_v57 = vld [vmem:[%s14825_s1 + $0x1458] sm:$0xff]   ;;  %v11636_v0 = vld [vmem:[%s14825_s1 + $0x1490] sm:$0xff]  }
 0x264   :  { %10645 = vmatpush3.bf16.msra.mxu0 %v11583_v1  ;;  %8345 = vmatprep.mubr.bf16.mxu0 %v9019_v36  ;;  %v11637_v1 = vld [vmem:[%s14825_s1 + $0x1448] sm:$0xff]   ;;  %v11664_v36 = vld [vmem:[%s14825_s1 + $0x1598] sm:$0xff]  }
 0x265   :  { %8305 = vmatmul.mubr.bf16.vlgmr.msra.gmra.mxu1 %v9016_v61  ;;  %10646 = vmatprep.subr.bf16.mxu0 %v11585_v3  ;;  %v11633_v61 = vld [vmem:[%s14825_s1 + $0x1450] sm:$0xff]   ;;  %v11639_v3 = vld [vmem:[%s14825_s1 + $0x1408] sm:$0xff]  }
 0x266   :  { %10667 = vmatpush3.bf16.msra.mxu1 %v11584_v2  ;;  %8386 = vmatprep.mubr.bf16.mxu1 %v9021_v38  ;;  %v11638_v2 = vld [vmem:[%s14825_s1 + $0x14c8] sm:$0xff]   ;;  %v11666_v38 = vld [vmem:[%s14825_s1 + $0x15d0] sm:$0xff]  }
 0x267   :  { %10668 = vmatprep.subr.bf16.mxu1 %v11586_v4  ;;  %v11640_v4 = vld [vmem:[%s14825_s1 + $0x1488] sm:$0xff]  }
 0x268   :  { %10647 = vmatpush3.bf16.msra.mxu0 %v11587_v5  ;;  %v11641_v5 = vld [vmem:[%s14825_s1 + $0x1440] sm:$0xff]  }
 0x269   :  { %10648 = vmatprep.subr.bf16.mxu0 %v11589_v7  ;;  %v11643_v7 = vld [vmem:[%s14825_s1 + $0x1400] sm:$0xff]  }
 0x26a   :  { %10669 = vmatpush3.bf16.msra.mxu1 %v11588_v6  ;;  %v11642_v6 = vld [vmem:[%s14825_s1 + $0x14c0] sm:$0xff]  }
 0x26b   :  { %10670 = vmatprep.subr.bf16.mxu1 %v11590_v8  ;;  %v11644_v8 = vld [vmem:[%s14825_s1 + $0x1480] sm:$0xff]  }
 0x26c   :  { %10649 = vmatpush3.bf16.msra.mxu0 %v11591_v9  ;;  %v68_v9 = vld [vmem:[%s14824_s0 + $0x140] sm:$0xff] }
 0x26d   :  { %10650 = vmatprep.subr.bf16.mxu0 %v11593_v11  ;;  %v69_v11 = vld [vmem:[%s14824_s0 + $0x148] sm:$0xff] }
 0x26e   :  { %10671 = vmatpush3.bf16.msra.mxu1 %v11592_v10  ;;  %v116_v10 = vld [vmem:[%s14824_s0 + $0x2c0] sm:$0xff] }
 0x26f   :  { %10672 = vmatprep.subr.bf16.mxu1 %v11594_v12  ;;  %v9022_v12 = vcombine.low %v68_v9, %v116_v10 }
 0x270   :  { %10651 = vmatpush3.bf16.msra.mxu0 %v11595_v13  ;;  %v9023_v13 = vcombine.high %v68_v9, %v116_v10  ;;  %v11691_v9 = vld [vmem:[%s14825_s1 + $0x1620] sm:$0xff]  }
 0x271   :  { %10652 = vmatprep.subr.bf16.mxu0 %v11597_v15  ;;  %v11692_v10 = vld [vmem:[%s14825_s1 + $0x16a0] sm:$0xff]  }
 0x272   :  { %10673 = vmatpush3.bf16.msra.mxu1 %v11596_v14  ;;  %v117_v14 = vld [vmem:[%s14824_s0 + $0x2c8] sm:$0xff] }
 0x273   :  { %10674 = vmatprep.subr.bf16.mxu1 %v11598_v16  ;;  %v9024_v15 = vcombine.low %v69_v11, %v117_v14  ;;  %v9025_v16 = vcombine.high %v69_v11, %v117_v14  ;;  %v11693_v11 = vld [vmem:[%s14825_s1 + $0x1658] sm:$0xff]  }
 0x274   :  { %10653 = vmatpush3.bf16.msra.mxu0 %v11599_v17  ;;  %v11645_v17 = vld [vmem:[%s14825_s1 + $0x1578] sm:$0xff]  }
 0x275   :  { %10654 = vmatprep.subr.bf16.mxu0 %v11601_v19  ;;  %v11647_v19 = vld [vmem:[%s14825_s1 + $0x1538] sm:$0xff]  }
 0x276   :  { %10675 = vmatpush3.bf16.msra.mxu1 %v11600_v18  ;;  %v11646_v18 = vld [vmem:[%s14825_s1 + $0x15f8] sm:$0xff]  }
 0x277   :  { %10676 = vmatprep.subr.bf16.mxu1 %v11602_v20  ;;  %v11648_v20 = vld [vmem:[%s14825_s1 + $0x15b8] sm:$0xff]  }
 0x278   :  { %10655 = vmatpush3.bf16.msra.mxu0 %v11603_v21  ;;  %v11649_v21 = vld [vmem:[%s14825_s1 + $0x1570] sm:$0xff]   ;;  %v11696_v14 = vld [vmem:[%s14825_s1 + $0x1698] sm:$0xff]  }
 0x279   :  { %10656 = vmatprep.subr.bf16.mxu0 %v11605_v23  ;;  %v11651_v23 = vld [vmem:[%s14825_s1 + $0x1530] sm:$0xff]  }
 0x27a   :  { %10677 = vmatpush3.bf16.msra.mxu1 %v11604_v22  ;;  %v11650_v22 = vld [vmem:[%s14825_s1 + $0x15f0] sm:$0xff]  }
 0x27b   :  { %10678 = vmatprep.subr.bf16.mxu1 %v11606_v24  ;;  %v11652_v24 = vld [vmem:[%s14825_s1 + $0x15b0] sm:$0xff]  }
 0x27c   :  { %10657 = vmatpush3.bf16.msra.mxu0 %v11607_v25  ;;  %v11653_v25 = vld [vmem:[%s14825_s1 + $0x1568] sm:$0xff]  }
 0x27d   :  { %10658 = vmatprep.subr.bf16.mxu0 %v11609_v27  ;;  %v11655_v27 = vld [vmem:[%s14825_s1 + $0x1528] sm:$0xff]  }
 0x27e   :  { %10679 = vmatpush3.bf16.msra.mxu1 %v11608_v26  ;;  %v11654_v26 = vld [vmem:[%s14825_s1 + $0x15e8] sm:$0xff]  }
 0x27f   :  { %10680 = vmatprep.subr.bf16.mxu1 %v11610_v28  ;;  %v11656_v28 = vld [vmem:[%s14825_s1 + $0x15a8] sm:$0xff]  }
 0x280   :  { %10659 = vmatpush3.bf16.msra.mxu0 %v11611_v29  ;;  %v11657_v29 = vld [vmem:[%s14825_s1 + $0x1560] sm:$0xff]  }
 0x281   :  { %10688 = vmatprep.subr.bf16.mxu0 %v11613_v39  ;;  %v11667_v39 = vld [vmem:[%s14825_s1 + $0x1510] sm:$0xff]  }
 0x282   :  { %10681 = vmatpush3.bf16.msra.mxu1 %v11612_v30  ;;  %v11658_v30 = vld [vmem:[%s14825_s1 + $0x15e0] sm:$0xff]  }
 0x283   :  { %8346 = vmatmul.mubr.bf16.vlgmr.msra.gmra.mxu0 %v9018_v35  ;;  %10710 = vmatprep.subr.bf16.mxu1 %v11614_v40  ;;  %v11663_v35 = vld [vmem:[%s14825_s1 + $0x1518] sm:$0xff]   ;;  %v11668_v40 = vld [vmem:[%s14825_s1 + $0x1590] sm:$0xff]  }
 0x284   :  { %10689 = vmatpush3.bf16.msra.mxu0 %v11615_v41  ;;  %8427 = vmatprep.mubr.bf16.mxu0 %v9023_v13  ;;  %v11669_v41 = vld [vmem:[%s14825_s1 + $0x1548] sm:$0xff]   ;;  %v11695_v13 = vld [vmem:[%s14825_s1 + $0x1618] sm:$0xff]  }
 0x285   :  { %8387 = vmatmul.mubr.bf16.vlgmr.msra.gmra.mxu1 %v9020_v37  ;;  %10690 = vmatprep.subr.bf16.mxu0 %v11617_v43  ;;  %v11665_v37 = vld [vmem:[%s14825_s1 + $0x1550] sm:$0xff]   ;;  %v11671_v43 = vld [vmem:[%s14825_s1 + $0x1508] sm:$0xff]  }
 0x286   :  { %10711 = vmatpush3.bf16.msra.mxu1 %v11616_v42  ;;  %8468 = vmatprep.mubr.bf16.mxu1 %v9025_v16  ;;  %v11670_v42 = vld [vmem:[%s14825_s1 + $0x15c8] sm:$0xff]   ;;  %v11698_v16 = vld [vmem:[%s14825_s1 + $0x16d0] sm:$0xff]  }
 0x287   :  { %10712 = vmatprep.subr.bf16.mxu1 %v11618_v44  ;;  %v11672_v44 = vld [vmem:[%s14825_s1 + $0x1588] sm:$0xff]  }
 0x288   :  { %10691 = vmatpush3.bf16.msra.mxu0 %v11619_v45  ;;  %v11673_v45 = vld [vmem:[%s14825_s1 + $0x1540] sm:$0xff]  }
 0x289   :  { %10692 = vmatprep.subr.bf16.mxu0 %v11621_v47  ;;  %v11675_v47 = vld [vmem:[%s14825_s1 + $0x1500] sm:$0xff]  }
 0x28a   :  { %10713 = vmatpush3.bf16.msra.mxu1 %v11620_v46  ;;  %v11674_v46 = vld [vmem:[%s14825_s1 + $0x15c0] sm:$0xff]  }
 0x28b   :  { %10714 = vmatprep.subr.bf16.mxu1 %v11622_v48  ;;  %v11676_v48 = vld [vmem:[%s14825_s1 + $0x1580] sm:$0xff]  }
 0x28c   :  { %10693 = vmatpush3.bf16.msra.mxu0 %v11623_v49  ;;  %v70_v49 = vld [vmem:[%s14824_s0 + $0x150] sm:$0xff] }
 0x28d   :  { %10694 = vmatprep.subr.bf16.mxu0 %v11625_v52 }
 0x28e   :  { %10715 = vmatpush3.bf16.msra.mxu1 %v11624_v51  ;;  %v118_v51 = vld [vmem:[%s14824_s0 + $0x2d0] sm:$0xff] }
 0x28f   :  { %10716 = vmatprep.subr.bf16.mxu1 %v11626_v53  ;;  %v9026_v52 = vcombine.low %v70_v49, %v118_v51  ;;  %v9027_v53 = vcombine.high %v70_v49, %v118_v51  ;;  %v11723_v49 = vld [vmem:[%s14825_s1 + $0x1720] sm:$0xff]  }
 0x290   :  { %10695 = vmatpush3.bf16.msra.mxu0 %v11627_v54  ;;  %v71_v54 = vld [vmem:[%s14824_s0 + $0x158] sm:$0xff]  ;;  %v11724_v51 = vld [vmem:[%s14825_s1 + $0x17a0] sm:$0xff]  }
 0x291   :  { %10696 = vmatprep.subr.bf16.mxu0 %v11629_v57 }
 0x292   :  { %10717 = vmatpush3.bf16.msra.mxu1 %v11628_v56  ;;  %v119_v56 = vld [vmem:[%s14824_s0 + $0x2d8] sm:$0xff] }
 0x293   :  { %10718 = vmatprep.subr.bf16.mxu1 %v11630_v58  ;;  %v9028_v57 = vcombine.low %v71_v54, %v119_v56  ;;  %v9029_v58 = vcombine.high %v71_v54, %v119_v56  ;;  %v11726_v54 = vld [vmem:[%s14825_s1 + $0x17d8] sm:$0xff]  }
 0x294   :  { %10697 = vmatpush3.bf16.msra.mxu0 %v11631_v59  ;;  %v11677_v59 = vld [vmem:[%s14825_s1 + $0x1678] sm:$0xff]  }
 0x295   :  { %10698 = vmatprep.subr.bf16.mxu0 %v11633_v61  ;;  %v11679_v61 = vld [vmem:[%s14825_s1 + $0x1638] sm:$0xff]  }
 0x296   :  { %10719 = vmatpush3.bf16.msra.mxu1 %v11632_v60  ;;  %v11678_v60 = vld [vmem:[%s14825_s1 + $0x16f8] sm:$0xff]  }
 0x297   :  { %10720 = vmatprep.subr.bf16.mxu1 %v11634_v62  ;;  %v11680_v62 = vld [vmem:[%s14825_s1 + $0x16b8] sm:$0xff]  }
 0x298   :  { %10699 = vmatpush3.bf16.msra.mxu0 %v11635_v63  ;;  %v11681_v63 = vld [vmem:[%s14825_s1 + $0x1670] sm:$0xff]   ;;  %v11727_v56 = vld [vmem:[%s14825_s1 + $0x1718] sm:$0xff]  }
 0x299   :  { %10700 = vmatprep.subr.bf16.mxu0 %v11637_v1  ;;  %v11683_v1 = vld [vmem:[%s14825_s1 + $0x1630] sm:$0xff]  }
 0x29a   :  { %10721 = vmatpush3.bf16.msra.mxu1 %v11636_v0  ;;  %v11682_v0 = vld [vmem:[%s14825_s1 + $0x16f0] sm:$0xff]  }
 0x29b   :  { %10722 = vmatprep.subr.bf16.mxu1 %v11638_v2  ;;  %v11684_v2 = vld [vmem:[%s14825_s1 + $0x16b0] sm:$0xff]  }
 0x29c   :  { %10701 = vmatpush3.bf16.msra.mxu0 %v11639_v3  ;;  %v11685_v3 = vld [vmem:[%s14825_s1 + $0x1668] sm:$0xff]  }
 0x29d   :  { %10702 = vmatprep.subr.bf16.mxu0 %v11641_v5  ;;  %v11687_v5 = vld [vmem:[%s14825_s1 + $0x1628] sm:$0xff]  }
 0x29e   :  { %10723 = vmatpush3.bf16.msra.mxu1 %v11640_v4  ;;  %v11686_v4 = vld [vmem:[%s14825_s1 + $0x16e8] sm:$0xff]  }
 0x29f   :  { %10724 = vmatprep.subr.bf16.mxu1 %v11642_v6  ;;  %v11688_v6 = vld [vmem:[%s14825_s1 + $0x16a8] sm:$0xff]  }
 0x2a0   :  { %10703 = vmatpush3.bf16.msra.mxu0 %v11643_v7  ;;  %v11689_v7 = vld [vmem:[%s14825_s1 + $0x1660] sm:$0xff]  }
 0x2a1   :  { %10732 = vmatprep.subr.bf16.mxu0 %v11645_v17  ;;  %v11699_v17 = vld [vmem:[%s14825_s1 + $0x1610] sm:$0xff]  }
 0x2a2   :  { %10725 = vmatpush3.bf16.msra.mxu1 %v11644_v8  ;;  %v11690_v8 = vld [vmem:[%s14825_s1 + $0x16e0] sm:$0xff]  }
 0x2a3   :  { %8428 = vmatmul.mubr.bf16.vlgmr.msra.gmra.mxu0 %v9022_v12  ;;  %10754 = vmatprep.subr.bf16.mxu1 %v11646_v18  ;;  %v11694_v12 = vld [vmem:[%s14825_s1 + $0x16d8] sm:$0xff]   ;;  %v11700_v18 = vld [vmem:[%s14825_s1 + $0x1690] sm:$0xff]  }
 0x2a4   :  { %10733 = vmatpush3.bf16.msra.mxu0 %v11647_v19  ;;  %8509 = vmatprep.mubr.bf16.mxu0 %v9027_v53  ;;  %v11701_v19 = vld [vmem:[%s14825_s1 + $0x1648] sm:$0xff]   ;;  %v11725_v53 = vld [vmem:[%s14825_s1 + $0x1758] sm:$0xff]  }
 0x2a5   :  { %8469 = vmatmul.mubr.bf16.vlgmr.msra.gmra.mxu1 %v9024_v15  ;;  %10734 = vmatprep.subr.bf16.mxu0 %v11649_v21  ;;  %v11697_v15 = vld [vmem:[%s14825_s1 + $0x1650] sm:$0xff]   ;;  %v11703_v21 = vld [vmem:[%s14825_s1 + $0x1608] sm:$0xff]  }
 0x2a6   :  { %10755 = vmatpush3.bf16.msra.mxu1 %v11648_v20  ;;  %8550 = vmatprep.mubr.bf16.mxu1 %v9029_v58  ;;  %v11702_v20 = vld [vmem:[%s14825_s1 + $0x16c8] sm:$0xff]   ;;  %v11728_v58 = vld [vmem:[%s14825_s1 + $0x1798] sm:$0xff]  }
 0x2a7   :  { %10756 = vmatprep.subr.bf16.mxu1 %v11650_v22  ;;  %v11704_v22 = vld [vmem:[%s14825_s1 + $0x1688] sm:$0xff]  }
 0x2a8   :  { %10735 = vmatpush3.bf16.msra.mxu0 %v11651_v23  ;;  %v11705_v23 = vld [vmem:[%s14825_s1 + $0x1640] sm:$0xff]  }
 0x2a9   :  { %10736 = vmatprep.subr.bf16.mxu0 %v11653_v25  ;;  %v11707_v25 = vld [vmem:[%s14825_s1 + $0x1600] sm:$0xff]  }
 0x2aa   :  { %10757 = vmatpush3.bf16.msra.mxu1 %v11652_v24  ;;  %v11706_v24 = vld [vmem:[%s14825_s1 + $0x16c0] sm:$0xff]  }
 0x2ab   :  { %10758 = vmatprep.subr.bf16.mxu1 %v11654_v26  ;;  %v11708_v26 = vld [vmem:[%s14825_s1 + $0x1680] sm:$0xff]  }
 0x2ac   :  { %10737 = vmatpush3.bf16.msra.mxu0 %v11655_v27  ;;  %v72_v27 = vld [vmem:[%s14824_s0 + $0x160] sm:$0xff] }
 0x2ad   :  { %10738 = vmatprep.subr.bf16.mxu0 %v11657_v29  ;;  %v73_v29 = vld [vmem:[%s14824_s0 + $0x168] sm:$0xff] }
 0x2ae   :  { %10759 = vmatpush3.bf16.msra.mxu1 %v11656_v28  ;;  %v120_v28 = vld [vmem:[%s14824_s0 + $0x2e0] sm:$0xff] }
 0x2af   :  { %10760 = vmatprep.subr.bf16.mxu1 %v11658_v30  ;;  %v121_v30 = vld [vmem:[%s14824_s0 + $0x2e8] sm:$0xff] }
 0x2b0   :  { %10739 = vmatpush3.bf16.msra.mxu0 %v11659_v31  ;;  %v9030_v31 = vcombine.low %v72_v27, %v120_v28 }
 0x2b1   :  { %10740 = vmatprep.subr.bf16.mxu0 %v11661_v33  ;;  %v9032_v33 = vcombine.low %v73_v29, %v121_v30 }
 0x2b2   :  { %10761 = vmatpush3.bf16.msra.mxu1 %v11660_v32  ;;  %v9031_v32 = vcombine.high %v72_v27, %v120_v28 }
 0x2b3   :  { %10762 = vmatprep.subr.bf16.mxu1 %v11662_v34  ;;  %v9033_v34 = vcombine.high %v73_v29, %v121_v30 }
 0x2b4   :  { %10741 = vmatpush3.bf16.msra.mxu0 %v11663_v35  ;;  %v11709_v35 = vld [vmem:[%s14825_s1 + $0x1778] sm:$0xff]  }
 0x2b5   :  { %10742 = vmatprep.subr.bf16.mxu0 %v11665_v37  ;;  %v11711_v37 = vld [vmem:[%s14825_s1 + $0x1738] sm:$0xff]  }
 0x2b6   :  { %10763 = vmatpush3.bf16.msra.mxu1 %v11664_v36  ;;  %v11710_v36 = vld [vmem:[%s14825_s1 + $0x17f8] sm:$0xff]  }
 0x2b7   :  { %10764 = vmatprep.subr.bf16.mxu1 %v11666_v38  ;;  %v11712_v38 = vld [vmem:[%s14825_s1 + $0x17b8] sm:$0xff]  }
 0x2b8   :  { %10743 = vmatpush3.bf16.msra.mxu0 %v11667_v39  ;;  %v11713_v39 = vld [vmem:[%s14825_s1 + $0x1770] sm:$0xff]  }
 0x2b9   :  { %10744 = vmatprep.subr.bf16.mxu0 %v11669_v41  ;;  %v11715_v41 = vld [vmem:[%s14825_s1 + $0x1730] sm:$0xff]  }
 0x2ba   :  { %10765 = vmatpush3.bf16.msra.mxu1 %v11668_v40  ;;  %v11714_v40 = vld [vmem:[%s14825_s1 + $0x17f0] sm:$0xff]  }
 0x2bb   :  { %10766 = vmatprep.subr.bf16.mxu1 %v11670_v42  ;;  %v11716_v42 = vld [vmem:[%s14825_s1 + $0x17b0] sm:$0xff]  }
 0x2bc   :  { %10745 = vmatpush3.bf16.msra.mxu0 %v11671_v43  ;;  %v11717_v43 = vld [vmem:[%s14825_s1 + $0x1768] sm:$0xff]  }
 0x2bd   :  { %10746 = vmatprep.subr.bf16.mxu0 %v11673_v45  ;;  %v11719_v45 = vld [vmem:[%s14825_s1 + $0x1728] sm:$0xff]  }
 0x2be   :  { %10767 = vmatpush3.bf16.msra.mxu1 %v11672_v44  ;;  %v11718_v44 = vld [vmem:[%s14825_s1 + $0x17e8] sm:$0xff]  }
 0x2bf   :  { %10768 = vmatprep.subr.bf16.mxu1 %v11674_v46  ;;  %v11720_v46 = vld [vmem:[%s14825_s1 + $0x17a8] sm:$0xff]  }
 0x2c0   :  { %10747 = vmatpush3.bf16.msra.mxu0 %v11675_v47  ;;  %v11721_v47 = vld [vmem:[%s14825_s1 + $0x1760] sm:$0xff]  }
 0x2c1   :  { %10776 = vmatprep.subr.bf16.mxu0 %v11677_v59 }
 0x2c2   :  { %10769 = vmatpush3.bf16.msra.mxu1 %v11676_v48  ;;  %v11722_v48 = vld [vmem:[%s14825_s1 + $0x17e0] sm:$0xff]  }
 0x2c3   :  { %8510 = vmatmul.mubr.bf16.vlgmr.msra.gmra.mxu0 %v9026_v52  ;;  %10798 = vmatprep.subr.bf16.mxu1 %v11678_v60  ;;  %v14387_v52 = vpop.f32.mrf.mxu0  ;;  %v11729_v60 = vld [vmem:[%s14825_s1 + $0x1750] sm:$0xff]  }
 0x2c4   :  { %10777 = vmatpush3.bf16.msra.mxu0 %v11679_v61  ;;  %8591 = vmatprep.mubr.bf16.mxu0 %v9031_v32  ;;  %v11730_v61 = vld [vmem:[%s14825_s1 + $0x17d0] sm:$0xff]  }
 0x2c5   :  { %8551 = vmatmul.mubr.bf16.vlgmr.msra.gmra.mxu1 %v9028_v57  ;;  %10778 = vmatprep.subr.bf16.mxu0 %v11681_v63  ;;  %v14398_v57 = vpop.f32.mrf.mxu1  ;;  %v14403_v59 = vpop.f32.mrf.mxu0 }
 0x2c6   :  { %10799 = vmatpush3.bf16.msra.mxu1 %v11680_v62  ;;  %8632 = vmatprep.mubr.bf16.mxu1 %v9033_v34  ;;  %v11731_v62 = vld [vmem:[%s14825_s1 + $0x1710] sm:$0xff]  }
 0x2c7   :  { %10800 = vmatprep.subr.bf16.mxu1 %v11682_v0  ;;  %v14414_v63 = vpop.f32.mrf.mxu1  ;;  %v11732_v0 = vld [vmem:[%s14825_s1 + $0x1790] sm:$0xff]  }
 0x2c8   :  { %10779 = vmatpush3.bf16.msra.mxu0 %v11683_v1  ;;  %v14419_v1 = vpop.f32.mrf.mxu0 }
 0x2c9   :  { %10780 = vmatprep.subr.bf16.mxu0 %v11685_v3  ;;  %v11734_v3 = vld [vmem:[%s14825_s1 + $0x17c8] sm:$0xff]  }
 0x2ca   :  { %10801 = vmatpush3.bf16.msra.mxu1 %v11684_v2  ;;  %v11733_v2 = vld [vmem:[%s14825_s1 + $0x1748] sm:$0xff]  }
 0x2cb   :  { %10802 = vmatprep.subr.bf16.mxu1 %v11686_v4  ;;  %v11735_v4 = vld [vmem:[%s14825_s1 + $0x1708] sm:$0xff]  }
 0x2cc   :  { %10781 = vmatpush3.bf16.msra.mxu0 %v11687_v5  ;;  %v14430_v5 = vpop.f32.mrf.mxu1 }
 0x2cd   :  { %10782 = vmatprep.subr.bf16.mxu0 %v11689_v7  ;;  %v14435_v7 = vpop.f32.mrf.mxu0 }
 0x2ce   :  { %10803 = vmatpush3.bf16.msra.mxu1 %v11688_v6  ;;  %v11736_v6 = vld [vmem:[%s14825_s1 + $0x1788] sm:$0xff]  }
 0x2cf   :  { %10804 = vmatprep.subr.bf16.mxu1 %v11690_v8  ;;  %v11737_v8 = vld [vmem:[%s14825_s1 + $0x1740] sm:$0xff]  }
 0x2d0   :  { %10783 = vmatpush3.bf16.msra.mxu0 %v11691_v9  ;;  %v11738_v9 = vld [vmem:[%s14825_s1 + $0x17c0] sm:$0xff]  }
 0x2d1   :  { %10784 = vmatprep.subr.bf16.mxu0 %v11693_v11  ;;  %v11739_v11 = vld [vmem:[%s14825_s1 + $0x1700] sm:$0xff]  }
 0x2d2   :  { %10805 = vmatpush3.bf16.msra.mxu1 %v11692_v10  ;;  %v14443_v10 = vpop.f32.mrf.mxu0 }
 0x2d3   :  { %10806 = vmatprep.subr.bf16.mxu1 %v11694_v12  ;;  %v14448_v12 = vpop.f32.mrf.mxu1 }
 0x2d4   :  { %10785 = vmatpush3.bf16.msra.mxu0 %v11695_v13  ;;  %v11740_v13 = vld [vmem:[%s14825_s1 + $0x1780] sm:$0xff]  }
 0x2d5   :  { %10786 = vmatprep.subr.bf16.mxu0 %v11697_v15  ;;  %v122_v15 = vld [vmem:[%s14824_s0 + $0x2f0] sm:$0xff] }
 0x2d6   :  { %10807 = vmatpush3.bf16.msra.mxu1 %v11696_v14  ;;  %v74_v14 = vld [vmem:[%s14824_s0 + $0x170] sm:$0xff] }
 0x2d7   :  { %10808 = vmatprep.subr.bf16.mxu1 %v11698_v16  ;;  %v75_v16 = vld [vmem:[%s14824_s0 + $0x178] sm:$0xff] }
 0x2d8   :  { %10787 = vmatpush3.bf16.msra.mxu0 %v11699_v17  ;;  %v14462_v17 = vpop.f32.mrf.mxu1 }
 0x2d9   :  { %10788 = vmatprep.subr.bf16.mxu0 %v11701_v19  ;;  %v9035_v19 = vcombine.high %v74_v14, %v122_v15 }
 0x2da   :  { %10809 = vmatpush3.bf16.msra.mxu1 %v11700_v18  ;;  %v9034_v18 = vcombine.low %v74_v14, %v122_v15 }
 0x2db   :  { %10810 = vmatprep.subr.bf16.mxu1 %v11702_v20  ;;  %v123_v20 = vld [vmem:[%s14824_s0 + $0x2f8] sm:$0xff] }
 0x2dc   :  { %10789 = vmatpush3.bf16.msra.mxu0 %v11703_v21 }
 0x2dd   :  { %10790 = vmatprep.subr.bf16.mxu0 %v11705_v23 }
 0x2de   :  { %10811 = vmatpush3.bf16.msra.mxu1 %v11704_v22 }
 0x2df   :  { %10812 = vmatprep.subr.bf16.mxu1 %v11706_v24 }
 0x2e0   :  { %10791 = vmatpush3.bf16.msra.mxu0 %v11707_v25 }
 0x2e1   :  { %10820 = vmatprep.subr.bf16.mxu0 %v11709_v35 }
 0x2e2   :  { %10813 = vmatpush3.bf16.msra.mxu1 %v11708_v26 }
 0x2e3   :  { %8592 = vmatmul.mubr.bf16.vlgmr.msra.gmra.mxu0 %v9030_v31  ;;  %10842 = vmatprep.subr.bf16.mxu1 %v11710_v36 }
 0x2e4   :  { %10821 = vmatpush3.bf16.msra.mxu0 %v11711_v37 }
 0x2e5   :  { %8633 = vmatmul.mubr.bf16.vlgmr.msra.gmra.mxu1 %v9032_v33  ;;  %10822 = vmatprep.subr.bf16.mxu0 %v11713_v39 }
 0x2e6   :  { %10843 = vmatpush3.bf16.msra.mxu1 %v11712_v38 }
 0x2e7   :  { %10844 = vmatprep.subr.bf16.mxu1 %v11714_v40 }
 0x2e8   :  { %10823 = vmatpush3.bf16.msra.mxu0 %v11715_v41 }
 0x2e9   :  { %10824 = vmatprep.subr.bf16.mxu0 %v11717_v43 }
 0x2ea   :  { %10845 = vmatpush3.bf16.msra.mxu1 %v11716_v42 }
 0x2eb   :  { %10846 = vmatprep.subr.bf16.mxu1 %v11718_v44 }
 0x2ec   :  { %10825 = vmatpush3.bf16.msra.mxu0 %v11719_v45 }
 0x2ed   :  { %10826 = vmatprep.subr.bf16.mxu0 %v11721_v47 }
 0x2ee   :  { %10847 = vmatpush3.bf16.msra.mxu1 %v11720_v46 }
 0x2ef   :  { %10848 = vmatprep.subr.bf16.mxu1 %v11722_v48 }
 0x2f0   :  { %10827 = vmatpush3.bf16.msra.mxu0 %v11723_v49 }
 0x2f1   :  { %10828 = vmatprep.subr.bf16.mxu0 %v11725_v53 }
 0x2f2   :  { %10849 = vmatpush3.bf16.msra.mxu1 %v11724_v51 }
 0x2f3   :  { %10850 = vmatprep.subr.bf16.mxu1 %v11726_v54 }
 0x2f4   :  { %10829 = vmatpush3.bf16.msra.mxu0 %v11727_v56 }
 0x2f5   :  { %10830 = vmatprep.subr.bf16.mxu0 %v11729_v60 }
 0x2f6   :  { %10851 = vmatpush3.bf16.msra.mxu1 %v11728_v58 }
 0x2f7   :  { %10852 = vmatprep.subr.bf16.mxu1 %v11730_v61 }
 0x2f8   :  { %10831 = vmatpush3.bf16.msra.mxu0 %v11731_v62 }
 0x2f9   :  { %10832 = vmatprep.subr.bf16.mxu0 %v11733_v2 }
 0x2fa   :  { %10853 = vmatpush3.bf16.msra.mxu1 %v11732_v0 }
 0x2fb   :  { %10854 = vmatprep.subr.bf16.mxu1 %v11734_v3 }
 0x2fc   :  { %10833 = vmatpush3.bf16.msra.mxu0 %v11735_v4 }
 0x2fd   :  { %10834 = vmatprep.subr.bf16.mxu0 %v11737_v8 }
 0x2fe   :  { %10855 = vmatpush3.bf16.msra.mxu1 %v11736_v6 }
 0x2ff   :  { %10856 = vmatprep.subr.bf16.mxu1 %v11738_v9 }
 0x300   :  { %10835 = vmatpush3.bf16.msra.mxu0 %v11739_v11 }
 0x302   :  { %10857 = vmatpush3.bf16.msra.mxu1 %v11740_v13 }
 0x303   :  { %12 = vsyncpa [#allocation3], 0  ;;  %v14467_v21 = vpop.f32.mrf.mxu0  ;;  %v9036_v22 = vcombine.low %v75_v16, %v123_v20  ;;  %v9037_v23 = vcombine.high %v75_v16, %v123_v20  ;;  %8673 = vmatprep.mubr.bf16.mxu0 %v9035_v19  ;;  %v14469_v24 = vpop.f32.mrf.mxu1  ;;  %v8740_v48 = vld [vmem:[%s14827_s3 + $0x78] sm:$0xff]  ;;  %v8739_v49 = vld [vmem:[%s14827_s3 + $0x70] sm:$0xff] }
 0x304   :  { %8674 = vmatmul.mubr.bf16.vlgmr.msra.gmra.mxu0 %v9034_v18  ;;  %10900 = vmatprep.subr.mxu0 %v8740_v48  ;;  %v8738_v54 = vld [vmem:[%s14827_s3 + $0x68] sm:$0xff]  ;;  %v8737_v56 = vld [vmem:[%s14827_s3 + $0x60] sm:$0xff]  ;;  %v8736_v61 = vld [vmem:[%s14827_s3 + $0x58] sm:$0xff] }
 0x305   :  { %8714 = vmatprep.mubr.bf16.mxu1 %v9037_v23  ;;  %v14471_v25 = vpop.f32.mrf.mxu0  ;;  %v14473_v26 = vpop.f32.mrf.mxu1  ;;  %10901 = vmatpush3.msra.mxu0 %v8740_v48  ;;  %v8735_v0 = vld [vmem:[%s14827_s3 + $0x50] sm:$0xff]  ;;  %v8734_v3 = vld [vmem:[%s14827_s3 + $0x48] sm:$0xff]  ;;  %v8733_v8 = vld [vmem:[%s14827_s3 + $0x40] sm:$0xff] }
 0x306   :  { %8715 = vmatmul.mubr.bf16.vlgmr.msra.gmra.mxu1 %v9036_v22  ;;  %10902 = vmatprep.subr.mxu0 %v8739_v49  ;;  %v8732_v9 = vld [vmem:[%s14827_s3 + $0x38] sm:$0xff]  ;;  %v8731_v19 = vld [vmem:[%s14827_s3 + $0x30] sm:$0xff]  ;;  %v8730_v22 = vld [vmem:[%s14827_s3 + $0x28] sm:$0xff] }
 0x307   :  { %v14475_v27 = vpop.f32.mrf.mxu0  ;;  %v14479_v29 = vpop.f32.mrf.mxu1  ;;  %10903 = vmatpush3.msra.mxu0 %v8739_v49  ;;  %v8729_v48 = vld [vmem:[%s14827_s3 + $0x20] sm:$0xff] }
 0x308   :  { %10904 = vmatprep.subr.mxu0 %v8738_v54 }
 0x309   :  { %v14477_v28 = vpop.f32.mrf.mxu0  ;;  %v14481_v30 = vpop.f32.mrf.mxu1  ;;  %10905 = vmatpush3.msra.mxu0 %v8738_v54  ;;  %v8728_v54 = vld [vmem:[%s14827_s3 + $0x18] sm:$0xff] }
 0x30a   :  { %10906 = vmatprep.subr.mxu0 %v8737_v56 }
 0x30b   :  { %v14483_v31 = vpop.f32.mrf.mxu0  ;;  %v14485_v32 = vpop.f32.mrf.mxu1  ;;  %10907 = vmatpush3.msra.mxu0 %v8737_v56 }
 0x30c   :  { %10908 = vmatprep.subr.mxu0 %v8736_v61 }
 0x30d   :  { %v14487_v33 = vpop.f32.mrf.mxu0  ;;  %v14489_v34 = vpop.f32.mrf.mxu1  ;;  %10909 = vmatpush3.msra.mxu0 %v8736_v61  ;;  %v8727_v61 = vld [vmem:[%s14827_s3 + $0x10] sm:$0xff] }
 0x30e   :  { %10910 = vmatprep.subr.mxu0 %v8735_v0 }
 0x30f   :  { %v14491_v35 = vpop.f32.mrf.mxu0  ;;  %v14495_v37 = vpop.f32.mrf.mxu1  ;;  %10911 = vmatpush3.msra.mxu0 %v8735_v0 }
 0x310   :  { %10912 = vmatprep.subr.mxu0 %v8734_v3 }
 0x311   :  { %v14493_v36 = vpop.f32.mrf.mxu0  ;;  %v14497_v38 = vpop.f32.mrf.mxu1  ;;  %10913 = vmatpush3.msra.mxu0 %v8734_v3  ;;  %v8726_v3 = vld [vmem:[%s14827_s3 + $0x8] sm:$0xff] }
 0x312   :  { %10914 = vmatprep.subr.mxu0 %v8733_v8 }
 0x313   :  { %v14499_v39 = vpop.f32.mrf.mxu0  ;;  %v14501_v40 = vpop.f32.mrf.mxu1  ;;  %10915 = vmatpush3.msra.mxu0 %v8733_v8 }
 0x314   :  { %10916 = vmatprep.subr.mxu0 %v8732_v9 }
 0x315   :  { %v14503_v41 = vpop.f32.mrf.mxu0  ;;  %v14505_v42 = vpop.f32.mrf.mxu1  ;;  %10917 = vmatpush3.msra.mxu0 %v8732_v9  ;;  %v8725_v9 = vld [vmem:[%s14827_s3] sm:$0xff] }
 0x316   :  { %10918 = vmatprep.subr.mxu0 %v8731_v19 }
 0x317   :  { %v14507_v43 = vpop.f32.mrf.mxu0  ;;  %v14511_v45 = vpop.f32.mrf.mxu1  ;;  %10919 = vmatpush3.msra.mxu0 %v8731_v19 }
 0x318   :  { %10920 = vmatprep.subr.mxu0 %v8730_v22 }
 0x319   :  { %v14509_v44 = vpop.f32.mrf.mxu0  ;;  %v14513_v46 = vpop.f32.mrf.mxu1  ;;  %10921 = vmatpush3.msra.mxu0 %v8730_v22 }
 0x31a   :  { %10922 = vmatprep.subr.mxu0 %v8729_v48 }
 0x31b   :  { %v14515_v47 = vpop.f32.mrf.mxu0  ;;  %v14523_v51 = vpop.f32.mrf.mxu1  ;;  %10923 = vmatpush3.msra.mxu0 %v8729_v48  ;;  %v8840_v48 = vld [vmem:[%s14829_s5 + $0x78] sm:$0xff] }
 0x31c   :  { %10924 = vmatprep.subr.mxu0 %v8728_v54  ;;  %10935 = vmatprep.subr.mxu1 %v8840_v48 }
 0x31d   :  { %v14525_v53 = vpop.f32.mrf.mxu0  ;;  %v14533_v58 = vpop.f32.mrf.mxu1  ;;  %10925 = vmatpush3.msra.mxu0 %v8728_v54  ;;  %v8839_v54 = vld [vmem:[%s14829_s5 + $0x70] sm:$0xff]  ;;  %10936 = vmatpush3.msra.mxu1 %v8840_v48  ;;  %v8836_v48 = vld [vmem:[%s14829_s5 + $0x58] sm:$0xff] }
 0x31e   :  { %10926 = vmatprep.subr.mxu0 %v8727_v61  ;;  %10937 = vmatprep.subr.mxu1 %v8839_v54 }
 0x31f   :  { %v14535_v60 = vpop.f32.mrf.mxu0  ;;  %v14545_v2 = vpop.f32.mrf.mxu1  ;;  %10927 = vmatpush3.msra.mxu0 %v8727_v61  ;;  %10938 = vmatpush3.msra.mxu1 %v8839_v54  ;;  %v8835_v54 = vld [vmem:[%s14829_s5 + $0x50] sm:$0xff] }
 0x320   :  { %10928 = vmatprep.subr.mxu0 %v8726_v3 }
 0x321   :  { %v14540_v62 = vpop.f32.mrf.mxu0  ;;  %v14550_v4 = vpop.f32.mrf.mxu1  ;;  %10929 = vmatpush3.msra.mxu0 %v8726_v3  ;;  %v8838_v3 = vld [vmem:[%s14829_s5 + $0x68] sm:$0xff] }
 0x322   :  { %10930 = vmatprep.subr.mxu0 %v8725_v9  ;;  %10939 = vmatprep.subr.mxu1 %v8838_v3 }
 0x323   :  { %v14552_v6 = vpop.f32.mrf.mxu0  ;;  %v14560_v11 = vpop.f32.mrf.mxu1  ;;  %10931 = vmatpush3.msra.mxu0 %v8725_v9  ;;  %v8837_v9 = vld [vmem:[%s14829_s5 + $0x60] sm:$0xff]  ;;  %10940 = vmatpush3.msra.mxu1 %v8838_v3  ;;  %v8834_v3 = vld [vmem:[%s14829_s5 + $0x48] sm:$0xff] }
 0x324   :  { %10941 = vmatprep.subr.mxu1 %v8837_v9 }
 0x325   :  { %v14562_v13 = vpop.f32.mrf.mxu0  ;;  %v14564_v14 = vpop.f32.mrf.mxu1  ;;  %10942 = vmatpush3.msra.mxu1 %v8837_v9  ;;  %v8833_v9 = vld [vmem:[%s14829_s5 + $0x40] sm:$0xff] }
 0x326   :  { %10943 = vmatprep.subr.mxu1 %v8836_v48 }
 0x327   :  { %v14566_v15 = vpop.f32.mrf.mxu0  ;;  %v14570_v18 = vpop.f32.mrf.mxu1  ;;  %10944 = vmatpush3.msra.mxu1 %v8836_v48  ;;  %v8832_v48 = vld [vmem:[%s14829_s5 + $0x38] sm:$0xff] }
 0x328   :  { %10945 = vmatprep.subr.mxu1 %v8835_v54 }
 0x329   :  { %v14568_v16 = vpop.f32.mrf.mxu0  ;;  %v14575_v20 = vpop.f32.mrf.mxu1  ;;  %10946 = vmatpush3.msra.mxu1 %v8835_v54  ;;  %v8831_v54 = vld [vmem:[%s14829_s5 + $0x30] sm:$0xff] }
 0x32a   :  { %10947 = vmatprep.subr.mxu1 %v8834_v3 }
 0x32b   :  { %v14580_v23 = vpop.f32.mrf.mxu0  ;;  %v14585_v49 = vpop.f32.mrf.mxu1  ;;  %10948 = vmatpush3.msra.mxu1 %v8834_v3  ;;  %v8830_v3 = vld [vmem:[%s14829_s5 + $0x28] sm:$0xff] }
 0x32c   :  { %10949 = vmatprep.subr.mxu1 %v8833_v9 }
 0x32d   :  { %v14590_v56 = vpop.f32.mrf.mxu0  ;;  %v14595_v0 = vpop.f32.mrf.mxu1  ;;  %10950 = vmatpush3.msra.mxu1 %v8833_v9  ;;  %v8829_v9 = vld [vmem:[%s14829_s5 + $0x20] sm:$0xff] }
 0x32e   :  { %14832 = vst [vmem:[#allocation5_spill] sm:$0xff] %v14595_v0  ;;  %10951 = vmatprep.subr.mxu1 %v8832_v48 }
 0x32f   :  { %v14600_v8 = vpop.f32.mrf.mxu0  ;;  %v14607_v22 = vpop.f32.mrf.mxu1  ;;  %10952 = vmatpush3.msra.mxu1 %v8832_v48  ;;  %v10178_v48 = vadd.f32 %v14403_v59, %v14387_v52  ;;  %v10222_v52 = vadd.f32 %v14467_v21, %v14443_v10  ;;  %v10266_v21 = vadd.f32 %v14483_v31, %v14477_v28  ;;  %v10310_v28 = vadd.f32 %v14499_v39, %v14493_v36 }
 0x330   :  { %14833 = vst [vmem:[#allocation6_spill] sm:$0xff] %v14600_v8  ;;  %14835 = vst [vmem:[#allocation8_spill] sm:$0xff] %v14607_v22  ;;  %10953 = vmatprep.subr.mxu1 %v8831_v54  ;;  %v10354_v36 = vadd.f32 %v14515_v47, %v14509_v44  ;;  %v10398_v47 = vadd.f32 %v14552_v6, %v14540_v62  ;;  %v10442_v6 = vadd.f32 %v14580_v23, %v14568_v16 }
 0x331   :  { %v14605_v19 = vpop.f32.mrf.mxu0  ;;  %v14615_v61 = vpop.f32.mrf.mxu1  ;;  %10954 = vmatpush3.msra.mxu1 %v8831_v54  ;;  %v7446_v54 = vadd.f32 %v10178_v48, %v13374_v50  ;;  %v10203_v50 = vadd.f32 %v14448_v12, %v14430_v5  ;;  %v10247_v12 = vadd.f32 %v14479_v29, %v14473_v26  ;;  %v10291_v29 = vadd.f32 %v14495_v37, %v14489_v34 }
 0x332   :  { %14834 = vst [vmem:[#allocation7_spill] sm:$0xff] %v14605_v19  ;;  %14836 = vst [vmem:[#allocation9_spill] sm:$0xff] %v14615_v61  ;;  %10955 = vmatprep.subr.mxu1 %v8830_v3  ;;  %v10335_v34 = vadd.f32 %v14511_v45, %v14505_v42  ;;  %v10379_v45 = vadd.f32 %v14545_v2, %v14533_v58  ;;  %v10423_v58 = vadd.f32 %v14570_v18, %v14564_v14 }
 0x333   :  { %v14620_v0 = vpop.f32.mrf.mxu0  ;;  %v14625_v22 = vpop.f32.mrf.mxu1  ;;  %10956 = vmatpush3.msra.mxu1 %v8830_v3 }
 0x334   :  { %14837 = vst [vmem:[#allocation10_spill] sm:$0xff] %v14620_v0  ;;  %14838 = vst [vmem:[#allocation11_spill] sm:$0xff] %v14625_v22  ;;  %10957 = vmatprep.subr.mxu1 %v8829_v9 }
 0x335   :  { %v14630_v61 = vpop.f32.mrf.mxu0  ;;  %v14635_v0 = vpop.f32.mrf.mxu1  ;;  %10958 = vmatpush3.msra.mxu1 %v8829_v9 }
 0x336   :  { %14839 = vst [vmem:[#allocation12_spill] sm:$0xff] %v14630_v61  ;;  %14840 = vst [vmem:[#allocation13_spill] sm:$0xff] %v14635_v0 }
 0x337   :  { %v14640_v22 = vpop.f32.mrf.mxu0  ;;  %v14647_v19 = vpop.f32.mrf.mxu1 }
 0x338   :  { %14841 = vst [vmem:[#allocation14_spill] sm:$0xff] %v14640_v22  ;;  %14843 = vst [vmem:[#allocation16_spill] sm:$0xff] %v14647_v19 }
 0x339   :  { %v14645_v61 = vpop.f32.mrf.mxu0  ;;  %v14652_v0 = vpop.f32.mrf.mxu1  ;;  %v14855_v18 = vld [vmem:[#allocation9_spill] sm:$0xff] }
 0x33a   :  { %14842 = vst [vmem:[#allocation15_spill] sm:$0xff] %v14645_v61  ;;  %14844 = vst [vmem:[#allocation17_spill] sm:$0xff] %v14652_v0 }
 0x33b   :  { %v14657_v22 = vpop.f32.mrf.mxu0  ;;  %v14662_v19 = vpop.f32.mrf.mxu1 }
 0x33c   :  { %14845 = vst [vmem:[#allocation18_spill] sm:$0xff] %v14657_v22  ;;  %14846 = vst [vmem:[#allocation19_spill] sm:$0xff] %v14662_v19  ;;  %v10200_v19 = vadd.f32 %v14414_v63, %v14398_v57  ;;  %v10244_v57 = vadd.f32 %v14469_v24, %v14462_v17  ;;  %v10225_v63 = vadd.f32 %v14475_v27, %v14471_v25 }
 0x33d   :  { %v14667_v0 = vpop.f32.mrf.mxu0  ;;  %v14671_v22 = vpop.f32.mrf.mxu1  ;;  %v10288_v24 = vadd.f32 %v14485_v32, %v14481_v30  ;;  %v10269_v25 = vadd.f32 %v14491_v35, %v14487_v33  ;;  %v10332_v32 = vadd.f32 %v14501_v40, %v14497_v38  ;;  %v10313_v33 = vadd.f32 %v14507_v43, %v14503_v41 }
 0x33e   :  { %14847 = vst [vmem:[#allocation20_spill] sm:$0xff] %v14667_v0  ;;  %14848 = vst [vmem:[#allocation21_spill] sm:$0xff] %v14671_v22  ;;  %v10181_v0 = vadd.f32 %v14435_v7, %v14419_v1  ;;  %v7487_v22 = vadd.f32 %v10200_v19, %v7446_v54  ;;  %v10376_v38 = vadd.f32 %v14523_v51, %v14513_v46 }
 0x33f   :  { %v14673_v61 = vpop.f32.mrf.mxu0  ;;  %v14682_v3 = vpop.f32.mrf.mxu1  ;;  %v10357_v40 = vadd.f32 %v14535_v60, %v14525_v53  ;;  %v10420_v51 = vadd.f32 %v14560_v11, %v14550_v4  ;;  %v10401_v53 = vadd.f32 %v14566_v15, %v14562_v13  ;;  %v10464_v4 = vadd.f32 %v14585_v49, %v14575_v20  ;;  %v14850_v11 = vld [vmem:[#allocation6_spill] sm:$0xff]  ;;  %v14857_v20 = vld [vmem:[#allocation12_spill] sm:$0xff] }
 0x340   :  { %v7528_v48 = vadd.f32 %v10222_v52, %v7487_v22  ;;  %v10445_v13 = vadd.f32 %v14850_v11, %v14590_v56  ;;  %v14858_v49 = vld [vmem:[#allocation14_spill] sm:$0xff] }
 0x341   :  { %v14675_v8 = vpop.f32.mrf.mxu0  ;;  %v14686_v59 = vpop.f32.mrf.mxu1 }
 0x342   :  { %14849 = vst [vmem:[#allocation22_spill] sm:$0xff] %v14675_v8  ;;  %v7449_v8 = vadd.f32 %v10181_v0, %v13386_v55  ;;  %v7569_v19 = vadd.f32 %v10244_v57, %v7528_v48 }
 0x343   :  { %v14688_v9 = vpop.f32.mrf.mxu0  ;;  %v14697_v1 = vpop.f32.mrf.mxu1 }
 0x344   :  { %v7490_v10 = vadd.f32 %v10203_v50, %v7449_v8  ;;  %v7610_v17 = vadd.f32 %v10266_v21, %v7569_v19 }
 0x345   :  { %v14699_v7 = vpop.f32.mrf.mxu0  ;;  %v14703_v0 = vpop.f32.mrf.mxu1 }
 0x346   :  { %v7531_v55 = vadd.f32 %v10225_v63, %v7490_v10  ;;  %v7651_v22 = vadd.f32 %v10288_v24, %v7610_v17 }
 0x347   :  { %v14705_v5 = vpop.f32.mrf.mxu0  ;;  %v14717_v31 = vpop.f32.mrf.mxu1 }
 0x348   :  { %v7572_v8 = vadd.f32 %v10247_v12, %v7531_v55  ;;  %v7692_v30 = vadd.f32 %v10310_v28, %v7651_v22 }
 0x349   :  { %v14713_v27 = vpop.f32.mrf.mxu0  ;;  %v14719_v52 = vpop.f32.mrf.mxu1  ;;  %v14866_v11 = vld [vmem:[#allocation22_spill] sm:$0xff] }
 0x34a   :  { %v7613_v54 = vadd.f32 %v10269_v25, %v7572_v8  ;;  %v7733_v48 = vadd.f32 %v10332_v32, %v7692_v30  ;;  %v14851_v25 = vld [vmem:[#allocation7_spill] sm:$0xff]  ;;  %v14852_v8 = vld [vmem:[#allocation10_spill] sm:$0xff]  ;;  %v14853_v30 = vld [vmem:[#allocation5_spill] sm:$0xff] }
 0x34b   :  { %v14721_v26 = vpop.f32.mrf.mxu0  ;;  %v14731_v39 = vpop.f32.mrf.mxu1  ;;  %v10486_v28 = vadd.f32 %v14852_v8, %v14851_v25  ;;  %v14854_v32 = vld [vmem:[#allocation8_spill] sm:$0xff] }
 0x34c   :  { %v7654_v35 = vadd.f32 %v10291_v29, %v7613_v54  ;;  %v7774_v37 = vadd.f32 %v10354_v36, %v7733_v48  ;;  %v10489_v48 = vadd.f32 %v14858_v49, %v14857_v20 }
 0x34d   :  { %v14733_v50 = vpop.f32.mrf.mxu0  ;;  %v14741_v41 = vpop.f32.mrf.mxu1 }
 0x34e   :  { %v7695_v57 = vadd.f32 %v10313_v33, %v7654_v35  ;;  %v7815_v10 = vadd.f32 %v10376_v38, %v7774_v37  ;;  %v10467_v33 = vadd.f32 %v14854_v32, %v14853_v30  ;;  %v14856_v35 = vld [vmem:[#allocation11_spill] sm:$0xff]  ;;  %v14860_v37 = vld [vmem:[#allocation18_spill] sm:$0xff]  ;;  %v10596_v32 = vadd.f32 %v14697_v1, %v14686_v59 }
 0x34f   :  { %v14743_v43 = vpop.f32.mrf.mxu0  ;;  %v14749_v42 = vpop.f32.mrf.mxu1  ;;  %v10508_v36 = vadd.f32 %v14856_v35, %v14855_v18  ;;  %v10618_v18 = vadd.f32 %v14721_v26, %v14713_v27  ;;  %v10640_v59 = vadd.f32 %v14731_v39, %v14719_v52 }
 0x350   :  { %v7736_v44 = vadd.f32 %v10335_v34, %v7695_v57  ;;  %v7856_v46 = vadd.f32 %v10398_v47, %v7815_v10  ;;  %v14859_v34 = vld [vmem:[#allocation15_spill] sm:$0xff]  ;;  %v10621_v1 = vadd.f32 %v14743_v43, %v14733_v50 }
 0x351   :  { %v14747_v63 = vpop.f32.mrf.mxu0  ;;  %v14757_v60 = vpop.f32.mrf.mxu1  ;;  %v10530_v38 = vadd.f32 %v14860_v37, %v14859_v34  ;;  %v10643_v37 = vadd.f32 %v14749_v42, %v14741_v41 }
 0x352   :  { %v7777_v21 = vadd.f32 %v10357_v40, %v7736_v44  ;;  %v7897_v55 = vadd.f32 %v10420_v51, %v7856_v46 }
 0x353   :  { %v10661_v19 = vpop.f32.mrf.mxu0  ;;  %v10683_v17 = vpop.f32.mrf.mxu1 }
 0x354   :  { %v7818_v62 = vadd.f32 %v10379_v45, %v7777_v21  ;;  %v7938_v2 = vadd.f32 %v10442_v6, %v7897_v55  ;;  %v14861_v21 = vld [vmem:[#allocation13_spill] sm:$0xff]  ;;  %v14862_v45 = vld [vmem:[#allocation16_spill] sm:$0xff] }
 0x355   :  { %v10663_v24 = vpop.f32.mrf.mxu0  ;;  %v10685_v22 = vpop.f32.mrf.mxu1  ;;  %v10511_v46 = vadd.f32 %v14862_v45, %v14861_v21  ;;  %v14865_v55 = vld [vmem:[#allocation20_spill] sm:$0xff] }
 0x356   :  { %v7859_v12 = vadd.f32 %v10401_v53, %v7818_v62  ;;  %v7979_v23 = vadd.f32 %v10464_v4, %v7938_v2  ;;  %v14863_v53 = vld [vmem:[#allocation17_spill] sm:$0xff]  ;;  %v14864_v62 = vld [vmem:[#allocation19_spill] sm:$0xff] }
 0x357   :  { %v10664_v16 = vpop.f32.mrf.mxu0  ;;  %v10686_v56 = vpop.f32.mrf.mxu1  ;;  %v10552_v6 = vadd.f32 %v14864_v62, %v14863_v53 }
 0x358   :  { %v7900_v15 = vadd.f32 %v10423_v58, %v7859_v12  ;;  %v8020_v14 = vadd.f32 %v10486_v28, %v7979_v23  ;;  %v10533_v12 = vadd.f32 %v14673_v61, %v14865_v55  ;;  %v14867_v23 = vld [vmem:[#allocation21_spill] sm:$0xff]  ;;  %v10577_v61 = vadd.f32 %v14705_v5, %v14699_v7 }
 0x359   :  { %v10662_v5 = vadd.f32 %v10661_v19, %v14747_v63  ;;  %v10687_v63 = vadd.f32 %v10686_v56, %v10685_v22 }
 0x35a   :  { %v7941_v54 = vadd.f32 %v10445_v13, %v7900_v15  ;;  %v8061_v47 = vadd.f32 %v10508_v36, %v8020_v14  ;;  %v10574_v13 = vadd.f32 %v14688_v9, %v14866_v11 }
 0x35c   :  { %v7982_v57 = vadd.f32 %v10467_v33, %v7941_v54  ;;  %v8102_v51 = vadd.f32 %v10530_v38, %v8061_v47  ;;  %v10555_v54 = vadd.f32 %v14682_v3, %v14867_v23  ;;  %v10599_v3 = vadd.f32 %v14717_v31, %v14703_v0 }
 0x35d   :  { %v10684_v0 = vadd.f32 %v10683_v17, %v14757_v60  ;;  %v10665_v31 = vadd.f32 %v10664_v16, %v10663_v24 }
 0x35e   :  { %v8023_v10 = vadd.f32 %v10489_v48, %v7982_v57  ;;  %v8143_v15 = vadd.f32 %v10552_v6, %v8102_v51 }
 0x360   :  { %v8064_v4 = vadd.f32 %v10511_v46, %v8023_v10  ;;  %v8184_v30 = vadd.f32 %v10574_v13, %v8143_v15 }
 0x362   :  { %v8105_v25 = vadd.f32 %v10533_v12, %v8064_v4  ;;  %v8225_v35 = vadd.f32 %v10596_v32, %v8184_v30 }
 0x363   :  { %v10704_v29 = vpop.f32.mrf.mxu0 }
 0x364   :  { %v8146_v14 = vadd.f32 %v10555_v54, %v8105_v25  ;;  %v8266_v48 = vadd.f32 %v10618_v18, %v8225_v35 }
 0x365   :  { %v10726_v40 = vpop.f32.mrf.mxu1  ;;  %v10705_v44 = vpop.f32.mrf.mxu0 }
 0x366   :  { %v8187_v36 = vadd.f32 %v10577_v61, %v8146_v14  ;;  %v8307_v26 = vadd.f32 %v10640_v59, %v8266_v48  ;;  %v10706_v39 = vadd.f32 %v10705_v44, %v10704_v29 }
 0x367   :  { %v10727_v58 = vpop.f32.mrf.mxu1  ;;  %v10707_v2 = vpop.f32.mrf.mxu0 }
 0x368   :  { %v8228_v7 = vadd.f32 %v10599_v3, %v8187_v36  ;;  %v8348_v38 = vadd.f32 %v10662_v5, %v8307_v26  ;;  %v10728_v46 = vadd.f32 %v10727_v58, %v10726_v40  ;;  %v8828_v26 = vld [vmem:[%s14829_s5 + $0x18] sm:$0xff] }
 0x369   :  { %v10729_v8 = vpop.f32.mrf.mxu1  ;;  %v10708_v28 = vpop.f32.mrf.mxu0  ;;  %10959 = vmatprep.subr.mxu1 %v8828_v26 }
 0x36a   :  { %v8269_v34 = vadd.f32 %v10621_v1, %v8228_v7  ;;  %v8389_v50 = vadd.f32 %v10684_v0, %v8348_v38  ;;  %v10709_v51 = vadd.f32 %v10708_v28, %v10707_v2  ;;  %10960 = vmatpush3.msra.mxu1 %v8828_v26  ;;  %v8825_v38 = vld [vmem:[%s14829_s5] sm:$0xff] }
 0x36b   :  { %v10730_v9 = vpop.f32.mrf.mxu1  ;;  %v9806_v0 = vld [vmem:[%s14828_s4] ss:$0 sm:$0xff] }
 0x36c   :  { %v8310_v52 = vadd.f32 %v10643_v37, %v8269_v34  ;;  %v8430_v19 = vadd.f32 %v10706_v39, %v8389_v50  ;;  %v10731_v24 = vadd.f32 %v10730_v9, %v10729_v8  ;;  %v8827_v34 = vld [vmem:[%s14829_s5 + $0x10] sm:$0xff]  ;;  %v8826_v37 = vld [vmem:[%s14829_s5 + $0x8] sm:$0xff]  ;;  %v9807_v50 = vld [vmem:[%s14830_s6] ss:$0 sm:$0xff]  ;;  %s11763_s5 = smov [#allocation2]  }
 0x36d   :  { %10961 = vmatprep.subr.mxu1 %v8827_v34  ;;  %s8930_s13 = sshll.u32 %s11763_s5, 4  ;;  %s8931_s13 = int_to_ptr.vmem [resolvable:$true] %s8930_s13 }
 0x36e   :  { %v8351_v43 = vadd.f32 %v10665_v31, %v8310_v52  ;;  %v8471_v42 = vadd.f32 %v10728_v46, %v8430_v19  ;;  %10962 = vmatpush3.msra.mxu1 %v8827_v34  ;;  %s11741_s4 = scalar_lea.vmem %s8931_s13, 256  ;;  %p11746_p1 = scmp.lt.s32.totalorder %s8931_s13, %s8931_s13 }
 0x36f   :  { %10963 = vmatprep.subr.mxu1 %v8826_v37  ;;  %p11742_p0 = scmp.ne.s32.totalorder %s8931_s13, %s11741_s4  ;;  %p11747_p2 = scmp.lt.s32.totalorder %s11741_s4, %s11741_s4 }
 0x370   :  { %v8392_v6 = vadd.f32 %v10687_v63, %v8351_v43  ;;  %10964 = vmatpush3.msra.mxu1 %v8826_v37 }
 0x371   :  { %10965 = vmatprep.subr.mxu1 %v8825_v38  ;;  %p11748_p3 = por %p11747_p2, %p11746_p1 }
 0x372   :  { %v8433_v55 = vadd.f32 %v10709_v51, %v8392_v6  ;;  %10966 = vmatpush3.msra.mxu1 %v8825_v38 }
 0x373   :  { %p11749_p4 = pnand %p11748_p3, %p11742_p0 }
 0x374   :  { %v8474_v44 = vadd.f32 %v10731_v24, %v8433_v55 }
 0x383   :  { %v10748_v33 = vpop.f32.mrf.mxu0 }
 0x385   :  { %v10770_v20 = vpop.f32.mrf.mxu1  ;;  %v10749_v49 = vpop.f32.mrf.mxu0 }
 0x386   :  { %v10750_v41 = vadd.f32 %v10749_v49, %v10748_v33 }
 0x387   :  { %v10771_v57 = vpop.f32.mrf.mxu1  ;;  %v10751_v27 = vpop.f32.mrf.mxu0 }
 0x388   :  { %v8512_v16 = vadd.f32 %v10750_v41, %v8471_v42  ;;  %v10772_v12 = vadd.f32 %v10771_v57, %v10770_v20 }
 0x389   :  { %v10773_v47 = vpop.f32.mrf.mxu1  ;;  %v10752_v10 = vpop.f32.mrf.mxu0 }
 0x38a   :  { %v10753_v29 = vadd.f32 %v10752_v10, %v10751_v27  ;;  %v8553_v22 = vadd.f32 %v10772_v12, %v8512_v16 }
 0x38b   :  { %v10774_v45 = vpop.f32.mrf.mxu1 }
 0x38c   :  { %v8515_v56 = vadd.f32 %v10753_v29, %v8474_v44  ;;  %v10775_v40 = vadd.f32 %v10774_v45, %v10773_v47 }
 0x38e   :  { %v8556_v23 = vadd.f32 %v10775_v40, %v8515_v56 }
 0x3a3   :  { %v10792_v21 = vpop.f32.mrf.mxu0 }
 0x3a5   :  { %v10814_v53 = vpop.f32.mrf.mxu1  ;;  %v10793_v62 = vpop.f32.mrf.mxu0 }
 0x3a6   :  { %v10794_v4 = vadd.f32 %v10793_v62, %v10792_v21 }
 0x3a7   :  { %v10815_v60 = vpop.f32.mrf.mxu1  ;;  %v10795_v17 = vpop.f32.mrf.mxu0 }
 0x3a8   :  { %v8594_v58 = vadd.f32 %v10794_v4, %v8553_v22  ;;  %v10816_v2 = vadd.f32 %v10815_v60, %v10814_v53 }
 0x3a9   :  { %v10817_v11 = vpop.f32.mrf.mxu1  ;;  %v10796_v13 = vpop.f32.mrf.mxu0 }
 0x3aa   :  { %v10797_v15 = vadd.f32 %v10796_v13, %v10795_v17  ;;  %v8635_v32 = vadd.f32 %v10816_v2, %v8594_v58 }
 0x3ab   :  { %v10818_v25 = vpop.f32.mrf.mxu1 }
 0x3ac   :  { %v8597_v8 = vadd.f32 %v10797_v15, %v8556_v23  ;;  %v10819_v18 = vadd.f32 %v10818_v25, %v10817_v11 }
 0x3ae   :  { %v8638_v49 = vadd.f32 %v10819_v18, %v8597_v8 }
 0x3c4   :  { %v10836_v28 = vpop.f32.mrf.mxu0 }
 0x3c6   :  { %v10858_v54 = vpop.f32.mrf.mxu1  ;;  %v10837_v30 = vpop.f32.mrf.mxu0 }
 0x3c7   :  { %v10838_v61 = vadd.f32 %v10837_v30, %v10836_v28 }
 0x3c8   :  { %v10859_v33 = vpop.f32.mrf.mxu1  ;;  %v10839_v14 = vpop.f32.mrf.mxu0 }
 0x3c9   :  { %v8676_v9 = vadd.f32 %v10838_v61, %v8635_v32  ;;  %v10860_v35 = vadd.f32 %v10859_v33, %v10858_v54 }
 0x3ca   :  { %v10861_v36 = vpop.f32.mrf.mxu1  ;;  %v10840_v20 = vpop.f32.mrf.mxu0 }
 0x3cb   :  { %v8717_v3 = vadd.f32 %v10860_v35, %v8676_v9  ;;  %v10841_v48 = vadd.f32 %v10840_v20, %v10839_v14 }
 0x3cc   :  { %v10862_v59 = vpop.f32.mrf.mxu1 }
 0x3cd   :  { %v8723_v1 = vmax.f32 %v8717_v3, 0.0  ;;  %v8679_v7 = vadd.f32 %v10841_v48, %v8638_v49  ;;  %v10863_v5 = vadd.f32 %v10862_v59, %v10861_v36 }
 0x3cf   :  { %v8720_v57 = vadd.f32 %v10863_v5, %v8679_v7  ;;  %10932 = vmatprep.mubr.f32.mxu0 %v8723_v1 }
 0x3d1   :  { %v8724_v27 = vmax.f32 %v8720_v57, 0.0 }
 0x3d3   :  { %10933 = vmatmul.mubr.f32.vlgmr.msra.gmra.mxu0 %v8724_v27 }
 0x493   :  { %v10934_v31 = vpop.f32.mrf.mxu0 }
 0x494   :  { %v8820_v47 = vadd.f32 %v10934_v31, %v9806_v0 }
 0x495   :  { %v8814_v10 = vpop.f32.mrf.mxu0 }
 0x496   :  { %v8815_v52 = vadd.f32 %v9806_v0, %v8814_v10  ;;  %v8824_v21 = vmax.f32 %v8820_v47, 0.0 }
 0x498   :  { %v8823_v39 = vmax.f32 %v8815_v52, 0.0 }
 0x49a   :  { %10967 = vmatprep.mubr.f32.mxu1 %v8823_v39 }
 0x49b   :  { %10968 = vmatmul.mubr.f32.vlgmr.msra.gmra.mxu1 %v8824_v21 }
 0x55b   :  { %v10969_v43 = vpop.f32.mrf.mxu1 }
 0x55c   :  { %v8920_v45 = vadd.f32 %v10969_v43, %v9807_v50 }
 0x55d   :  { %v8914_v63 = vpop.f32.mrf.mxu1 }
 0x55e   :  { %8924 = vst [vmem:[#allocation2 + $0x8] sm:$0xff] %v8920_v45  ;;  %v8915_v19 = vadd.f32 %v9807_v50, %v8914_v63 }
 0x560   :  { %8923 = vst [vmem:[#allocation2] sm:$0xff] %v8915_v19 }
 0x561   :  { %11752 = shalt.err (!%p11749_p4)
}
 0x562   :  { %s11764_s14 = smov 128   ;;  %s11765_s2 = smov 8  }
 0x563   :  { %8936 = dma.vmem_to_hbm [thread:$0]  %s8931_s13, 256, %s14831_s7, [#allocation3], %s11764_s14, %s11764_s14, %s11765_s2  }
 0x564   :  { %11761 = dma.done.wait [#allocation3], 256  }
 0x565   :  { %11762 = vsyncadd [#allocation3], 4294967040 }
 0x566   :  { %8940 = vsyncpa [#allocation3], 1 }

</bundles_post_ra>
